<compile_context>
chip_gen: v6e
topology: v6e:2x2x1
jax: 0.10.0
libtpu: 0.0.40
codegen_flags: <defaults>
</compile_context>

<pallas_src>
import jax
import jax.numpy as jnp
import numpy as np
from jax import lax
from jax.experimental import pallas as pl
from jax.experimental.pallas import tpu as pltpu


def _spd_logmap_kernel(u_ref, s_ref, o_ref):
    # u_ref: (TB, N, N) eigenvectors, s_ref: (TB, 1, N) eigenvalues,
    # o_ref: (TB, N, N) output.
    u = u_ref[...]                       # (TB, N, N)
    log_s = jnp.log(s_ref[...])          # (TB, 1, N)  -- EUP log
    # u @ diag(log s): scale the columns of u by log s (broadcast over rows).
    scaled = u * log_s                   # (TB, N, N)
    # Batched (scaled) @ u^T without materializing the transpose:
    #   out[b, i, k] = sum_j scaled[b, i, j] * u[b, k, j]
    out = lax.dot_general(
        scaled,
        u,
        dimension_numbers=(((2,), (2,)), ((0,), (0,))),
        preferred_element_type=jnp.float32,
    )
    o_ref[...] = out.astype(o_ref.dtype)


def spd_log_map(x, block_b=256):
    """x: (B, N, N) batch of SPD matrices (float32). Returns log_m(x)."""
    B, N, _ = x.shape

    # TODO(synk): torch.symeig / symmetric eigendecomposition has no Pallas
    # equivalent; computed here with jnp.linalg.eigh (glue), rest in-kernel.
    s, u = jnp.linalg.eigh(x)            # s: (B, N) ascending, u: (B, N, N)

    # Guard against tiny nonpositive eigenvalues from rounding on
    # ill-conditioned SPD inputs (would otherwise give NaN/-inf in the log).
    s = jnp.maximum(s, jnp.finfo(s.dtype).tiny)

    # Batch tile size: amortize per-grid-step overhead, sized against v7x's
    # 64 MiB VMEM (3 arrays x 2 pipeline buffers x TB*N*N*4 bytes << 24 MiB).
    TB = min(block_b, B)
    n_blocks = pl.cdiv(B, TB)
    Bp = n_blocks * TB

    if Bp != B:
        # Pad the batch with identity eigen-systems (u=I, s=1 -> log=0) so the
        # grid divides evenly; padded results are sliced off below.
        pad = Bp - B
        u = jnp.concatenate(
            [u, jnp.broadcast_to(jnp.eye(N, dtype=u.dtype), (pad, N, N))], axis=0
        )
        s = jnp.concatenate([s, jnp.ones((pad, N), dtype=s.dtype)], axis=0)

    s3 = s.reshape(Bp, 1, N)             # (Bp, 1, N) so block dims match full dims

    out = pl.pallas_call(
        _spd_logmap_kernel,
        out_shape=jax.ShapeDtypeStruct((Bp, N, N), x.dtype),
        grid_spec=pl.GridSpec(
            grid=(n_blocks,),
            in_specs=[
                pl.BlockSpec((TB, N, N), lambda b: (b, 0, 0)),
                pl.BlockSpec((TB, 1, N), lambda b: (b, 0, 0)),
            ],
            out_specs=pl.BlockSpec((TB, N, N), lambda b: (b, 0, 0)),
        ),
        compiler_params=pltpu.CompilerParams(
            dimension_semantics=("parallel",),
        ),
    )(u, s3)

    return out[:B]


if __name__ == "__main__":
    B, N = 96, 32
    key = jax.random.PRNGKey(0)
    a = jax.random.normal(key, (B, N, N), dtype=jnp.float32)
    # Deterministic SPD inputs: A A^T + N * I  (strictly positive definite)
    x = a @ jnp.swapaxes(a, -1, -2) + N * jnp.eye(N, dtype=jnp.float32)[None]

    out = spd_log_map(x, block_b=64)     # grid of 2 blocks of 64 (B padded 96->128)
    out = jax.block_until_ready(out)

    # Reference (same math in plain JAX) for a sanity check.
    s_ref, u_ref = jnp.linalg.eigh(x)
    ref = (u_ref * jnp.log(s_ref)[..., None, :]) @ jnp.swapaxes(u_ref, -1, -2)
    assert np.allclose(np.asarray(out), np.asarray(ref), atol=1e-4, rtol=1e-4)

    print("KERNEL_OK")
</pallas_src>

<mosaic_0001>
module attributes {stable_mosaic.version = 11 : i64} {
  func.func @_spd_logmap_kernel(%arg0: i32, %arg1: memref<64x32x32xf32, #tpu.memory_space<vmem>>, %arg2: memref<64x1x32xf32, #tpu.memory_space<vmem>>, %arg3: memref<64x32x32xf32, #tpu.memory_space<vmem>>) attributes {dimension_semantics = [#tpu.dimension_semantics<parallel>], iteration_bounds = array<i64: 2>, scalar_prefetch = 0 : i64, scratch_operands = 0 : i64, tpu.core_type = #tpu.core_type<tc>, window_params = [{transform_indices = @transform_0, window_bounds = array<i64: 64, 32, 32>}, {transform_indices = @transform_1, window_bounds = array<i64: 64, 1, 32>}, {transform_indices = @transform_2, window_bounds = array<i64: 64, 32, 32>}]} {
    %c0 = arith.constant 0 : index
    %c0_0 = arith.constant 0 : index
    %c0_1 = arith.constant 0 : index
    %0 = vector.load %arg1[%c0, %c0_0, %c0_1] : memref<64x32x32xf32, #tpu.memory_space<vmem>>, vector<64x32x32xf32>
    %c0_2 = arith.constant 0 : index
    %c0_3 = arith.constant 0 : index
    %c0_4 = arith.constant 0 : index
    %1 = vector.load %arg2[%c0_2, %c0_3, %c0_4] : memref<64x1x32xf32, #tpu.memory_space<vmem>>, vector<64x1x32xf32>
    %2 = math.log %1 : vector<64x1x32xf32>
    %3 = vector.broadcast %2 : vector<64x1x32xf32> to vector<64x32x32xf32>
    %4 = arith.mulf %0, %3 : vector<64x32x32xf32>
    %cst = arith.constant dense<0.000000e+00> : vector<64x32x32xf32>
    %5 = tpu.matmul %4, %0, %cst {dimension_numbers = #tpu.dot_dimension_numbers<[2], [2], [1], [1], [0, 0, 0, 1, 1, 1], [0], [0]>} : vector<64x32x32xf32>, vector<64x32x32xf32>, vector<64x32x32xf32> -> vector<64x32x32xf32>
    %c0_5 = arith.constant 0 : index
    %c0_6 = arith.constant 0 : index
    %c0_7 = arith.constant 0 : index
    %6 = vector.load %arg3[%c0_5, %c0_6, %c0_7] : memref<64x32x32xf32, #tpu.memory_space<vmem>>, vector<64x32x32xf32>
    tpu.vector_store %arg3[%c0_5, %c0_6, %c0_7], %5 {strides = array<i32>} : memref<64x32x32xf32, #tpu.memory_space<vmem>>, vector<64x32x32xf32>,
    return
  }
  func.func @transform_0(%arg0: i32) -> (i32, i32, i32) {
    %c0_i32 = arith.constant 0 : i32
    %c0_i32_0 = arith.constant 0 : i32
    %c0_i32_1 = arith.constant 0 : i32
    return %arg0, %c0_i32, %c0_i32_0 : i32, i32, i32
  }
  func.func @transform_1(%arg0: i32) -> (i32, i32, i32) {
    %c0_i32 = arith.constant 0 : i32
    %c0_i32_0 = arith.constant 0 : i32
    %c0_i32_1 = arith.constant 0 : i32
    return %arg0, %c0_i32, %c0_i32_0 : i32, i32, i32
  }
  func.func @transform_2(%arg0: i32) -> (i32, i32, i32) {
    %c0_i32 = arith.constant 0 : i32
    %c0_i32_0 = arith.constant 0 : i32
    %c0_i32_1 = arith.constant 0 : i32
    return %arg0, %c0_i32, %c0_i32_0 : i32, i32, i32
  }
}

</mosaic_0001>

<bundles_post_ra>
// kernel: tpu_custom_call.1
= control target key start
LH: loop header
LB: loop body
LE: loop exit
PB: predicated region body
PF: predicated region fallthrough
CT: control target
= control target key end

     0   :  { %s10654_s9 = smov 0   ;;  %s12965_s0 = inlined_call_operand.vmem [shape: f32[128,32,32], index: 0, kind: input, shape index: {}]   ;;  %s12966_s1 = inlined_call_operand.vmem [shape: f32[128,1,32], index: 1, kind: input, shape index: {}]   ;;  %s12967_s2 = inlined_call_operand.vmem [shape: f32[128,32,32], index: 2, kind: output, shape index: {}]  }
   0x1 LB: > { %s8559_s10 = sadd.s32 4294967295, %s10637_s9   ;;  %p8563_p0 = scmp.ge.s32.totalorder %s10637_s9, 1  ;;  %s10637_s9 = sphi %s10654_s9, %s12_s9  }
   0x2   : > { %p124_p1 = scmp.lt.s32.totalorder %s10637_s9, 3 }
   0x4   : > { %p125_p2 = pnand %p8563_p0, %p124_p1 }
   0x5   : > { %s8564_s11 = sshll.u32 (!%p125_p2), %s8559_s10, 6 }
   0x6   : > { %128 = sbr.rel (%p125_p2) target bundleno = 732 (0x2dc), region = 28  ;;  %p153_p3 = scmp.lt.s32.totalorder (!%p125_p2), %s8564_s11, 127 }
   0xb   : > { %s12969_s11 = smov (!%p153_p3, %s8564_s11), 127  ;;  %vm1259_vm0 = vcmask 261120   ;;  %v683_v8 = vlaneseq }
   0xc   : > { %s9085_s12 = sshll.u32 %s12969_s11, 5  ;;  %s10669_s15 = scalar_lea.vmem %s12966_s1, %s12969_s11 }
   0xd   : > { %s10676_s18 = scalar_lea.vmem %s12965_s0, %s9085_s12  ;;  %v427_v0 = vld [vmem:[%s10669_s15] sm:$0x1]  ;;  %v428_v1 = vld [vmem:[%s10669_s15 + $0x1] sm:$0x1]  ;;  %v429_v2 = vld [vmem:[%s10669_s15 + $0x2] sm:$0x1]  ;;  %s11277_s21 = scalar_lea.vmem %s12967_s2, %s9085_s12 }
   0xe   : > { %v174_v3 = vld [vmem:[%s10676_s18 + $0x18] sm:$0xff]  ;;  %10503 = vlog2.f32 %v427_v0  ;;  %v173_v5 = vld [vmem:[%s10676_s18 + $0x10] sm:$0xff]  ;;  %v430_v7 = vld [vmem:[%s10669_s15 + $0x3] sm:$0x1]  ;;  %v684_v11 = vshrl.u32 %v683_v8, 7 }
   0xf   : > { %v178_v4 = vld [vmem:[%s10676_s18 + $0x38] sm:$0xff]  ;;  %9599 = vmatprep.subr.msk.mxu0 %vm1259_vm0, %v174_v3  ;;  %10505 = vlog2.f32 %v428_v1  ;;  %v177_v6 = vld [vmem:[%s10676_s18 + $0x30] sm:$0xff]  ;;  %v172_v9 = vld [vmem:[%s10676_s18 + $0x8] sm:$0xff] }
  0x10   : > { %9613 = vmatprep.subr.msk.mxu1 %vm1259_vm0, %v178_v4  ;;  %9600 = vmatpush3.xpose.msk.msra.mxu0 %vm1259_vm0, %v174_v3  ;;  %10507 = vlog2.f32 %v429_v2  ;;  %v176_v10 = vld [vmem:[%s10676_s18 + $0x28] sm:$0xff]  ;;  %v171_v12 = vld [vmem:[%s10676_s18] sm:$0xff]  ;;  %v10704_v14 = vsub.s32 0, %v684_v11  ;;  %v10707_v15 = vld [vmem:[%s10676_s18 + $0x58] sm:$0xff] }
  0x11   : > { %9614 = vmatpush3.xpose.msk.msra.mxu1 %vm1259_vm0, %v178_v4  ;;  %9601 = vmatprep.subr.msk.mxu0 %vm1259_vm0, %v173_v5  ;;  %10509 = vlog2.f32 %v430_v7  ;;  %v175_v13 = vld [vmem:[%s10676_s18 + $0x20] sm:$0xff]  ;;  %v10710_v16 = vld [vmem:[%s10676_s18 + $0x78] sm:$0xff]  ;;  %v181_v35 = vld [vmem:[%s10676_s18 + $0x50] sm:$0xff] }
  0x12   : > { %9615 = vmatprep.subr.msk.mxu1 %vm1259_vm0, %v177_v6  ;;  %v431_v18 = vld [vmem:[%s10669_s15 + $0x4] sm:$0x1]  ;;  %v432_v21 = vld [vmem:[%s10669_s15 + $0x5] sm:$0x1]  ;;  %v185_v38 = vld [vmem:[%s10676_s18 + $0x70] sm:$0xff] }
  0x13   : > { %10511 = vlog2.f32 %v431_v18  ;;  %v179_v39 = vld [vmem:[%s10676_s18 + $0x40] sm:$0xff]  ;;  %v180_v43 = vld [vmem:[%s10676_s18 + $0x48] sm:$0xff]  ;;  %v10757_v51 = vld [vmem:[%s10676_s18 + $0x98] sm:$0xff] }
  0x14   : > { %9602 = vmatpush3.xpose.msk.msra.mxu0 %vm1259_vm0, %v173_v5  ;;  %10513 = vlog2.f32 %v432_v21  ;;  %v183_v42 = vld [vmem:[%s10676_s18 + $0x60] sm:$0xff]  ;;  %v184_v45 = vld [vmem:[%s10676_s18 + $0x68] sm:$0xff]  ;;  %v10760_v54 = vld [vmem:[%s10676_s18 + $0xb8] sm:$0xff] }
  0x15   : > { %9616 = vmatpush3.xpose.msk.msra.mxu1 %vm1259_vm0, %v177_v6  ;;  %9603 = vmatprep.subr.msk.mxu0 %vm1259_vm0, %v172_v9  ;;  %v433_v48 = vld [vmem:[%s10669_s15 + $0x6] sm:$0x1]  ;;  %v434_v50 = vld [vmem:[%s10669_s15 + $0x7] sm:$0x1]  ;;  %v189_v59 = vld [vmem:[%s10676_s18 + $0x90] sm:$0xff] }
  0x16   : > { %9617 = vmatprep.subr.msk.mxu1 %vm1259_vm0, %v176_v10  ;;  %10515 = vlog2.f32 %v433_v48  ;;  %v193_v63 = vld [vmem:[%s10676_s18 + $0xb0] sm:$0xff]  ;;  %v187_v0 = vld [vmem:[%s10676_s18 + $0x80] sm:$0xff]  ;;  %v435_v8 = vld [vmem:[%s10669_s15 + $0x8] sm:$0x1] }
  0x17   : > { %10517 = vlog2.f32 %v434_v50  ;;  %v191_v2 = vld [vmem:[%s10676_s18 + $0xa0] sm:$0xff]  ;;  %v10803_v11 = vld [vmem:[%s10676_s18 + $0xd8] sm:$0xff]  ;;  %v209_v48 = vld [vmem:[%s10676_s18 + $0x130] sm:$0xff] }
  0x18   : > { %9604 = vmatpush3.xpose.msk.msra.mxu0 %vm1259_vm0, %v172_v9  ;;  %10519 = vlog2.f32 %v435_v8  ;;  %v217_v8 = vld [vmem:[%s10676_s18 + $0x170] sm:$0xff] }
  0x19   : > { %9618 = vmatpush3.xpose.msk.msra.mxu1 %vm1259_vm0, %v176_v10  ;;  %9605 = vmatprep.subr.msk.mxu0 %vm1259_vm0, %v171_v12 }
  0x1a   : > { %9619 = vmatprep.subr.msk.mxu1 %vm1259_vm0, %v175_v13 }
  0x1b   : > { %v10504_v17 = vpop.eup %10503 }
  0x1c   : > { %v10506_v19 = vpop.eup %10505  ;;  %v492_v20 = vmul.f32 0.6931472, %v10504_v17  ;;  %9606 = vmatpush3.xpose.msk.msra.mxu0 %vm1259_vm0, %v171_v12 }
  0x1d   : > { %9620 = vmatpush3.xpose.msk.msra.mxu1 %vm1259_vm0, %v175_v13  ;;  %v10508_v22 = vpop.eup %10507  ;;  %v494_v23 = vmul.f32 0.6931472, %v10506_v19  ;;  %9627 = vmatprep.subr.msk.mxu0 %vm1259_vm0, %v10707_v15 }
  0x1e   : > { %9641 = vmatprep.subr.msk.mxu1 %vm1259_vm0, %v10710_v16  ;;  %v686_v24 = vrot.slane %v492_v20, %v10704_v14  ;;  %v496_v25 = vmul.f32 0.6931472, %v10508_v22  ;;  %v10510_v26 = vpop.eup %10509  ;;  %v197_v20 = vld [vmem:[%s10676_s18 + $0xd0] sm:$0xff] }
  0x1f   : > { %v690_v27 = vrot.slane %v494_v23, %v10704_v14  ;;  %v498_v34 = vmul.f32 0.6931472, %v10510_v26 }
  0x20   : > { %v1004_v28 = vmul.f32 %v686_v24, %v172_v9  ;;  %v1003_v29 = vmul.f32 %v686_v24, %v171_v12  ;;  %v1005_v32 = vmul.f32 %v686_v24, %v173_v5  ;;  %v694_v33 = vrot.slane %v496_v25, %v10704_v14  ;;  %v10512_v47 = vpop.eup %10511  ;;  %v192_v5 = vld [vmem:[%s10676_s18 + $0xa8] sm:$0xff]  ;;  %v195_v25 = vld [vmem:[%s10676_s18 + $0xc0] sm:$0xff] }
  0x21   : > { %v1008_v30 = vmul.f32 %v690_v27, %v176_v10  ;;  %v1007_v31 = vmul.f32 %v690_v27, %v175_v13  ;;  %v1006_v36 = vmul.f32 %v686_v24, %v174_v3  ;;  %v1009_v37 = vmul.f32 %v690_v27, %v177_v6  ;;  %v10514_v49 = vpop.eup %10513  ;;  %v188_v3 = vld [vmem:[%s10676_s18 + $0x88] sm:$0xff]  ;;  %v201_v24 = vld [vmem:[%s10676_s18 + $0xf0] sm:$0xff] }
  0x22   : > { %9607 = vmatprep.mubr.msk.f32.mxu0 %vm1259_vm0, %v1003_v29  ;;  %v1010_v40 = vmul.f32 %v690_v27, %v178_v4  ;;  %v698_v41 = vrot.slane %v498_v34, %v10704_v14  ;;  %v1011_v44 = vmul.f32 %v694_v33, %v179_v39  ;;  %v500_v52 = vmul.f32 0.6931472, %v10512_v47  ;;  %v436_v10 = vld [vmem:[%s10669_s15 + $0x9] sm:$0x1]  ;;  %v199_v27 = vld [vmem:[%s10676_s18 + $0xe0] sm:$0xff] }
  0x23   : > { %9621 = vmatprep.mubr.msk.f32.mxu1 %vm1259_vm0, %v1007_v31  ;;  %9608 = vmatmul.mubr.msk.f32.vlgmr.msra.gmra.mxu0 %vm1259_vm0, %v1004_v28  ;;  %v1012_v53 = vmul.f32 %v694_v33, %v180_v43  ;;  %v502_v55 = vmul.f32 0.6931472, %v10514_v49  ;;  %v1013_v57 = vmul.f32 %v694_v33, %v181_v35  ;;  %v1014_v60 = vmul.f32 %v694_v33, %v10707_v15  ;;  %v10516_v7 = vpop.eup %10515  ;;  %v196_v28 = vld [vmem:[%s10676_s18 + $0xc8] sm:$0xff]  ;;  %v203_v49 = vld [vmem:[%s10676_s18 + $0x100] sm:$0xff] }
  0x24   : > { %9622 = vmatmul.mubr.msk.f32.vlgmr.msra.gmra.mxu1 %vm1259_vm0, %v1008_v30  ;;  %9628 = vmatpush3.xpose.msk.msra.mxu0 %vm1259_vm0, %v10707_v15  ;;  %v1015_v46 = vmul.f32 %v698_v41, %v183_v42  ;;  %v1016_v56 = vmul.f32 %v698_v41, %v184_v45  ;;  %v702_v58 = vrot.slane %v500_v52, %v10704_v14  ;;  %v10518_v9 = vpop.eup %10517  ;;  %v504_v12 = vmul.f32 0.6931472, %v10516_v7  ;;  %v10806_v15 = vld [vmem:[%s10676_s18 + $0xf8] sm:$0xff]  ;;  %v200_v30 = vld [vmem:[%s10676_s18 + $0xe8] sm:$0xff] }
  0x25   : > { %9642 = vmatpush3.xpose.msk.msra.mxu1 %vm1259_vm0, %v10710_v16  ;;  %9629 = vmatprep.subr.msk.mxu0 %vm1259_vm0, %v181_v35  ;;  %v1017_v61 = vmul.f32 %v698_v41, %v185_v38  ;;  %v706_v62 = vrot.slane %v502_v55, %v10704_v14  ;;  %v1018_v1 = vmul.f32 %v698_v41, %v10710_v16  ;;  %v506_v16 = vmul.f32 0.6931472, %v10518_v9  ;;  %v437_v33 = vld [vmem:[%s10669_s15 + $0xa] sm:$0x1]  ;;  %v211_v9 = vld [vmem:[%s10676_s18 + $0x140] sm:$0xff] }
  0x26   : > { %9643 = vmatprep.subr.msk.mxu1 %vm1259_vm0, %v185_v38  ;;  %9610 = vmatprep.mubr.msk.f32.mxu0 %vm1259_vm0, %v1005_v32  ;;  %v1019_v4 = vmul.f32 %v702_v58, %v187_v0  ;;  %v1020_v13 = vmul.f32 %v702_v58, %v188_v3  ;;  %10521 = vlog2.f32 %v436_v10  ;;  %v1021_v18 = vmul.f32 %v702_v58, %v189_v59  ;;  %v10520_v32 = vpop.eup %10519  ;;  %v204_v52 = vld [vmem:[%s10676_s18 + $0x108] sm:$0xff] }
  0x27   : > { %9624 = vmatprep.mubr.msk.f32.mxu1 %vm1259_vm0, %v1009_v37  ;;  %9611 = vmatmul.mubr.msk.f32.gmra.mxu0 %vm1259_vm0, %v1006_v36  ;;  %v1023_v6 = vmul.f32 %v706_v62, %v191_v2  ;;  %v1024_v17 = vmul.f32 %v706_v62, %v192_v5  ;;  %v710_v19 = vrot.slane %v504_v12, %v10704_v14  ;;  %v10849_v36 = vld [vmem:[%s10676_s18 + $0x118] sm:$0xff]  ;;  %v508_v37 = vmul.f32 0.6931472, %v10520_v32  ;;  %v212_v12 = vld [vmem:[%s10676_s18 + $0x148] sm:$0xff] }
  0x28   : > { %9630 = vmatpush3.xpose.msk.msra.mxu0 %vm1259_vm0, %v181_v35  ;;  %9625 = vmatmul.mubr.msk.f32.gmra.mxu1 %vm1259_vm0, %v1010_v40  ;;  %v1022_v21 = vmul.f32 %v702_v58, %v10757_v51  ;;  %v1025_v22 = vmul.f32 %v706_v62, %v193_v63  ;;  %v714_v23 = vrot.slane %v506_v16, %v10704_v14  ;;  %v438_v35 = vld [vmem:[%s10669_s15 + $0xb] sm:$0x1]  ;;  %10523 = vlog2.f32 %v437_v33  ;;  %v225_v33 = vld [vmem:[%s10676_s18 + $0x1b0] sm:$0xff] }
  0x29   : > { %9644 = vmatpush3.xpose.msk.msra.mxu1 %vm1259_vm0, %v185_v38  ;;  %9631 = vmatprep.subr.msk.mxu0 %vm1259_vm0, %v180_v43  ;;  %v1026_v26 = vmul.f32 %v706_v62, %v10760_v54  ;;  %v1027_v29 = vmul.f32 %v710_v19, %v195_v25  ;;  %v1028_v38 = vmul.f32 %v710_v19, %v196_v28  ;;  %10525 = vlog2.f32 %v438_v35 }
  0x2a   : > { %9645 = vmatprep.subr.msk.mxu1 %vm1259_vm0, %v184_v45  ;;  %9635 = vmatprep.mubr.msk.f32.mxu0 %vm1259_vm0, %v1011_v44  ;;  %v1031_v31 = vmul.f32 %v714_v23, %v199_v27  ;;  %v1032_v41 = vmul.f32 %v714_v23, %v200_v30  ;;  %v205_v44 = vld [vmem:[%s10676_s18 + $0x110] sm:$0xff]  ;;  %v1034_v50 = vmul.f32 %v714_v23, %v10806_v15 }
  0x2b   : > { %9649 = vmatprep.mubr.msk.f32.mxu1 %vm1259_vm0, %v1015_v46  ;;  %v1033_v46 = vmul.f32 %v714_v23, %v201_v24 }
  0x2c   : > { %9632 = vmatpush3.xpose.msk.msra.mxu0 %vm1259_vm0, %v180_v43  ;;  %v718_v43 = vrot.slane %v508_v37, %v10704_v14  ;;  %v220_v37 = vld [vmem:[%s10676_s18 + $0x188] sm:$0xff] }
  0x2d   : > { %9646 = vmatpush3.xpose.msk.msra.mxu1 %vm1259_vm0, %v184_v45  ;;  %9633 = vmatprep.subr.msk.mxu0 %vm1259_vm0, %v179_v39  ;;  %v1030_v45 = vmul.f32 %v710_v19, %v10803_v11 }
  0x2e   : > { %9647 = vmatprep.subr.msk.mxu1 %vm1259_vm0, %v183_v42  ;;  %v1036_v62 = vmul.f32 %v718_v43, %v204_v52 }
  0x30   : > { %9634 = vmatpush3.xpose.msk.msra.mxu0 %vm1259_vm0, %v179_v39  ;;  %v10852_v39 = vld [vmem:[%s10676_s18 + $0x138] sm:$0xff] }
  0x31   : > { %9648 = vmatpush3.xpose.msk.msra.mxu1 %vm1259_vm0, %v183_v42  ;;  %9655 = vmatprep.subr.msk.mxu0 %vm1259_vm0, %v10757_v51  ;;  %v1029_v42 = vmul.f32 %v710_v19, %v197_v20 }
  0x32   : > { %9669 = vmatprep.subr.msk.mxu1 %vm1259_vm0, %v10760_v54 }
  0x33   : > { %9636 = vmatmul.mubr.msk.f32.vlgmr.msra.gmra.mxu0 %vm1259_vm0, %v1012_v53  ;;  %v10522_v34 = vpop.eup %10521  ;;  %v1035_v53 = vmul.f32 %v718_v43, %v203_v49 }
  0x34   : > { %9650 = vmatmul.mubr.msk.f32.vlgmr.msra.gmra.mxu1 %vm1259_vm0, %v1016_v56  ;;  %9656 = vmatpush3.xpose.msk.msra.mxu0 %vm1259_vm0, %v10757_v51  ;;  %v510_v40 = vmul.f32 0.6931472, %v10522_v34  ;;  %v207_v51 = vld [vmem:[%s10676_s18 + $0x120] sm:$0xff] }
  0x35   : > { %9670 = vmatpush3.xpose.msk.msra.mxu1 %vm1259_vm0, %v10760_v54  ;;  %9657 = vmatprep.subr.msk.mxu0 %vm1259_vm0, %v189_v59  ;;  %v208_v54 = vld [vmem:[%s10676_s18 + $0x128] sm:$0xff]  ;;  %v10524_v56 = vpop.eup %10523  ;;  %v219_v34 = vld [vmem:[%s10676_s18 + $0x180] sm:$0xff] }
  0x36   : > { %9671 = vmatprep.subr.msk.mxu1 %vm1259_vm0, %v193_v63  ;;  %9638 = vmatprep.mubr.msk.f32.mxu0 %vm1259_vm0, %v1013_v57  ;;  %v722_v47 = vrot.slane %v510_v40, %v10704_v14  ;;  %v439_v57 = vld [vmem:[%s10669_s15 + $0xc] sm:$0x1]  ;;  %v10526_v58 = vpop.eup %10525 }
  0x37   : > { %9652 = vmatprep.mubr.msk.f32.mxu1 %vm1259_vm0, %v1017_v61  ;;  %9639 = vmatmul.mubr.msk.f32.gmra.mxu0 %vm1259_vm0, %v1014_v60  ;;  %v10895_v60 = vld [vmem:[%s10676_s18 + $0x158] sm:$0xff]  ;;  %v512_v61 = vmul.f32 0.6931472, %v10524_v56  ;;  %10527 = vlog2.f32 %v439_v57  ;;  %v233_v57 = vld [vmem:[%s10676_s18 + $0x1f0] sm:$0xff] }
  0x38   : > { %9658 = vmatpush3.xpose.msk.msra.mxu0 %vm1259_vm0, %v189_v59  ;;  %9653 = vmatmul.mubr.msk.f32.gmra.mxu1 %vm1259_vm0, %v1018_v1  ;;  %v1039_v55 = vmul.f32 %v722_v47, %v207_v51  ;;  %v440_v59 = vld [vmem:[%s10669_s15 + $0xd] sm:$0x1]  ;;  %v1040_v1 = vmul.f32 %v722_v47, %v208_v54  ;;  %v1042_v10 = vmul.f32 %v722_v47, %v10852_v39 }
  0x39   : > { %9672 = vmatpush3.xpose.msk.msra.mxu1 %vm1259_vm0, %v193_v63  ;;  %9659 = vmatprep.subr.msk.mxu0 %vm1259_vm0, %v188_v3  ;;  %v10898_v63 = vld [vmem:[%s10676_s18 + $0x178] sm:$0xff]  ;;  %10529 = vlog2.f32 %v440_v59 }
  0x3a   : > { %9673 = vmatprep.subr.msk.mxu1 %vm1259_vm0, %v192_v5  ;;  %9663 = vmatprep.mubr.msk.f32.mxu0 %vm1259_vm0, %v1019_v4  ;;  %v213_v4 = vld [vmem:[%s10676_s18 + $0x150] sm:$0xff] }
  0x3b   : > { %9677 = vmatprep.mubr.msk.f32.mxu1 %vm1259_vm0, %v1023_v6  ;;  %v1041_v6 = vmul.f32 %v722_v47, %v209_v48 }
  0x3c   : > { %9660 = vmatpush3.xpose.msk.msra.mxu0 %vm1259_vm0, %v188_v3  ;;  %v726_v3 = vrot.slane %v512_v61, %v10704_v14  ;;  %v228_v61 = vld [vmem:[%s10676_s18 + $0x1c8] sm:$0xff] }
  0x3d   : > { %9674 = vmatpush3.xpose.msk.msra.mxu1 %vm1259_vm0, %v192_v5  ;;  %9661 = vmatprep.subr.msk.mxu0 %vm1259_vm0, %v187_v0  ;;  %v1038_v5 = vmul.f32 %v718_v43, %v10849_v36 }
  0x3e   : > { %9675 = vmatprep.subr.msk.mxu1 %vm1259_vm0, %v191_v2  ;;  %v1044_v23 = vmul.f32 %v726_v3, %v212_v12 }
  0x40   : > { %9662 = vmatpush3.xpose.msk.msra.mxu0 %vm1259_vm0, %v187_v0  ;;  %v514_v0 = vmul.f32 0.6931472, %v10526_v58  ;;  %v227_v58 = vld [vmem:[%s10676_s18 + $0x1c0] sm:$0xff] }
  0x41   : > { %9676 = vmatpush3.xpose.msk.msra.mxu1 %vm1259_vm0, %v191_v2  ;;  %9683 = vmatprep.subr.msk.mxu0 %vm1259_vm0, %v10803_v11  ;;  %v1037_v2 = vmul.f32 %v718_v43, %v205_v44 }
  0x42   : > { %9697 = vmatprep.subr.msk.mxu1 %vm1259_vm0, %v10806_v15  ;;  %v730_v7 = vrot.slane %v514_v0, %v10704_v14 }
  0x43   : > { %9664 = vmatmul.mubr.msk.f32.vlgmr.msra.gmra.mxu0 %vm1259_vm0, %v1020_v13  ;;  %v1043_v13 = vmul.f32 %v726_v3, %v211_v9 }
  0x44   : > { %9678 = vmatmul.mubr.msk.f32.vlgmr.msra.gmra.mxu1 %vm1259_vm0, %v1024_v17  ;;  %9684 = vmatpush3.xpose.msk.msra.mxu0 %vm1259_vm0, %v10803_v11  ;;  %v215_v11 = vld [vmem:[%s10676_s18 + $0x160] sm:$0xff]  ;;  %v10528_v17 = vpop.eup %10527  ;;  %v1050_v35 = vmul.f32 %v730_v7, %v10898_v63 }
  0x45   : > { %9698 = vmatpush3.xpose.msk.msra.mxu1 %vm1259_vm0, %v10806_v15  ;;  %9685 = vmatprep.subr.msk.mxu0 %vm1259_vm0, %v197_v20  ;;  %v216_v15 = vld [vmem:[%s10676_s18 + $0x168] sm:$0xff]  ;;  %v1047_v16 = vmul.f32 %v730_v7, %v215_v11 }
  0x46   : > { %9699 = vmatprep.subr.msk.mxu1 %vm1259_vm0, %v201_v24  ;;  %9666 = vmatprep.mubr.msk.f32.mxu0 %vm1259_vm0, %v1021_v18  ;;  %v441_v18 = vld [vmem:[%s10669_s15 + $0xe] sm:$0x1]  ;;  %v10530_v19 = vpop.eup %10529 }
  0x47   : > { %9680 = vmatprep.mubr.msk.f32.mxu1 %vm1259_vm0, %v1025_v22  ;;  %9667 = vmatmul.mubr.msk.f32.gmra.mxu0 %vm1259_vm0, %v1022_v21  ;;  %v10941_v21 = vld [vmem:[%s10676_s18 + $0x198] sm:$0xff]  ;;  %v516_v22 = vmul.f32 0.6931472, %v10528_v17  ;;  %10531 = vlog2.f32 %v441_v18  ;;  %v241_v18 = vld [vmem:[%s10676_s18 + $0x230] sm:$0xff] }
  0x48   : > { %9686 = vmatpush3.xpose.msk.msra.mxu0 %vm1259_vm0, %v197_v20  ;;  %9681 = vmatmul.mubr.msk.f32.gmra.mxu1 %vm1259_vm0, %v1026_v26  ;;  %v442_v20 = vld [vmem:[%s10669_s15 + $0xf] sm:$0x1]  ;;  %v1048_v26 = vmul.f32 %v730_v7, %v216_v15 }
  0x49   : > { %9700 = vmatpush3.xpose.msk.msra.mxu1 %vm1259_vm0, %v201_v24  ;;  %9687 = vmatprep.subr.msk.mxu0 %vm1259_vm0, %v196_v28  ;;  %v10944_v24 = vld [vmem:[%s10676_s18 + $0x1b8] sm:$0xff]  ;;  %10533 = vlog2.f32 %v442_v20 }
  0x4a   : > { %9701 = vmatprep.subr.msk.mxu1 %vm1259_vm0, %v200_v30  ;;  %9691 = vmatprep.mubr.msk.f32.mxu0 %vm1259_vm0, %v1027_v29  ;;  %v221_v29 = vld [vmem:[%s10676_s18 + $0x190] sm:$0xff] }
  0x4b   : > { %9705 = vmatprep.mubr.msk.f32.mxu1 %vm1259_vm0, %v1031_v31  ;;  %v1049_v31 = vmul.f32 %v730_v7, %v217_v8 }
  0x4c   : > { %9688 = vmatpush3.xpose.msk.msra.mxu0 %vm1259_vm0, %v196_v28  ;;  %v734_v28 = vrot.slane %v516_v22, %v10704_v14  ;;  %v236_v22 = vld [vmem:[%s10676_s18 + $0x208] sm:$0xff] }
  0x4d   : > { %9702 = vmatpush3.xpose.msk.msra.mxu1 %vm1259_vm0, %v200_v30  ;;  %9689 = vmatprep.subr.msk.mxu0 %vm1259_vm0, %v195_v25  ;;  %v1046_v30 = vmul.f32 %v726_v3, %v10895_v60 }
  0x4e   : > { %9703 = vmatprep.subr.msk.mxu1 %vm1259_vm0, %v199_v27  ;;  %v1052_v47 = vmul.f32 %v734_v28, %v220_v37 }
  0x50   : > { %9690 = vmatpush3.xpose.msk.msra.mxu0 %vm1259_vm0, %v195_v25  ;;  %v518_v25 = vmul.f32 0.6931472, %v10530_v19  ;;  %v235_v19 = vld [vmem:[%s10676_s18 + $0x200] sm:$0xff] }
  0x51   : > { %9704 = vmatpush3.xpose.msk.msra.mxu1 %vm1259_vm0, %v199_v27  ;;  %9711 = vmatprep.subr.msk.mxu0 %vm1259_vm0, %v10849_v36  ;;  %v1045_v27 = vmul.f32 %v726_v3, %v213_v4 }
  0x52   : > { %9725 = vmatprep.subr.msk.mxu1 %vm1259_vm0, %v10852_v39  ;;  %v738_v32 = vrot.slane %v518_v25, %v10704_v14 }
  0x53   : > { %9692 = vmatmul.mubr.msk.f32.vlgmr.msra.gmra.mxu0 %vm1259_vm0, %v1028_v38  ;;  %v1051_v38 = vmul.f32 %v734_v28, %v219_v34 }
  0x54   : > { %9706 = vmatmul.mubr.msk.f32.vlgmr.msra.gmra.mxu1 %vm1259_vm0, %v1032_v41  ;;  %9712 = vmatpush3.xpose.msk.msra.mxu0 %vm1259_vm0, %v10849_v36  ;;  %v223_v36 = vld [vmem:[%s10676_s18 + $0x1a0] sm:$0xff]  ;;  %v10532_v41 = vpop.eup %10531  ;;  %v1058_v59 = vmul.f32 %v738_v32, %v10944_v24 }
  0x55   : > { %9726 = vmatpush3.xpose.msk.msra.mxu1 %vm1259_vm0, %v10852_v39  ;;  %9713 = vmatprep.subr.msk.mxu0 %vm1259_vm0, %v205_v44  ;;  %v224_v39 = vld [vmem:[%s10676_s18 + $0x1a8] sm:$0xff]  ;;  %v1055_v40 = vmul.f32 %v738_v32, %v223_v36 }
  0x56   : > { %9727 = vmatprep.subr.msk.mxu1 %vm1259_vm0, %v209_v48  ;;  %9694 = vmatprep.mubr.msk.f32.mxu0 %vm1259_vm0, %v1029_v42  ;;  %v443_v42 = vld [vmem:[%s10669_s15 + $0x10] sm:$0x1]  ;;  %v10534_v43 = vpop.eup %10533 }
  0x57   : > { %9708 = vmatprep.mubr.msk.f32.mxu1 %vm1259_vm0, %v1033_v46  ;;  %9695 = vmatmul.mubr.msk.f32.gmra.mxu0 %vm1259_vm0, %v1030_v45  ;;  %v10987_v45 = vld [vmem:[%s10676_s18 + $0x1d8] sm:$0xff]  ;;  %v520_v46 = vmul.f32 0.6931472, %v10532_v41  ;;  %10535 = vlog2.f32 %v443_v42  ;;  %v249_v42 = vld [vmem:[%s10676_s18 + $0x270] sm:$0xff] }
  0x58   : > { %9714 = vmatpush3.xpose.msk.msra.mxu0 %vm1259_vm0, %v205_v44  ;;  %9709 = vmatmul.mubr.msk.f32.gmra.mxu1 %vm1259_vm0, %v1034_v50  ;;  %v444_v44 = vld [vmem:[%s10669_s15 + $0x11] sm:$0x1]  ;;  %v1056_v50 = vmul.f32 %v738_v32, %v224_v39 }
  0x59   : > { %9728 = vmatpush3.xpose.msk.msra.mxu1 %vm1259_vm0, %v209_v48  ;;  %9715 = vmatprep.subr.msk.mxu0 %vm1259_vm0, %v204_v52  ;;  %v10990_v48 = vld [vmem:[%s10676_s18 + $0x1f8] sm:$0xff]  ;;  %10537 = vlog2.f32 %v444_v44 }
  0x5a   : > { %9729 = vmatprep.subr.msk.mxu1 %vm1259_vm0, %v208_v54  ;;  %9719 = vmatprep.mubr.msk.f32.mxu0 %vm1259_vm0, %v1035_v53  ;;  %v229_v53 = vld [vmem:[%s10676_s18 + $0x1d0] sm:$0xff] }
  0x5b   : > { %9733 = vmatprep.mubr.msk.f32.mxu1 %vm1259_vm0, %v1039_v55  ;;  %v1057_v55 = vmul.f32 %v738_v32, %v225_v33 }
  0x5c   : > { %9716 = vmatpush3.xpose.msk.msra.mxu0 %vm1259_vm0, %v204_v52  ;;  %v742_v52 = vrot.slane %v520_v46, %v10704_v14  ;;  %v244_v46 = vld [vmem:[%s10676_s18 + $0x248] sm:$0xff] }
  0x5d   : > { %9730 = vmatpush3.xpose.msk.msra.mxu1 %vm1259_vm0, %v208_v54  ;;  %9717 = vmatprep.subr.msk.mxu0 %vm1259_vm0, %v203_v49  ;;  %v1054_v54 = vmul.f32 %v734_v28, %v10941_v21 }
  0x5e   : > { %9731 = vmatprep.subr.msk.mxu1 %vm1259_vm0, %v207_v51  ;;  %v1060_v7 = vmul.f32 %v742_v52, %v228_v61 }
  0x60   : > { %9718 = vmatpush3.xpose.msk.msra.mxu0 %vm1259_vm0, %v203_v49  ;;  %v522_v49 = vmul.f32 0.6931472, %v10534_v43  ;;  %v243_v43 = vld [vmem:[%s10676_s18 + $0x240] sm:$0xff] }
  0x61   : > { %9732 = vmatpush3.xpose.msk.msra.mxu1 %vm1259_vm0, %v207_v51  ;;  %9739 = vmatprep.subr.msk.mxu0 %vm1259_vm0, %v10895_v60  ;;  %v1053_v51 = vmul.f32 %v734_v28, %v221_v29 }
  0x62   : > { %9753 = vmatprep.subr.msk.mxu1 %vm1259_vm0, %v10898_v63  ;;  %v746_v56 = vrot.slane %v522_v49, %v10704_v14 }
  0x63   : > { %9720 = vmatmul.mubr.msk.f32.vlgmr.msra.gmra.mxu0 %vm1259_vm0, %v1036_v62  ;;  %v1059_v62 = vmul.f32 %v742_v52, %v227_v58 }
  0x64   : > { %9734 = vmatmul.mubr.msk.f32.vlgmr.msra.gmra.mxu1 %vm1259_vm0, %v1040_v1  ;;  %9740 = vmatpush3.xpose.msk.msra.mxu0 %vm1259_vm0, %v10895_v60  ;;  %v231_v60 = vld [vmem:[%s10676_s18 + $0x1e0] sm:$0xff]  ;;  %v10536_v1 = vpop.eup %10535  ;;  %v1066_v20 = vmul.f32 %v746_v56, %v10990_v48 }
  0x65   : > { %9754 = vmatpush3.xpose.msk.msra.mxu1 %vm1259_vm0, %v10898_v63  ;;  %9741 = vmatprep.subr.msk.mxu0 %vm1259_vm0, %v213_v4  ;;  %v232_v63 = vld [vmem:[%s10676_s18 + $0x1e8] sm:$0xff]  ;;  %v1063_v0 = vmul.f32 %v746_v56, %v231_v60 }
  0x66   : > { %9755 = vmatprep.subr.msk.mxu1 %vm1259_vm0, %v217_v8  ;;  %9722 = vmatprep.mubr.msk.f32.mxu0 %vm1259_vm0, %v1037_v2  ;;  %v445_v2 = vld [vmem:[%s10669_s15 + $0x12] sm:$0x1]  ;;  %v10538_v3 = vpop.eup %10537 }
  0x67   : > { %9736 = vmatprep.mubr.msk.f32.mxu1 %vm1259_vm0, %v1041_v6  ;;  %9723 = vmatmul.mubr.msk.f32.gmra.mxu0 %vm1259_vm0, %v1038_v5  ;;  %v11033_v5 = vld [vmem:[%s10676_s18 + $0x218] sm:$0xff]  ;;  %v524_v6 = vmul.f32 0.6931472, %v10536_v1  ;;  %10539 = vlog2.f32 %v445_v2  ;;  %v257_v2 = vld [vmem:[%s10676_s18 + $0x2b0] sm:$0xff] }
  0x68   : > { %9742 = vmatpush3.xpose.msk.msra.mxu0 %vm1259_vm0, %v213_v4  ;;  %9737 = vmatmul.mubr.msk.f32.gmra.mxu1 %vm1259_vm0, %v1042_v10  ;;  %v446_v4 = vld [vmem:[%s10669_s15 + $0x13] sm:$0x1]  ;;  %v1064_v10 = vmul.f32 %v746_v56, %v232_v63 }
  0x69   : > { %9756 = vmatpush3.xpose.msk.msra.mxu1 %vm1259_vm0, %v217_v8  ;;  %9743 = vmatprep.subr.msk.mxu0 %vm1259_vm0, %v212_v12  ;;  %v11036_v8 = vld [vmem:[%s10676_s18 + $0x238] sm:$0xff]  ;;  %10541 = vlog2.f32 %v446_v4 }
  0x6a   : > { %9757 = vmatprep.subr.msk.mxu1 %vm1259_vm0, %v216_v15  ;;  %9747 = vmatprep.mubr.msk.f32.mxu0 %vm1259_vm0, %v1043_v13  ;;  %v237_v13 = vld [vmem:[%s10676_s18 + $0x210] sm:$0xff] }
  0x6b   : > { %9761 = vmatprep.mubr.msk.f32.mxu1 %vm1259_vm0, %v1047_v16  ;;  %v1065_v16 = vmul.f32 %v746_v56, %v233_v57 }
  0x6c   : > { %9744 = vmatpush3.xpose.msk.msra.mxu0 %vm1259_vm0, %v212_v12  ;;  %v750_v12 = vrot.slane %v524_v6, %v10704_v14  ;;  %v252_v6 = vld [vmem:[%s10676_s18 + $0x288] sm:$0xff] }
  0x6d   : > { %9758 = vmatpush3.xpose.msk.msra.mxu1 %vm1259_vm0, %v216_v15  ;;  %9745 = vmatprep.subr.msk.mxu0 %vm1259_vm0, %v211_v9  ;;  %v1062_v15 = vmul.f32 %v742_v52, %v10987_v45 }
  0x6e   : > { %9759 = vmatprep.subr.msk.mxu1 %vm1259_vm0, %v215_v11  ;;  %v1068_v32 = vmul.f32 %v750_v12, %v236_v22 }
  0x70   : > { %9746 = vmatpush3.xpose.msk.msra.mxu0 %vm1259_vm0, %v211_v9  ;;  %v526_v9 = vmul.f32 0.6931472, %v10538_v3  ;;  %v251_v3 = vld [vmem:[%s10676_s18 + $0x280] sm:$0xff] }
  0x71   : > { %9760 = vmatpush3.xpose.msk.msra.mxu1 %vm1259_vm0, %v215_v11  ;;  %9767 = vmatprep.subr.msk.mxu0 %vm1259_vm0, %v10941_v21  ;;  %v1061_v11 = vmul.f32 %v742_v52, %v229_v53 }
  0x72   : > { %9781 = vmatprep.subr.msk.mxu1 %vm1259_vm0, %v10944_v24  ;;  %v754_v17 = vrot.slane %v526_v9, %v10704_v14 }
  0x73   : > { %9748 = vmatmul.mubr.msk.f32.vlgmr.msra.gmra.mxu0 %vm1259_vm0, %v1044_v23  ;;  %v1067_v23 = vmul.f32 %v750_v12, %v235_v19 }
  0x74   : > { %9762 = vmatmul.mubr.msk.f32.vlgmr.msra.gmra.mxu1 %vm1259_vm0, %v1048_v26  ;;  %9768 = vmatpush3.xpose.msk.msra.mxu0 %vm1259_vm0, %v10941_v21  ;;  %v239_v21 = vld [vmem:[%s10676_s18 + $0x220] sm:$0xff]  ;;  %v10540_v26 = vpop.eup %10539  ;;  %v1074_v44 = vmul.f32 %v754_v17, %v11036_v8 }
  0x75   : > { %9782 = vmatpush3.xpose.msk.msra.mxu1 %vm1259_vm0, %v10944_v24  ;;  %9769 = vmatprep.subr.msk.mxu0 %vm1259_vm0, %v221_v29  ;;  %v240_v24 = vld [vmem:[%s10676_s18 + $0x228] sm:$0xff]  ;;  %v1071_v25 = vmul.f32 %v754_v17, %v239_v21 }
  0x76   : > { %9783 = vmatprep.subr.msk.mxu1 %vm1259_vm0, %v225_v33  ;;  %9750 = vmatprep.mubr.msk.f32.mxu0 %vm1259_vm0, %v1045_v27  ;;  %v447_v27 = vld [vmem:[%s10669_s15 + $0x14] sm:$0x1]  ;;  %v10542_v28 = vpop.eup %10541 }
  0x77   : > { %9764 = vmatprep.mubr.msk.f32.mxu1 %vm1259_vm0, %v1049_v31  ;;  %9751 = vmatmul.mubr.msk.f32.gmra.mxu0 %vm1259_vm0, %v1046_v30  ;;  %v11079_v30 = vld [vmem:[%s10676_s18 + $0x258] sm:$0xff]  ;;  %v528_v31 = vmul.f32 0.6931472, %v10540_v26  ;;  %10543 = vlog2.f32 %v447_v27  ;;  %v265_v27 = vld [vmem:[%s10676_s18 + $0x2f0] sm:$0xff] }
  0x78   : > { %9770 = vmatpush3.xpose.msk.msra.mxu0 %vm1259_vm0, %v221_v29  ;;  %9765 = vmatmul.mubr.msk.f32.gmra.mxu1 %vm1259_vm0, %v1050_v35  ;;  %v448_v29 = vld [vmem:[%s10669_s15 + $0x15] sm:$0x1]  ;;  %v1072_v35 = vmul.f32 %v754_v17, %v240_v24 }
  0x79   : > { %9784 = vmatpush3.xpose.msk.msra.mxu1 %vm1259_vm0, %v225_v33  ;;  %9771 = vmatprep.subr.msk.mxu0 %vm1259_vm0, %v220_v37  ;;  %v11082_v33 = vld [vmem:[%s10676_s18 + $0x278] sm:$0xff]  ;;  %10545 = vlog2.f32 %v448_v29 }
  0x7a   : > { %9785 = vmatprep.subr.msk.mxu1 %vm1259_vm0, %v224_v39  ;;  %9775 = vmatprep.mubr.msk.f32.mxu0 %vm1259_vm0, %v1051_v38  ;;  %v245_v38 = vld [vmem:[%s10676_s18 + $0x250] sm:$0xff] }
  0x7b   : > { %9789 = vmatprep.mubr.msk.f32.mxu1 %vm1259_vm0, %v1055_v40  ;;  %v1073_v40 = vmul.f32 %v754_v17, %v241_v18 }
  0x7c   : > { %9772 = vmatpush3.xpose.msk.msra.mxu0 %vm1259_vm0, %v220_v37  ;;  %v758_v37 = vrot.slane %v528_v31, %v10704_v14  ;;  %v260_v31 = vld [vmem:[%s10676_s18 + $0x2c8] sm:$0xff] }
  0x7d   : > { %9786 = vmatpush3.xpose.msk.msra.mxu1 %vm1259_vm0, %v224_v39  ;;  %9773 = vmatprep.subr.msk.mxu0 %vm1259_vm0, %v219_v34  ;;  %v1070_v39 = vmul.f32 %v750_v12, %v11033_v5 }
  0x7e   : > { %9787 = vmatprep.subr.msk.mxu1 %vm1259_vm0, %v223_v36  ;;  %v1076_v56 = vmul.f32 %v758_v37, %v244_v46 }
  0x80   : > { %9774 = vmatpush3.xpose.msk.msra.mxu0 %vm1259_vm0, %v219_v34  ;;  %v530_v34 = vmul.f32 0.6931472, %v10542_v28  ;;  %v259_v28 = vld [vmem:[%s10676_s18 + $0x2c0] sm:$0xff] }
  0x81   : > { %9788 = vmatpush3.xpose.msk.msra.mxu1 %vm1259_vm0, %v223_v36  ;;  %9795 = vmatprep.subr.msk.mxu0 %vm1259_vm0, %v10987_v45  ;;  %v1069_v36 = vmul.f32 %v750_v12, %v237_v13 }
  0x82   : > { %9809 = vmatprep.subr.msk.mxu1 %vm1259_vm0, %v10990_v48  ;;  %v762_v41 = vrot.slane %v530_v34, %v10704_v14 }
  0x83   : > { %9776 = vmatmul.mubr.msk.f32.vlgmr.msra.gmra.mxu0 %vm1259_vm0, %v1052_v47  ;;  %v1075_v47 = vmul.f32 %v758_v37, %v243_v43 }
  0x84   : > { %9790 = vmatmul.mubr.msk.f32.vlgmr.msra.gmra.mxu1 %vm1259_vm0, %v1056_v50  ;;  %9796 = vmatpush3.xpose.msk.msra.mxu0 %vm1259_vm0, %v10987_v45  ;;  %v247_v45 = vld [vmem:[%s10676_s18 + $0x260] sm:$0xff]  ;;  %v10544_v50 = vpop.eup %10543  ;;  %v1082_v4 = vmul.f32 %v762_v41, %v11082_v33 }
  0x85   : > { %9810 = vmatpush3.xpose.msk.msra.mxu1 %vm1259_vm0, %v10990_v48  ;;  %9797 = vmatprep.subr.msk.mxu0 %vm1259_vm0, %v229_v53  ;;  %v248_v48 = vld [vmem:[%s10676_s18 + $0x268] sm:$0xff]  ;;  %v1079_v49 = vmul.f32 %v762_v41, %v247_v45 }
  0x86   : > { %9811 = vmatprep.subr.msk.mxu1 %vm1259_vm0, %v233_v57  ;;  %9778 = vmatprep.mubr.msk.f32.mxu0 %vm1259_vm0, %v1053_v51  ;;  %v449_v51 = vld [vmem:[%s10669_s15 + $0x16] sm:$0x1]  ;;  %v10546_v52 = vpop.eup %10545 }
  0x87   : > { %9792 = vmatprep.mubr.msk.f32.mxu1 %vm1259_vm0, %v1057_v55  ;;  %9779 = vmatmul.mubr.msk.f32.gmra.mxu0 %vm1259_vm0, %v1054_v54  ;;  %v11125_v54 = vld [vmem:[%s10676_s18 + $0x298] sm:$0xff]  ;;  %v532_v55 = vmul.f32 0.6931472, %v10544_v50  ;;  %10547 = vlog2.f32 %v449_v51  ;;  %v273_v51 = vld [vmem:[%s10676_s18 + $0x330] sm:$0xff] }
  0x88   : > { %9798 = vmatpush3.xpose.msk.msra.mxu0 %vm1259_vm0, %v229_v53  ;;  %9793 = vmatmul.mubr.msk.f32.gmra.mxu1 %vm1259_vm0, %v1058_v59  ;;  %v450_v53 = vld [vmem:[%s10669_s15 + $0x17] sm:$0x1]  ;;  %v1080_v59 = vmul.f32 %v762_v41, %v248_v48 }
  0x89   : > { %9812 = vmatpush3.xpose.msk.msra.mxu1 %vm1259_vm0, %v233_v57  ;;  %9799 = vmatprep.subr.msk.mxu0 %vm1259_vm0, %v228_v61  ;;  %v11128_v57 = vld [vmem:[%s10676_s18 + $0x2b8] sm:$0xff]  ;;  %10549 = vlog2.f32 %v450_v53 }
  0x8a   : > { %9813 = vmatprep.subr.msk.mxu1 %vm1259_vm0, %v232_v63  ;;  %9803 = vmatprep.mubr.msk.f32.mxu0 %vm1259_vm0, %v1059_v62  ;;  %v253_v62 = vld [vmem:[%s10676_s18 + $0x290] sm:$0xff] }
  0x8b   : > { %9817 = vmatprep.mubr.msk.f32.mxu1 %vm1259_vm0, %v1063_v0  ;;  %v1081_v0 = vmul.f32 %v762_v41, %v249_v42 }
  0x8c   : > { %9800 = vmatpush3.xpose.msk.msra.mxu0 %vm1259_vm0, %v228_v61  ;;  %v766_v61 = vrot.slane %v532_v55, %v10704_v14  ;;  %v268_v55 = vld [vmem:[%s10676_s18 + $0x308] sm:$0xff] }
  0x8d   : > { %9814 = vmatpush3.xpose.msk.msra.mxu1 %vm1259_vm0, %v232_v63  ;;  %9801 = vmatprep.subr.msk.mxu0 %vm1259_vm0, %v227_v58  ;;  %v1078_v63 = vmul.f32 %v758_v37, %v11079_v30 }
  0x8e   : > { %9815 = vmatprep.subr.msk.mxu1 %vm1259_vm0, %v231_v60  ;;  %v1084_v17 = vmul.f32 %v766_v61, %v252_v6 }
  0x90   : > { %9802 = vmatpush3.xpose.msk.msra.mxu0 %vm1259_vm0, %v227_v58  ;;  %v534_v58 = vmul.f32 0.6931472, %v10546_v52  ;;  %v267_v52 = vld [vmem:[%s10676_s18 + $0x300] sm:$0xff] }
  0x91   : > { %9816 = vmatpush3.xpose.msk.msra.mxu1 %vm1259_vm0, %v231_v60  ;;  %9823 = vmatprep.subr.msk.mxu0 %vm1259_vm0, %v11033_v5  ;;  %v1077_v60 = vmul.f32 %v758_v37, %v245_v38 }
  0x92   : > { %9837 = vmatprep.subr.msk.mxu1 %vm1259_vm0, %v11036_v8  ;;  %v770_v1 = vrot.slane %v534_v58, %v10704_v14 }
  0x93   : > { %9804 = vmatmul.mubr.msk.f32.vlgmr.msra.gmra.mxu0 %vm1259_vm0, %v1060_v7  ;;  %v1083_v7 = vmul.f32 %v766_v61, %v251_v3 }
  0x94   : > { %9818 = vmatmul.mubr.msk.f32.vlgmr.msra.gmra.mxu1 %vm1259_vm0, %v1064_v10  ;;  %9824 = vmatpush3.xpose.msk.msra.mxu0 %vm1259_vm0, %v11033_v5  ;;  %v255_v5 = vld [vmem:[%s10676_s18 + $0x2a0] sm:$0xff]  ;;  %v10548_v10 = vpop.eup %10547  ;;  %v1090_v29 = vmul.f32 %v770_v1, %v11128_v57 }
  0x95   : > { %9838 = vmatpush3.xpose.msk.msra.mxu1 %vm1259_vm0, %v11036_v8  ;;  %9825 = vmatprep.subr.msk.mxu0 %vm1259_vm0, %v237_v13  ;;  %v256_v8 = vld [vmem:[%s10676_s18 + $0x2a8] sm:$0xff]  ;;  %v1087_v9 = vmul.f32 %v770_v1, %v255_v5 }
  0x96   : > { %9839 = vmatprep.subr.msk.mxu1 %vm1259_vm0, %v241_v18  ;;  %9806 = vmatprep.mubr.msk.f32.mxu0 %vm1259_vm0, %v1061_v11  ;;  %v451_v11 = vld [vmem:[%s10669_s15 + $0x18] sm:$0x1]  ;;  %v10550_v12 = vpop.eup %10549 }
  0x97   : > { %9820 = vmatprep.mubr.msk.f32.mxu1 %vm1259_vm0, %v1065_v16  ;;  %9807 = vmatmul.mubr.msk.f32.gmra.mxu0 %vm1259_vm0, %v1062_v15  ;;  %v11171_v15 = vld [vmem:[%s10676_s18 + $0x2d8] sm:$0xff]  ;;  %v536_v16 = vmul.f32 0.6931472, %v10548_v10  ;;  %10551 = vlog2.f32 %v451_v11 }
  0x98   : > { %9826 = vmatpush3.xpose.msk.msra.mxu0 %vm1259_vm0, %v237_v13  ;;  %9821 = vmatmul.mubr.msk.f32.gmra.mxu1 %vm1259_vm0, %v1066_v20  ;;  %v452_v13 = vld [vmem:[%s10669_s15 + $0x19] sm:$0x1]  ;;  %v1088_v20 = vmul.f32 %v770_v1, %v256_v8 }
  0x99   : > { %9840 = vmatpush3.xpose.msk.msra.mxu1 %vm1259_vm0, %v241_v18  ;;  %9827 = vmatprep.subr.msk.mxu0 %vm1259_vm0, %v236_v22  ;;  %v11174_v18 = vld [vmem:[%s10676_s18 + $0x2f8] sm:$0xff]  ;;  %10553 = vlog2.f32 %v452_v13  ;;  %v275_v13 = vld [vmem:[%s10676_s18 + $0x340] sm:$0xff] }
  0x9a   : > { %9841 = vmatprep.subr.msk.mxu1 %vm1259_vm0, %v240_v24  ;;  %9831 = vmatprep.mubr.msk.f32.mxu0 %vm1259_vm0, %v1067_v23  ;;  %v261_v23 = vld [vmem:[%s10676_s18 + $0x2d0] sm:$0xff] }
  0x9b   : > { %9845 = vmatprep.mubr.msk.f32.mxu1 %vm1259_vm0, %v1071_v25  ;;  %v1089_v25 = vmul.f32 %v770_v1, %v257_v2 }
  0x9c   : > { %9828 = vmatpush3.xpose.msk.msra.mxu0 %vm1259_vm0, %v236_v22  ;;  %v774_v22 = vrot.slane %v536_v16, %v10704_v14 }
  0x9d   : > { %9842 = vmatpush3.xpose.msk.msra.mxu1 %vm1259_vm0, %v240_v24  ;;  %9829 = vmatprep.subr.msk.mxu0 %vm1259_vm0, %v235_v19  ;;  %v1086_v24 = vmul.f32 %v766_v61, %v11125_v54 }
  0x9e   : > { %9843 = vmatprep.subr.msk.mxu1 %vm1259_vm0, %v239_v21  ;;  %v1092_v41 = vmul.f32 %v774_v22, %v260_v31 }
  0xa0   : > { %9830 = vmatpush3.xpose.msk.msra.mxu0 %vm1259_vm0, %v235_v19  ;;  %v538_v19 = vmul.f32 0.6931472, %v10550_v12  ;;  %v281_v12 = vld [vmem:[%s10676_s18 + $0x370] sm:$0xff] }
  0xa1   : > { %9844 = vmatpush3.xpose.msk.msra.mxu1 %vm1259_vm0, %v239_v21  ;;  %9851 = vmatprep.subr.msk.mxu0 %vm1259_vm0, %v11079_v30  ;;  %v1085_v21 = vmul.f32 %v766_v61, %v253_v62 }
  0xa2   : > { %9865 = vmatprep.subr.msk.mxu1 %vm1259_vm0, %v11082_v33  ;;  %v778_v26 = vrot.slane %v538_v19, %v10704_v14 }
  0xa3   : > { %9832 = vmatmul.mubr.msk.f32.vlgmr.msra.gmra.mxu0 %vm1259_vm0, %v1068_v32  ;;  %v1091_v32 = vmul.f32 %v774_v22, %v259_v28 }
  0xa4   : > { %9846 = vmatmul.mubr.msk.f32.vlgmr.msra.gmra.mxu1 %vm1259_vm0, %v1072_v35  ;;  %9852 = vmatpush3.xpose.msk.msra.mxu0 %vm1259_vm0, %v11079_v30  ;;  %v263_v30 = vld [vmem:[%s10676_s18 + $0x2e0] sm:$0xff]  ;;  %v10552_v35 = vpop.eup %10551  ;;  %v1098_v53 = vmul.f32 %v778_v26, %v11174_v18 }
  0xa5   : > { %9866 = vmatpush3.xpose.msk.msra.mxu1 %vm1259_vm0, %v11082_v33  ;;  %9853 = vmatprep.subr.msk.mxu0 %vm1259_vm0, %v245_v38  ;;  %v264_v33 = vld [vmem:[%s10676_s18 + $0x2e8] sm:$0xff]  ;;  %v1095_v34 = vmul.f32 %v778_v26, %v263_v30 }
  0xa6   : > { %9867 = vmatprep.subr.msk.mxu1 %vm1259_vm0, %v249_v42  ;;  %9834 = vmatprep.mubr.msk.f32.mxu0 %vm1259_vm0, %v1069_v36  ;;  %v453_v36 = vld [vmem:[%s10669_s15 + $0x1a] sm:$0x1]  ;;  %v10554_v37 = vpop.eup %10553 }
  0xa7   : > { %9848 = vmatprep.mubr.msk.f32.mxu1 %vm1259_vm0, %v1073_v40  ;;  %9835 = vmatmul.mubr.msk.f32.gmra.mxu0 %vm1259_vm0, %v1070_v39  ;;  %v11217_v39 = vld [vmem:[%s10676_s18 + $0x318] sm:$0xff]  ;;  %v540_v40 = vmul.f32 0.6931472, %v10552_v35  ;;  %10555 = vlog2.f32 %v453_v36 }
  0xa8   : > { %9854 = vmatpush3.xpose.msk.msra.mxu0 %vm1259_vm0, %v245_v38  ;;  %9849 = vmatmul.mubr.msk.f32.gmra.mxu1 %vm1259_vm0, %v1074_v44  ;;  %v454_v38 = vld [vmem:[%s10669_s15 + $0x1b] sm:$0x1]  ;;  %v1096_v44 = vmul.f32 %v778_v26, %v264_v33 }
  0xa9   : > { %9868 = vmatpush3.xpose.msk.msra.mxu1 %vm1259_vm0, %v249_v42  ;;  %9855 = vmatprep.subr.msk.mxu0 %vm1259_vm0, %v244_v46  ;;  %v11220_v42 = vld [vmem:[%s10676_s18 + $0x338] sm:$0xff]  ;;  %10557 = vlog2.f32 %v454_v38 }
  0xaa   : > { %9869 = vmatprep.subr.msk.mxu1 %vm1259_vm0, %v248_v48  ;;  %9859 = vmatprep.mubr.msk.f32.mxu0 %vm1259_vm0, %v1075_v47  ;;  %v269_v47 = vld [vmem:[%s10676_s18 + $0x310] sm:$0xff]  ;;  %v11346_v35 = vld [vmem:[%s10676_s18 + $0x3b8] sm:$0xff] }
  0xab   : > { %9873 = vmatprep.mubr.msk.f32.mxu1 %vm1259_vm0, %v1079_v49  ;;  %v1097_v49 = vmul.f32 %v778_v26, %v265_v27 }
  0xac   : > { %9856 = vmatpush3.xpose.msk.msra.mxu0 %vm1259_vm0, %v244_v46  ;;  %v782_v46 = vrot.slane %v540_v40, %v10704_v14  ;;  %v11361_v40 = vld [vmem:[%s10676_s18 + $0x390] sm:$0xff] }
  0xad   : > { %9870 = vmatpush3.xpose.msk.msra.mxu1 %vm1259_vm0, %v248_v48  ;;  %9857 = vmatprep.subr.msk.mxu0 %vm1259_vm0, %v243_v43  ;;  %v1094_v48 = vmul.f32 %v774_v22, %v11171_v15 }
  0xae   : > { %9871 = vmatprep.subr.msk.mxu1 %vm1259_vm0, %v247_v45  ;;  %v1100_v1 = vmul.f32 %v782_v46, %v268_v55 }
  0xb0   : > { %9858 = vmatpush3.xpose.msk.msra.mxu0 %vm1259_vm0, %v243_v43  ;;  %v542_v43 = vmul.f32 0.6931472, %v10554_v37 }
  0xb1   : > { %9872 = vmatpush3.xpose.msk.msra.mxu1 %vm1259_vm0, %v247_v45  ;;  %9879 = vmatprep.subr.msk.mxu0 %vm1259_vm0, %v11125_v54  ;;  %v1093_v45 = vmul.f32 %v774_v22, %v261_v23  ;;  %v280_v22 = vld [vmem:[%s10676_s18 + $0x368] sm:$0xff] }
  0xb2   : > { %9893 = vmatprep.subr.msk.mxu1 %vm1259_vm0, %v11128_v57  ;;  %v786_v50 = vrot.slane %v542_v43, %v10704_v14 }
  0xb3   : > { %9860 = vmatmul.mubr.msk.f32.vlgmr.msra.gmra.mxu0 %vm1259_vm0, %v1076_v56  ;;  %v1099_v56 = vmul.f32 %v782_v46, %v267_v52 }
  0xb4   : > { %9874 = vmatmul.mubr.msk.f32.vlgmr.msra.gmra.mxu1 %vm1259_vm0, %v1080_v59  ;;  %9880 = vmatpush3.xpose.msk.msra.mxu0 %vm1259_vm0, %v11125_v54  ;;  %v271_v54 = vld [vmem:[%s10676_s18 + $0x320] sm:$0xff]  ;;  %v10556_v59 = vpop.eup %10555 }
  0xb5   : > { %9894 = vmatpush3.xpose.msk.msra.mxu1 %vm1259_vm0, %v11128_v57  ;;  %9881 = vmatprep.subr.msk.mxu0 %vm1259_vm0, %v253_v62  ;;  %v272_v57 = vld [vmem:[%s10676_s18 + $0x328] sm:$0xff]  ;;  %v1103_v58 = vmul.f32 %v786_v50, %v271_v54 }
  0xb6   : > { %9895 = vmatprep.subr.msk.mxu1 %vm1259_vm0, %v257_v2  ;;  %9862 = vmatprep.mubr.msk.f32.mxu0 %vm1259_vm0, %v1077_v60  ;;  %v455_v60 = vld [vmem:[%s10669_s15 + $0x1c] sm:$0x1]  ;;  %v10558_v61 = vpop.eup %10557 }
  0xb7   : > { %9876 = vmatprep.mubr.msk.f32.mxu1 %vm1259_vm0, %v1081_v0  ;;  %9863 = vmatmul.mubr.msk.f32.gmra.mxu0 %vm1259_vm0, %v1078_v63  ;;  %v11263_v63 = vld [vmem:[%s10676_s18 + $0x358] sm:$0xff]  ;;  %v544_v0 = vmul.f32 0.6931472, %v10556_v59  ;;  %10559 = vlog2.f32 %v455_v60 }
  0xb8   : > { %9882 = vmatpush3.xpose.msk.msra.mxu0 %vm1259_vm0, %v253_v62  ;;  %9877 = vmatmul.mubr.msk.f32.gmra.mxu1 %vm1259_vm0, %v1082_v4  ;;  %v456_v62 = vld [vmem:[%s10669_s15 + $0x1d] sm:$0x1]  ;;  %v1104_v4 = vmul.f32 %v786_v50, %v272_v57 }
  0xb9   : > { %9896 = vmatpush3.xpose.msk.msra.mxu1 %vm1259_vm0, %v257_v2  ;;  %9883 = vmatprep.subr.msk.mxu0 %vm1259_vm0, %v252_v6  ;;  %v11266_v2 = vld [vmem:[%s10676_s18 + $0x378] sm:$0xff]  ;;  %10561 = vlog2.f32 %v456_v62 }
  0xba   : > { %9897 = vmatprep.subr.msk.mxu1 %vm1259_vm0, %v256_v8  ;;  %9887 = vmatprep.mubr.msk.f32.mxu0 %vm1259_vm0, %v1083_v7  ;;  %v11285_v7 = vld [vmem:[%s10676_s18 + $0x350] sm:$0xff] }
  0xbb   : > { %9901 = vmatprep.mubr.msk.f32.mxu1 %vm1259_vm0, %v1087_v9  ;;  %v1105_v9 = vmul.f32 %v786_v50, %v273_v51 }
  0xbc   : > { %9884 = vmatpush3.xpose.msk.msra.mxu0 %vm1259_vm0, %v252_v6  ;;  %v11280_v6 = vrot.slane %v544_v0, %v10704_v14  ;;  %v11421_v0 = vld [vmem:[%s10676_s18 + $0x3d8] sm:$0xff] }
  0xbd   : > { %9898 = vmatpush3.xpose.msk.msra.mxu1 %vm1259_vm0, %v256_v8  ;;  %9885 = vmatprep.subr.msk.mxu0 %vm1259_vm0, %v251_v3  ;;  %v1102_v8 = vmul.f32 %v782_v46, %v11217_v39 }
  0xbe   : > { %9899 = vmatprep.subr.msk.mxu1 %vm1259_vm0, %v255_v5  ;;  %v1109_v38 = vmul.f32 %v11280_v6, %v11285_v7 }
  0xc0   : > { %9886 = vmatpush3.xpose.msk.msra.mxu0 %vm1259_vm0, %v251_v3  ;;  %v546_v3 = vmul.f32 0.6931472, %v10558_v61  ;;  %v459_v61 = vld [vmem:[%s10669_s15 + $0x20] sm:$0x1] }
  0xc1   : > { %9900 = vmatpush3.xpose.msk.msra.mxu1 %vm1259_vm0, %v255_v5  ;;  %9907 = vmatprep.subr.msk.mxu0 %vm1259_vm0, %v11171_v15  ;;  %v1101_v5 = vmul.f32 %v782_v46, %v269_v47  ;;  %v283_v46 = vld [vmem:[%s10676_s18 + $0x380] sm:$0xff] }
  0xc2   : > { %9921 = vmatprep.subr.msk.mxu1 %vm1259_vm0, %v11174_v18  ;;  %v11290_v10 = vrot.slane %v546_v3, %v10704_v14  ;;  %v11425_v3 = vld [vmem:[%s10676_s18 + $0x3f8] sm:$0xff] }
  0xc3   : > { %9888 = vmatmul.mubr.msk.f32.vlgmr.msra.gmra.mxu0 %vm1259_vm0, %v1084_v17  ;;  %v279_v17 = vld [vmem:[%s10676_s18 + $0x360] sm:$0xff] }
  0xc4   : > { %9902 = vmatmul.mubr.msk.f32.vlgmr.msra.gmra.mxu1 %vm1259_vm0, %v1088_v20  ;;  %9908 = vmatpush3.xpose.msk.msra.mxu0 %vm1259_vm0, %v11171_v15  ;;  %v1106_v15 = vmul.f32 %v786_v50, %v11220_v42  ;;  %v276_v20 = vld [vmem:[%s10676_s18 + $0x348] sm:$0xff]  ;;  %v1112_v37 = vmul.f32 %v11290_v10, %v280_v22 }
  0xc5   : > { %9922 = vmatpush3.xpose.msk.msra.mxu1 %vm1259_vm0, %v11174_v18  ;;  %9909 = vmatprep.subr.msk.mxu0 %vm1259_vm0, %v261_v23 }
  0xc6   : > { %9923 = vmatprep.subr.msk.mxu1 %vm1259_vm0, %v265_v27  ;;  %9890 = vmatprep.mubr.msk.f32.mxu0 %vm1259_vm0, %v1085_v21  ;;  %v1107_v21 = vmul.f32 %v11280_v6, %v275_v13 }
  0xc7   : > { %9904 = vmatprep.mubr.msk.f32.mxu1 %vm1259_vm0, %v1089_v25  ;;  %9891 = vmatmul.mubr.msk.f32.gmra.mxu0 %vm1259_vm0, %v1086_v24  ;;  %v1111_v24 = vmul.f32 %v11290_v10, %v279_v17 }
  0xc8   : > { %9910 = vmatpush3.xpose.msk.msra.mxu0 %vm1259_vm0, %v261_v23  ;;  %9905 = vmatmul.mubr.msk.f32.gmra.mxu1 %vm1259_vm0, %v1090_v29  ;;  %v457_v29 = vld [vmem:[%s10669_s15 + $0x1e] sm:$0x1] }
  0xc9   : > { %9924 = vmatpush3.xpose.msk.msra.mxu1 %vm1259_vm0, %v265_v27  ;;  %9911 = vmatprep.subr.msk.mxu0 %vm1259_vm0, %v260_v31  ;;  %10563 = vlog2.f32 %v457_v29 }
  0xca   : > { %9925 = vmatprep.subr.msk.mxu1 %vm1259_vm0, %v264_v33  ;;  %9915 = vmatprep.mubr.msk.f32.mxu0 %vm1259_vm0, %v1091_v32  ;;  %v11342_v32 = vld [vmem:[%s10676_s18 + $0x398] sm:$0xff] }
  0xcb   : > { %9929 = vmatprep.mubr.msk.f32.mxu1 %vm1259_vm0, %v1095_v34  ;;  %v1108_v34 = vmul.f32 %v11280_v6, %v276_v20 }
  0xcc   : > { %9912 = vmatpush3.xpose.msk.msra.mxu0 %vm1259_vm0, %v260_v31  ;;  %v458_v31 = vld [vmem:[%s10669_s15 + $0x1f] sm:$0x1] }
  0xcd   : > { %9926 = vmatpush3.xpose.msk.msra.mxu1 %vm1259_vm0, %v264_v33  ;;  %9913 = vmatprep.subr.msk.mxu0 %vm1259_vm0, %v259_v28  ;;  %10565 = vlog2.f32 %v458_v31 }
  0xce   : > { %9927 = vmatprep.subr.msk.mxu1 %vm1259_vm0, %v263_v30  ;;  %10567 = vlog2.f32 %v459_v61 }
  0xd0   : > { %9914 = vmatpush3.xpose.msk.msra.mxu0 %vm1259_vm0, %v259_v28  ;;  %v10560_v28 = vpop.eup %10559 }
  0xd1   : > { %9928 = vmatpush3.xpose.msk.msra.mxu1 %vm1259_vm0, %v263_v30  ;;  %9935 = vmatprep.subr.msk.mxu0 %vm1259_vm0, %v11217_v39  ;;  %v10562_v30 = vpop.eup %10561  ;;  %v548_v33 = vmul.f32 0.6931472, %v10560_v28 }
  0xd2   : > { %9949 = vmatprep.subr.msk.mxu1 %vm1259_vm0, %v11220_v42  ;;  %v550_v36 = vmul.f32 0.6931472, %v10562_v30  ;;  %v461_v30 = vld [vmem:[%s10669_s15 + $0x22] sm:$0x1] }
  0xd3   : > { %9916 = vmatmul.mubr.msk.f32.vlgmr.msra.gmra.mxu0 %vm1259_vm0, %v1092_v41  ;;  %v1110_v41 = vmul.f32 %v11280_v6, %v11263_v63 }
  0xd4   : > { %9930 = vmatmul.mubr.msk.f32.vlgmr.msra.gmra.mxu1 %vm1259_vm0, %v1096_v44  ;;  %9936 = vmatpush3.xpose.msk.msra.mxu0 %vm1259_vm0, %v11217_v39  ;;  %v11356_v39 = vrot.slane %v548_v33, %v10704_v14  ;;  %v11368_v44 = vrot.slane %v550_v36, %v10704_v14  ;;  %v11500_v33 = vld [vmem:[%s10676_s18 + $0x418] sm:$0xff] }
  0xd5   : > { %9950 = vmatpush3.xpose.msk.msra.mxu1 %vm1259_vm0, %v11220_v42  ;;  %9937 = vmatprep.subr.msk.mxu0 %vm1259_vm0, %v269_v47  ;;  %v1113_v42 = vmul.f32 %v11290_v10, %v281_v12  ;;  %v11504_v36 = vld [vmem:[%s10676_s18 + $0x438] sm:$0xff] }
  0xd6   : > { %9951 = vmatprep.subr.msk.mxu1 %vm1259_vm0, %v273_v51  ;;  %9918 = vmatprep.mubr.msk.f32.mxu0 %vm1259_vm0, %v1093_v45  ;;  %v289_v45 = vld [vmem:[%s10676_s18 + $0x3b0] sm:$0xff]  ;;  %v10564_v60 = vpop.eup %10563  ;;  %v1117_v6 = vmul.f32 %v11356_v39, %v11361_v40 }
  0xd7   : > { %9932 = vmatprep.mubr.msk.f32.mxu1 %vm1259_vm0, %v1097_v49  ;;  %9919 = vmatmul.mubr.msk.f32.gmra.mxu0 %vm1259_vm0, %v1094_v48  ;;  %v287_v49 = vld [vmem:[%s10676_s18 + $0x3a0] sm:$0xff] }
  0xd8   : > { %9938 = vmatpush3.xpose.msk.msra.mxu0 %vm1259_vm0, %v269_v47  ;;  %9933 = vmatmul.mubr.msk.f32.gmra.mxu1 %vm1259_vm0, %v1098_v53  ;;  %v1114_v47 = vmul.f32 %v11290_v10, %v11266_v2  ;;  %v1115_v53 = vmul.f32 %v11356_v39, %v283_v46  ;;  %v1121_v10 = vmul.f32 %v11368_v44, %v289_v45 }
  0xd9   : > { %9952 = vmatpush3.xpose.msk.msra.mxu1 %vm1259_vm0, %v273_v51  ;;  %9939 = vmatprep.subr.msk.mxu0 %vm1259_vm0, %v268_v55 }
  0xda   : > { %9953 = vmatprep.subr.msk.mxu1 %vm1259_vm0, %v272_v57  ;;  %9943 = vmatprep.mubr.msk.f32.mxu0 %vm1259_vm0, %v1099_v56  ;;  %v1119_v56 = vmul.f32 %v11368_v44, %v287_v49  ;;  %v10566_v62 = vpop.eup %10565 }
  0xdb   : > { %9957 = vmatprep.mubr.msk.f32.mxu1 %vm1259_vm0, %v1103_v58  ;;  %v10568_v29 = vpop.eup %10567 }
  0xdc   : > { %9940 = vmatpush3.xpose.msk.msra.mxu0 %vm1259_vm0, %v268_v55 }
  0xdd   : > { %9954 = vmatpush3.xpose.msk.msra.mxu1 %vm1259_vm0, %v272_v57  ;;  %9941 = vmatprep.subr.msk.mxu0 %vm1259_vm0, %v267_v52 }
  0xde   : > { %9955 = vmatprep.subr.msk.mxu1 %vm1259_vm0, %v271_v54 }
  0xe0   : > { %9942 = vmatpush3.xpose.msk.msra.mxu0 %vm1259_vm0, %v267_v52  ;;  %v284_v52 = vld [vmem:[%s10676_s18 + $0x388] sm:$0xff] }
  0xe1   : > { %9956 = vmatpush3.xpose.msk.msra.mxu1 %vm1259_vm0, %v271_v54  ;;  %9963 = vmatprep.subr.msk.mxu0 %vm1259_vm0, %v11263_v63  ;;  %v288_v54 = vld [vmem:[%s10676_s18 + $0x3a8] sm:$0xff] }
  0xe2   : > { %9977 = vmatprep.subr.msk.mxu1 %vm1259_vm0, %v11266_v2 }
  0xe3   : > { %9944 = vmatmul.mubr.msk.f32.vlgmr.msra.gmra.mxu0 %vm1259_vm0, %v1100_v1  ;;  %v9609_v11 = vpop.f32.mrf.mxu0  ;;  %v552_v1 = vmul.f32 0.6931472, %v10564_v60 }
  0xe4   : > { %9958 = vmatmul.mubr.msk.f32.vlgmr.msra.gmra.mxu1 %vm1259_vm0, %v1104_v4  ;;  %8237 = vst.msk [vmem:[%s11277_s21 + $0x8] sm:$0xff] %vm1259_vm0, %v9609_v11  ;;  %v9623_v16 = vpop.f32.mrf.mxu1  ;;  %9964 = vmatpush3.xpose.msk.msra.mxu0 %vm1259_vm0, %v11263_v63  ;;  %v460_v63 = vld [vmem:[%s10669_s15 + $0x21] sm:$0x1]  ;;  %v554_v4 = vmul.f32 0.6931472, %v10566_v62 }
  0xe5   : > { %8241 = vst.msk [vmem:[%s11277_s21 + $0x28] sm:$0xff] %vm1259_vm0, %v9623_v16  ;;  %9978 = vmatpush3.xpose.msk.msra.mxu1 %vm1259_vm0, %v11266_v2  ;;  %v1350_v18 = vpop.f32.mrf.mxu0  ;;  %9965 = vmatprep.subr.msk.mxu0 %vm1259_vm0, %v11285_v7  ;;  %v1116_v2 = vmul.f32 %v11356_v39, %v284_v52  ;;  %10569 = vlog2.f32 %v460_v63  ;;  %v1122_v16 = vmul.f32 %v11368_v44, %v11346_v35  ;;  %v463_v62 = vld [vmem:[%s10669_s15 + $0x24] sm:$0x1] }
  0xe6   : > { %8236 = vst.msk [vmem:[%s11277_s21] sm:$0xff] %vm1259_vm0, %v1350_v18  ;;  %v1459_v19 = vpop.f32.mrf.mxu1  ;;  %9979 = vmatprep.subr.msk.mxu1 %vm1259_vm0, %v281_v12  ;;  %9946 = vmatprep.mubr.msk.f32.mxu0 %vm1259_vm0, %v1101_v5  ;;  %v1120_v5 = vmul.f32 %v11368_v44, %v288_v54  ;;  %v295_v18 = vld [vmem:[%s10676_s18 + $0x3e0] sm:$0xff]  ;;  %10571 = vlog2.f32 %v461_v30 }
  0xe7   : > { %8240 = vst.msk [vmem:[%s11277_s21 + $0x20] sm:$0xff] %vm1259_vm0, %v1459_v19  ;;  %9960 = vmatprep.mubr.msk.f32.mxu1 %vm1259_vm0, %v1105_v9  ;;  %v9612_v23 = vpop.f32.mrf.mxu0  ;;  %9947 = vmatmul.mubr.msk.f32.gmra.mxu0 %vm1259_vm0, %v1102_v8  ;;  %v11440_v8 = vld [vmem:[%s10676_s18 + $0x3d0] sm:$0xff]  ;;  %v1118_v9 = vmul.f32 %v11356_v39, %v11342_v32 }
  0xe8   : > { %9966 = vmatpush3.xpose.msk.msra.mxu0 %vm1259_vm0, %v11285_v7  ;;  %8239 = vst.msk [vmem:[%s11277_s21 + $0x18] sm:$0xff] %vm1259_vm0, %v9612_v23  ;;  %v9626_v25 = vpop.f32.mrf.mxu1  ;;  %9961 = vmatmul.mubr.msk.f32.gmra.mxu1 %vm1259_vm0, %v1106_v15  ;;  %v11435_v7 = vrot.slane %v552_v1, %v10704_v14  ;;  %v291_v15 = vld [vmem:[%s10676_s18 + $0x3c0] sm:$0xff]  ;;  %v296_v23 = vld [vmem:[%s10676_s18 + $0x3e8] sm:$0xff]  ;;  %v11579_v1 = vld [vmem:[%s10676_s18 + $0x458] sm:$0xff] }
  0xe9   : > { %9980 = vmatpush3.xpose.msk.msra.mxu1 %vm1259_vm0, %v281_v12  ;;  %9967 = vmatprep.subr.msk.mxu0 %vm1259_vm0, %v276_v20  ;;  %8243 = vst.msk [vmem:[%s11277_s21 + $0x38] sm:$0xff] %vm1259_vm0, %v9626_v25  ;;  %v1360_v26 = vpop.f32.mrf.mxu0  ;;  %v11447_v12 = vrot.slane %v554_v4, %v10704_v14  ;;  %v11583_v4 = vld [vmem:[%s10676_s18 + $0x478] sm:$0xff] }
  0xea   : > { %9981 = vmatprep.subr.msk.mxu1 %vm1259_vm0, %v280_v22  ;;  %8238 = vst.msk [vmem:[%s11277_s21 + $0x10] sm:$0xff] %vm1259_vm0, %v1360_v26  ;;  %v1469_v27 = vpop.f32.mrf.mxu1  ;;  %9971 = vmatprep.mubr.msk.f32.mxu0 %vm1259_vm0, %v1107_v21  ;;  %v292_v21 = vld [vmem:[%s10676_s18 + $0x3c8] sm:$0xff]  ;;  %v1125_v39 = vmul.f32 %v11435_v7, %v11440_v8 }
  0xeb   : > { %8242 = vst.msk [vmem:[%s11277_s21 + $0x30] sm:$0xff] %vm1259_vm0, %v1469_v27  ;;  %9985 = vmatprep.mubr.msk.f32.mxu1 %vm1259_vm0, %v1111_v24  ;;  %v1127_v25 = vmul.f32 %v11447_v12, %v295_v18 }
  0xec   : > { %9968 = vmatpush3.xpose.msk.msra.mxu0 %vm1259_vm0, %v276_v20 }
  0xed   : > { %9982 = vmatpush3.xpose.msk.msra.mxu1 %vm1259_vm0, %v280_v22  ;;  %9969 = vmatprep.subr.msk.mxu0 %vm1259_vm0, %v275_v13  ;;  %v1123_v22 = vmul.f32 %v11435_v7, %v291_v15 }
  0xee   : > { %9983 = vmatprep.subr.msk.mxu1 %vm1259_vm0, %v279_v17 }
  0xf0   : > { %9970 = vmatpush3.xpose.msk.msra.mxu0 %vm1259_vm0, %v275_v13  ;;  %v297_v13 = vld [vmem:[%s10676_s18 + $0x3f0] sm:$0xff] }
  0xf1   : > { %9984 = vmatpush3.xpose.msk.msra.mxu1 %vm1259_vm0, %v279_v17  ;;  %9991 = vmatprep.subr.msk.mxu0 %vm1259_vm0, %v11342_v32 }
  0xf2   : > { %10005 = vmatprep.subr.msk.mxu1 %vm1259_vm0, %v11346_v35  ;;  %v10570_v31 = vpop.eup %10569 }
  0xf3   : > { %v9637_v43 = vpop.f32.mrf.mxu0  ;;  %9972 = vmatmul.mubr.msk.f32.vlgmr.msra.gmra.mxu0 %vm1259_vm0, %v1108_v34  ;;  %v556_v34 = vmul.f32 0.6931472, %v10568_v29  ;;  %v10572_v61 = vpop.eup %10571 }
  0xf4   : > { %8245 = vst.msk [vmem:[%s11277_s21 + $0x48] sm:$0xff] %vm1259_vm0, %v9637_v43  ;;  %v9651_v48 = vpop.f32.mrf.mxu1  ;;  %9986 = vmatmul.mubr.msk.f32.vlgmr.msra.gmra.mxu1 %vm1259_vm0, %v1112_v37  ;;  %9992 = vmatpush3.xpose.msk.msra.mxu0 %vm1259_vm0, %v11342_v32  ;;  %v462_v32 = vld [vmem:[%s10669_s15 + $0x23] sm:$0x1]  ;;  %v558_v37 = vmul.f32 0.6931472, %v10570_v31  ;;  %v1129_v43 = vmul.f32 %v11447_v12, %v297_v13 }
  0xf5   : > { %8249 = vst.msk [vmem:[%s11277_s21 + $0x68] sm:$0xff] %vm1259_vm0, %v9651_v48  ;;  %10006 = vmatpush3.xpose.msk.msra.mxu1 %vm1259_vm0, %v11346_v35  ;;  %v1568_v50 = vpop.f32.mrf.mxu0  ;;  %9993 = vmatprep.subr.msk.mxu0 %vm1259_vm0, %v11361_v40  ;;  %v1124_v35 = vmul.f32 %v11435_v7, %v292_v21  ;;  %10573 = vlog2.f32 %v462_v32  ;;  %v1130_v48 = vmul.f32 %v11447_v12, %v11425_v3  ;;  %v465_v31 = vld [vmem:[%s10669_s15 + $0x26] sm:$0x1] }
  0xf6   : > { %8244 = vst.msk [vmem:[%s11277_s21 + $0x40] sm:$0xff] %vm1259_vm0, %v1568_v50  ;;  %v1677_v51 = vpop.f32.mrf.mxu1  ;;  %10007 = vmatprep.subr.msk.mxu1 %vm1259_vm0, %v289_v45  ;;  %9974 = vmatprep.mubr.msk.f32.mxu0 %vm1259_vm0, %v1109_v38  ;;  %v1128_v38 = vmul.f32 %v11447_v12, %v296_v23  ;;  %v303_v50 = vld [vmem:[%s10676_s18 + $0x420] sm:$0xff]  ;;  %10575 = vlog2.f32 %v463_v62 }
  0xf7   : > { %8248 = vst.msk [vmem:[%s11277_s21 + $0x60] sm:$0xff] %vm1259_vm0, %v1677_v51  ;;  %9988 = vmatprep.mubr.msk.f32.mxu1 %vm1259_vm0, %v1113_v42  ;;  %v9640_v55 = vpop.f32.mrf.mxu0  ;;  %9975 = vmatmul.mubr.msk.f32.gmra.mxu0 %vm1259_vm0, %v1110_v41  ;;  %v11519_v41 = vld [vmem:[%s10676_s18 + $0x410] sm:$0xff]  ;;  %v1126_v42 = vmul.f32 %v11435_v7, %v11421_v0 }
  0xf8   : > { %9994 = vmatpush3.xpose.msk.msra.mxu0 %vm1259_vm0, %v11361_v40  ;;  %8247 = vst.msk [vmem:[%s11277_s21 + $0x58] sm:$0xff] %vm1259_vm0, %v9640_v55  ;;  %v9654_v57 = vpop.f32.mrf.mxu1  ;;  %9989 = vmatmul.mubr.msk.f32.gmra.mxu1 %vm1259_vm0, %v1114_v47  ;;  %v11514_v40 = vrot.slane %v556_v34, %v10704_v14  ;;  %v299_v47 = vld [vmem:[%s10676_s18 + $0x400] sm:$0xff]  ;;  %v304_v55 = vld [vmem:[%s10676_s18 + $0x428] sm:$0xff]  ;;  %v11658_v34 = vld [vmem:[%s10676_s18 + $0x498] sm:$0xff] }
  0xf9   : > { %10008 = vmatpush3.xpose.msk.msra.mxu1 %vm1259_vm0, %v289_v45  ;;  %9995 = vmatprep.subr.msk.mxu0 %vm1259_vm0, %v284_v52  ;;  %8251 = vst.msk [vmem:[%s11277_s21 + $0x78] sm:$0xff] %vm1259_vm0, %v9654_v57  ;;  %v1578_v58 = vpop.f32.mrf.mxu0  ;;  %v11526_v45 = vrot.slane %v558_v37, %v10704_v14  ;;  %v11662_v37 = vld [vmem:[%s10676_s18 + $0x4b8] sm:$0xff] }
  0xfa   : > { %10009 = vmatprep.subr.msk.mxu1 %vm1259_vm0, %v288_v54  ;;  %8246 = vst.msk [vmem:[%s11277_s21 + $0x50] sm:$0xff] %vm1259_vm0, %v1578_v58  ;;  %v1687_v59 = vpop.f32.mrf.mxu1  ;;  %9999 = vmatprep.mubr.msk.f32.mxu0 %vm1259_vm0, %v1115_v53  ;;  %v300_v53 = vld [vmem:[%s10676_s18 + $0x408] sm:$0xff]  ;;  %v1133_v7 = vmul.f32 %v11514_v40, %v11519_v41 }
  0xfb   : > { %8250 = vst.msk [vmem:[%s11277_s21 + $0x70] sm:$0xff] %vm1259_vm0, %v1687_v59  ;;  %10013 = vmatprep.mubr.msk.f32.mxu1 %vm1259_vm0, %v1119_v56  ;;  %v1135_v57 = vmul.f32 %v11526_v45, %v303_v50 }
  0xfc   : > { %9996 = vmatpush3.xpose.msk.msra.mxu0 %vm1259_vm0, %v284_v52 }
  0xfd   : > { %10010 = vmatpush3.xpose.msk.msra.mxu1 %vm1259_vm0, %v288_v54  ;;  %9997 = vmatprep.subr.msk.mxu0 %vm1259_vm0, %v283_v46  ;;  %v1131_v54 = vmul.f32 %v11514_v40, %v299_v47 }
  0xfe   : > { %10011 = vmatprep.subr.msk.mxu1 %vm1259_vm0, %v287_v49 }
 0x100   : > { %9998 = vmatpush3.xpose.msk.msra.mxu0 %vm1259_vm0, %v283_v46  ;;  %v305_v46 = vld [vmem:[%s10676_s18 + $0x430] sm:$0xff] }
 0x101   : > { %10012 = vmatpush3.xpose.msk.msra.mxu1 %vm1259_vm0, %v287_v49  ;;  %10019 = vmatprep.subr.msk.mxu0 %vm1259_vm0, %v11421_v0 }
 0x102   : > { %10033 = vmatprep.subr.msk.mxu1 %vm1259_vm0, %v11425_v3  ;;  %v10574_v63 = vpop.eup %10573 }
 0x103   : > { %v9665_v11 = vpop.f32.mrf.mxu0  ;;  %10000 = vmatmul.mubr.msk.f32.vlgmr.msra.gmra.mxu0 %vm1259_vm0, %v1116_v2  ;;  %v560_v2 = vmul.f32 0.6931472, %v10572_v61  ;;  %v10576_v30 = vpop.eup %10575 }
 0x104   : > { %8253 = vst.msk [vmem:[%s11277_s21 + $0x88] sm:$0xff] %vm1259_vm0, %v9665_v11  ;;  %v9679_v17 = vpop.f32.mrf.mxu1  ;;  %10014 = vmatmul.mubr.msk.f32.vlgmr.msra.gmra.mxu1 %vm1259_vm0, %v1120_v5  ;;  %10020 = vmatpush3.xpose.msk.msra.mxu0 %vm1259_vm0, %v11421_v0  ;;  %v464_v0 = vld [vmem:[%s10669_s15 + $0x25] sm:$0x1]  ;;  %v562_v5 = vmul.f32 0.6931472, %v10574_v63  ;;  %v1137_v11 = vmul.f32 %v11526_v45, %v305_v46 }
 0x105   : > { %8257 = vst.msk [vmem:[%s11277_s21 + $0xa8] sm:$0xff] %vm1259_vm0, %v9679_v17  ;;  %10034 = vmatpush3.xpose.msk.msra.mxu1 %vm1259_vm0, %v11425_v3  ;;  %v1786_v19 = vpop.f32.mrf.mxu0  ;;  %10021 = vmatprep.subr.msk.mxu0 %vm1259_vm0, %v11440_v8  ;;  %v1132_v3 = vmul.f32 %v11514_v40, %v300_v53  ;;  %10577 = vlog2.f32 %v464_v0  ;;  %v1138_v17 = vmul.f32 %v11526_v45, %v11504_v36  ;;  %v467_v63 = vld [vmem:[%s10669_s15 + $0x28] sm:$0x1] }
 0x106   : > { %8252 = vst.msk [vmem:[%s11277_s21 + $0x80] sm:$0xff] %vm1259_vm0, %v1786_v19  ;;  %v1895_v20 = vpop.f32.mrf.mxu1  ;;  %10035 = vmatprep.subr.msk.mxu1 %vm1259_vm0, %v297_v13  ;;  %10002 = vmatprep.mubr.msk.f32.mxu0 %vm1259_vm0, %v1117_v6  ;;  %v1136_v6 = vmul.f32 %v11526_v45, %v304_v55  ;;  %v311_v19 = vld [vmem:[%s10676_s18 + $0x460] sm:$0xff]  ;;  %10579 = vlog2.f32 %v465_v31 }
 0x107   : > { %8256 = vst.msk [vmem:[%s11277_s21 + $0xa0] sm:$0xff] %vm1259_vm0, %v1895_v20  ;;  %10016 = vmatprep.mubr.msk.f32.mxu1 %vm1259_vm0, %v1121_v10  ;;  %v9668_v24 = vpop.f32.mrf.mxu0  ;;  %10003 = vmatmul.mubr.msk.f32.gmra.mxu0 %vm1259_vm0, %v1118_v9  ;;  %v11598_v9 = vld [vmem:[%s10676_s18 + $0x450] sm:$0xff]  ;;  %v1134_v10 = vmul.f32 %v11514_v40, %v11500_v33 }
 0x108   : > { %10022 = vmatpush3.xpose.msk.msra.mxu0 %vm1259_vm0, %v11440_v8  ;;  %8255 = vst.msk [vmem:[%s11277_s21 + $0x98] sm:$0xff] %vm1259_vm0, %v9668_v24  ;;  %v9682_v26 = vpop.f32.mrf.mxu1  ;;  %10017 = vmatmul.mubr.msk.f32.gmra.mxu1 %vm1259_vm0, %v1122_v16  ;;  %v11593_v8 = vrot.slane %v560_v2, %v10704_v14  ;;  %v307_v16 = vld [vmem:[%s10676_s18 + $0x440] sm:$0xff]  ;;  %v312_v24 = vld [vmem:[%s10676_s18 + $0x468] sm:$0xff]  ;;  %v11737_v2 = vld [vmem:[%s10676_s18 + $0x4d8] sm:$0xff] }
 0x109   : > { %10036 = vmatpush3.xpose.msk.msra.mxu1 %vm1259_vm0, %v297_v13  ;;  %10023 = vmatprep.subr.msk.mxu0 %vm1259_vm0, %v292_v21  ;;  %8259 = vst.msk [vmem:[%s11277_s21 + $0xb8] sm:$0xff] %vm1259_vm0, %v9682_v26  ;;  %v1796_v27 = vpop.f32.mrf.mxu0  ;;  %v11605_v13 = vrot.slane %v562_v5, %v10704_v14  ;;  %v11741_v5 = vld [vmem:[%s10676_s18 + $0x4f8] sm:$0xff] }
 0x10a   : > { %10037 = vmatprep.subr.msk.mxu1 %vm1259_vm0, %v296_v23  ;;  %8254 = vst.msk [vmem:[%s11277_s21 + $0x90] sm:$0xff] %vm1259_vm0, %v1796_v27  ;;  %v1905_v28 = vpop.f32.mrf.mxu1  ;;  %10027 = vmatprep.mubr.msk.f32.mxu0 %vm1259_vm0, %v1123_v22  ;;  %v308_v22 = vld [vmem:[%s10676_s18 + $0x448] sm:$0xff]  ;;  %v1141_v40 = vmul.f32 %v11593_v8, %v11598_v9 }
 0x10b   : > { %8258 = vst.msk [vmem:[%s11277_s21 + $0xb0] sm:$0xff] %vm1259_vm0, %v1905_v28  ;;  %10041 = vmatprep.mubr.msk.f32.mxu1 %vm1259_vm0, %v1127_v25  ;;  %v1143_v26 = vmul.f32 %v11605_v13, %v311_v19 }
 0x10c   : > { %10024 = vmatpush3.xpose.msk.msra.mxu0 %vm1259_vm0, %v292_v21 }
 0x10d   : > { %10038 = vmatpush3.xpose.msk.msra.mxu1 %vm1259_vm0, %v296_v23  ;;  %10025 = vmatprep.subr.msk.mxu0 %vm1259_vm0, %v291_v15  ;;  %v1139_v23 = vmul.f32 %v11593_v8, %v307_v16 }
 0x10e   : > { %10039 = vmatprep.subr.msk.mxu1 %vm1259_vm0, %v295_v18 }
 0x110   : > { %10026 = vmatpush3.xpose.msk.msra.mxu0 %vm1259_vm0, %v291_v15  ;;  %v313_v15 = vld [vmem:[%s10676_s18 + $0x470] sm:$0xff] }
 0x111   : > { %10040 = vmatpush3.xpose.msk.msra.mxu1 %vm1259_vm0, %v295_v18  ;;  %10047 = vmatprep.subr.msk.mxu0 %vm1259_vm0, %v11500_v33 }
 0x112   : > { %10061 = vmatprep.subr.msk.mxu1 %vm1259_vm0, %v11504_v36  ;;  %v10578_v32 = vpop.eup %10577 }
 0x113   : > { %v9693_v44 = vpop.f32.mrf.mxu0  ;;  %10028 = vmatmul.mubr.msk.f32.vlgmr.msra.gmra.mxu0 %vm1259_vm0, %v1124_v35  ;;  %v564_v35 = vmul.f32 0.6931472, %v10576_v30  ;;  %v10580_v62 = vpop.eup %10579 }
 0x114   : > { %8261 = vst.msk [vmem:[%s11277_s21 + $0xc8] sm:$0xff] %vm1259_vm0, %v9693_v44  ;;  %v9707_v49 = vpop.f32.mrf.mxu1  ;;  %10042 = vmatmul.mubr.msk.f32.vlgmr.msra.gmra.mxu1 %vm1259_vm0, %v1128_v38  ;;  %10048 = vmatpush3.xpose.msk.msra.mxu0 %vm1259_vm0, %v11500_v33  ;;  %v466_v33 = vld [vmem:[%s10669_s15 + $0x27] sm:$0x1]  ;;  %v566_v38 = vmul.f32 0.6931472, %v10578_v32  ;;  %v1145_v44 = vmul.f32 %v11605_v13, %v313_v15 }
 0x115   : > { %8265 = vst.msk [vmem:[%s11277_s21 + $0xe8] sm:$0xff] %vm1259_vm0, %v9707_v49  ;;  %10062 = vmatpush3.xpose.msk.msra.mxu1 %vm1259_vm0, %v11504_v36  ;;  %v2004_v51 = vpop.f32.mrf.mxu0  ;;  %10049 = vmatprep.subr.msk.mxu0 %vm1259_vm0, %v11519_v41  ;;  %v1140_v36 = vmul.f32 %v11593_v8, %v308_v22  ;;  %10581 = vlog2.f32 %v466_v33  ;;  %v1146_v49 = vmul.f32 %v11605_v13, %v11583_v4  ;;  %v469_v32 = vld [vmem:[%s10669_s15 + $0x2a] sm:$0x1] }
 0x116   : > { %8260 = vst.msk [vmem:[%s11277_s21 + $0xc0] sm:$0xff] %vm1259_vm0, %v2004_v51  ;;  %v2113_v52 = vpop.f32.mrf.mxu1  ;;  %10063 = vmatprep.subr.msk.mxu1 %vm1259_vm0, %v305_v46  ;;  %10030 = vmatprep.mubr.msk.f32.mxu0 %vm1259_vm0, %v1125_v39  ;;  %v1144_v39 = vmul.f32 %v11605_v13, %v312_v24  ;;  %v319_v51 = vld [vmem:[%s10676_s18 + $0x4a0] sm:$0xff]  ;;  %10583 = vlog2.f32 %v467_v63 }
 0x117   : > { %8264 = vst.msk [vmem:[%s11277_s21 + $0xe0] sm:$0xff] %vm1259_vm0, %v2113_v52  ;;  %10044 = vmatprep.mubr.msk.f32.mxu1 %vm1259_vm0, %v1129_v43  ;;  %v9696_v56 = vpop.f32.mrf.mxu0  ;;  %10031 = vmatmul.mubr.msk.f32.gmra.mxu0 %vm1259_vm0, %v1126_v42  ;;  %v11677_v42 = vld [vmem:[%s10676_s18 + $0x490] sm:$0xff]  ;;  %v1142_v43 = vmul.f32 %v11593_v8, %v11579_v1 }
 0x118   : > { %10050 = vmatpush3.xpose.msk.msra.mxu0 %vm1259_vm0, %v11519_v41  ;;  %8263 = vst.msk [vmem:[%s11277_s21 + $0xd8] sm:$0xff] %vm1259_vm0, %v9696_v56  ;;  %v9710_v58 = vpop.f32.mrf.mxu1  ;;  %10045 = vmatmul.mubr.msk.f32.gmra.mxu1 %vm1259_vm0, %v1130_v48  ;;  %v11672_v41 = vrot.slane %v564_v35, %v10704_v14  ;;  %v315_v48 = vld [vmem:[%s10676_s18 + $0x480] sm:$0xff]  ;;  %v320_v56 = vld [vmem:[%s10676_s18 + $0x4a8] sm:$0xff]  ;;  %v11816_v35 = vld [vmem:[%s10676_s18 + $0x518] sm:$0xff] }
 0x119   : > { %10064 = vmatpush3.xpose.msk.msra.mxu1 %vm1259_vm0, %v305_v46  ;;  %10051 = vmatprep.subr.msk.mxu0 %vm1259_vm0, %v300_v53  ;;  %8267 = vst.msk [vmem:[%s11277_s21 + $0xf8] sm:$0xff] %vm1259_vm0, %v9710_v58  ;;  %v2014_v59 = vpop.f32.mrf.mxu0  ;;  %v11684_v46 = vrot.slane %v566_v38, %v10704_v14  ;;  %v11820_v38 = vld [vmem:[%s10676_s18 + $0x538] sm:$0xff] }
 0x11a   : > { %10065 = vmatprep.subr.msk.mxu1 %vm1259_vm0, %v304_v55  ;;  %8262 = vst.msk [vmem:[%s11277_s21 + $0xd0] sm:$0xff] %vm1259_vm0, %v2014_v59  ;;  %v2123_v60 = vpop.f32.mrf.mxu1  ;;  %10055 = vmatprep.mubr.msk.f32.mxu0 %vm1259_vm0, %v1131_v54  ;;  %v316_v54 = vld [vmem:[%s10676_s18 + $0x488] sm:$0xff]  ;;  %v1149_v8 = vmul.f32 %v11672_v41, %v11677_v42 }
 0x11b   : > { %8266 = vst.msk [vmem:[%s11277_s21 + $0xf0] sm:$0xff] %vm1259_vm0, %v2123_v60  ;;  %10069 = vmatprep.mubr.msk.f32.mxu1 %vm1259_vm0, %v1135_v57  ;;  %v1151_v58 = vmul.f32 %v11684_v46, %v319_v51 }
 0x11c   : > { %10052 = vmatpush3.xpose.msk.msra.mxu0 %vm1259_vm0, %v300_v53 }
 0x11d   : > { %10066 = vmatpush3.xpose.msk.msra.mxu1 %vm1259_vm0, %v304_v55  ;;  %10053 = vmatprep.subr.msk.mxu0 %vm1259_vm0, %v299_v47  ;;  %v1147_v55 = vmul.f32 %v11672_v41, %v315_v48 }
 0x11e   : > { %10067 = vmatprep.subr.msk.mxu1 %vm1259_vm0, %v303_v50 }
 0x120   : > { %10054 = vmatpush3.xpose.msk.msra.mxu0 %vm1259_vm0, %v299_v47  ;;  %v321_v47 = vld [vmem:[%s10676_s18 + $0x4b0] sm:$0xff] }
 0x121   : > { %10068 = vmatpush3.xpose.msk.msra.mxu1 %vm1259_vm0, %v303_v50  ;;  %10075 = vmatprep.subr.msk.mxu0 %vm1259_vm0, %v11579_v1 }
 0x122   : > { %10089 = vmatprep.subr.msk.mxu1 %vm1259_vm0, %v11583_v4  ;;  %v10582_v0 = vpop.eup %10581 }
 0x123   : > { %v9721_v12 = vpop.f32.mrf.mxu0  ;;  %10056 = vmatmul.mubr.msk.f32.vlgmr.msra.gmra.mxu0 %vm1259_vm0, %v1132_v3  ;;  %v568_v3 = vmul.f32 0.6931472, %v10580_v62  ;;  %v10584_v31 = vpop.eup %10583 }
 0x124   : > { %8269 = vst.msk [vmem:[%s11277_s21 + $0x108] sm:$0xff] %vm1259_vm0, %v9721_v12  ;;  %v9735_v18 = vpop.f32.mrf.mxu1  ;;  %10070 = vmatmul.mubr.msk.f32.vlgmr.msra.gmra.mxu1 %vm1259_vm0, %v1136_v6  ;;  %10076 = vmatpush3.xpose.msk.msra.mxu0 %vm1259_vm0, %v11579_v1  ;;  %v468_v1 = vld [vmem:[%s10669_s15 + $0x29] sm:$0x1]  ;;  %v570_v6 = vmul.f32 0.6931472, %v10582_v0  ;;  %v1153_v12 = vmul.f32 %v11684_v46, %v321_v47 }
 0x125   : > { %8273 = vst.msk [vmem:[%s11277_s21 + $0x128] sm:$0xff] %vm1259_vm0, %v9735_v18  ;;  %10090 = vmatpush3.xpose.msk.msra.mxu1 %vm1259_vm0, %v11583_v4  ;;  %v2222_v20 = vpop.f32.mrf.mxu0  ;;  %10077 = vmatprep.subr.msk.mxu0 %vm1259_vm0, %v11598_v9  ;;  %v1148_v4 = vmul.f32 %v11672_v41, %v316_v54  ;;  %10585 = vlog2.f32 %v468_v1  ;;  %v1154_v18 = vmul.f32 %v11684_v46, %v11662_v37  ;;  %v471_v0 = vld [vmem:[%s10669_s15 + $0x2c] sm:$0x1] }
 0x126   : > { %8268 = vst.msk [vmem:[%s11277_s21 + $0x100] sm:$0xff] %vm1259_vm0, %v2222_v20  ;;  %v2331_v21 = vpop.f32.mrf.mxu1  ;;  %10091 = vmatprep.subr.msk.mxu1 %vm1259_vm0, %v313_v15  ;;  %10058 = vmatprep.mubr.msk.f32.mxu0 %vm1259_vm0, %v1133_v7  ;;  %v1152_v7 = vmul.f32 %v11684_v46, %v320_v56  ;;  %v327_v20 = vld [vmem:[%s10676_s18 + $0x4e0] sm:$0xff]  ;;  %10587 = vlog2.f32 %v469_v32 }
 0x127   : > { %8272 = vst.msk [vmem:[%s11277_s21 + $0x120] sm:$0xff] %vm1259_vm0, %v2331_v21  ;;  %10072 = vmatprep.mubr.msk.f32.mxu1 %vm1259_vm0, %v1137_v11  ;;  %v9724_v25 = vpop.f32.mrf.mxu0  ;;  %10059 = vmatmul.mubr.msk.f32.gmra.mxu0 %vm1259_vm0, %v1134_v10  ;;  %v11756_v10 = vld [vmem:[%s10676_s18 + $0x4d0] sm:$0xff]  ;;  %v1150_v11 = vmul.f32 %v11672_v41, %v11658_v34 }
 0x128   : > { %10078 = vmatpush3.xpose.msk.msra.mxu0 %vm1259_vm0, %v11598_v9  ;;  %8271 = vst.msk [vmem:[%s11277_s21 + $0x118] sm:$0xff] %vm1259_vm0, %v9724_v25  ;;  %v9738_v27 = vpop.f32.mrf.mxu1  ;;  %10073 = vmatmul.mubr.msk.f32.gmra.mxu1 %vm1259_vm0, %v1138_v17  ;;  %v11751_v9 = vrot.slane %v568_v3, %v10704_v14  ;;  %v323_v17 = vld [vmem:[%s10676_s18 + $0x4c0] sm:$0xff]  ;;  %v328_v25 = vld [vmem:[%s10676_s18 + $0x4e8] sm:$0xff]  ;;  %v11895_v3 = vld [vmem:[%s10676_s18 + $0x558] sm:$0xff] }
 0x129   : > { %10092 = vmatpush3.xpose.msk.msra.mxu1 %vm1259_vm0, %v313_v15  ;;  %10079 = vmatprep.subr.msk.mxu0 %vm1259_vm0, %v308_v22  ;;  %8275 = vst.msk [vmem:[%s11277_s21 + $0x138] sm:$0xff] %vm1259_vm0, %v9738_v27  ;;  %v2232_v28 = vpop.f32.mrf.mxu0  ;;  %v11763_v15 = vrot.slane %v570_v6, %v10704_v14  ;;  %v11899_v6 = vld [vmem:[%s10676_s18 + $0x578] sm:$0xff] }
 0x12a   : > { %10093 = vmatprep.subr.msk.mxu1 %vm1259_vm0, %v312_v24  ;;  %8270 = vst.msk [vmem:[%s11277_s21 + $0x110] sm:$0xff] %vm1259_vm0, %v2232_v28  ;;  %v2341_v29 = vpop.f32.mrf.mxu1  ;;  %10083 = vmatprep.mubr.msk.f32.mxu0 %vm1259_vm0, %v1139_v23  ;;  %v324_v23 = vld [vmem:[%s10676_s18 + $0x4c8] sm:$0xff]  ;;  %v1157_v41 = vmul.f32 %v11751_v9, %v11756_v10 }
 0x12b   : > { %8274 = vst.msk [vmem:[%s11277_s21 + $0x130] sm:$0xff] %vm1259_vm0, %v2341_v29  ;;  %10097 = vmatprep.mubr.msk.f32.mxu1 %vm1259_vm0, %v1143_v26  ;;  %v1159_v27 = vmul.f32 %v11763_v15, %v327_v20 }
 0x12c   : > { %10080 = vmatpush3.xpose.msk.msra.mxu0 %vm1259_vm0, %v308_v22 }
 0x12d   : > { %10094 = vmatpush3.xpose.msk.msra.mxu1 %vm1259_vm0, %v312_v24  ;;  %10081 = vmatprep.subr.msk.mxu0 %vm1259_vm0, %v307_v16  ;;  %v1155_v24 = vmul.f32 %v11751_v9, %v323_v17 }
 0x12e   : > { %10095 = vmatprep.subr.msk.mxu1 %vm1259_vm0, %v311_v19 }
 0x130   : > { %10082 = vmatpush3.xpose.msk.msra.mxu0 %vm1259_vm0, %v307_v16  ;;  %v329_v16 = vld [vmem:[%s10676_s18 + $0x4f0] sm:$0xff] }
 0x131   : > { %10096 = vmatpush3.xpose.msk.msra.mxu1 %vm1259_vm0, %v311_v19  ;;  %10103 = vmatprep.subr.msk.mxu0 %vm1259_vm0, %v11658_v34 }
 0x132   : > { %10117 = vmatprep.subr.msk.mxu1 %vm1259_vm0, %v11662_v37  ;;  %v10586_v33 = vpop.eup %10585 }
 0x133   : > { %v9749_v45 = vpop.f32.mrf.mxu0  ;;  %10084 = vmatmul.mubr.msk.f32.vlgmr.msra.gmra.mxu0 %vm1259_vm0, %v1140_v36  ;;  %v572_v36 = vmul.f32 0.6931472, %v10584_v31  ;;  %v10588_v63 = vpop.eup %10587 }
 0x134   : > { %8277 = vst.msk [vmem:[%s11277_s21 + $0x148] sm:$0xff] %vm1259_vm0, %v9749_v45  ;;  %v9763_v50 = vpop.f32.mrf.mxu1  ;;  %10098 = vmatmul.mubr.msk.f32.vlgmr.msra.gmra.mxu1 %vm1259_vm0, %v1144_v39  ;;  %10104 = vmatpush3.xpose.msk.msra.mxu0 %vm1259_vm0, %v11658_v34  ;;  %v470_v34 = vld [vmem:[%s10669_s15 + $0x2b] sm:$0x1]  ;;  %v574_v39 = vmul.f32 0.6931472, %v10586_v33  ;;  %v1161_v45 = vmul.f32 %v11763_v15, %v329_v16 }
 0x135   : > { %8281 = vst.msk [vmem:[%s11277_s21 + $0x168] sm:$0xff] %vm1259_vm0, %v9763_v50  ;;  %10118 = vmatpush3.xpose.msk.msra.mxu1 %vm1259_vm0, %v11662_v37  ;;  %v2440_v52 = vpop.f32.mrf.mxu0  ;;  %10105 = vmatprep.subr.msk.mxu0 %vm1259_vm0, %v11677_v42  ;;  %v1156_v37 = vmul.f32 %v11751_v9, %v324_v23  ;;  %10589 = vlog2.f32 %v470_v34  ;;  %v1162_v50 = vmul.f32 %v11763_v15, %v11741_v5  ;;  %v473_v33 = vld [vmem:[%s10669_s15 + $0x2e] sm:$0x1] }
 0x136   : > { %8276 = vst.msk [vmem:[%s11277_s21 + $0x140] sm:$0xff] %vm1259_vm0, %v2440_v52  ;;  %v2549_v53 = vpop.f32.mrf.mxu1  ;;  %10119 = vmatprep.subr.msk.mxu1 %vm1259_vm0, %v321_v47  ;;  %10086 = vmatprep.mubr.msk.f32.mxu0 %vm1259_vm0, %v1141_v40  ;;  %v1160_v40 = vmul.f32 %v11763_v15, %v328_v25  ;;  %v335_v52 = vld [vmem:[%s10676_s18 + $0x520] sm:$0xff]  ;;  %10591 = vlog2.f32 %v471_v0 }
 0x137   : > { %8280 = vst.msk [vmem:[%s11277_s21 + $0x160] sm:$0xff] %vm1259_vm0, %v2549_v53  ;;  %10100 = vmatprep.mubr.msk.f32.mxu1 %vm1259_vm0, %v1145_v44  ;;  %v9752_v57 = vpop.f32.mrf.mxu0  ;;  %10087 = vmatmul.mubr.msk.f32.gmra.mxu0 %vm1259_vm0, %v1142_v43  ;;  %v11835_v43 = vld [vmem:[%s10676_s18 + $0x510] sm:$0xff]  ;;  %v1158_v44 = vmul.f32 %v11751_v9, %v11737_v2 }
 0x138   : > { %10106 = vmatpush3.xpose.msk.msra.mxu0 %vm1259_vm0, %v11677_v42  ;;  %8279 = vst.msk [vmem:[%s11277_s21 + $0x158] sm:$0xff] %vm1259_vm0, %v9752_v57  ;;  %v9766_v59 = vpop.f32.mrf.mxu1  ;;  %10101 = vmatmul.mubr.msk.f32.gmra.mxu1 %vm1259_vm0, %v1146_v49  ;;  %v11830_v42 = vrot.slane %v572_v36, %v10704_v14  ;;  %v331_v49 = vld [vmem:[%s10676_s18 + $0x500] sm:$0xff]  ;;  %v336_v57 = vld [vmem:[%s10676_s18 + $0x528] sm:$0xff]  ;;  %v11974_v36 = vld [vmem:[%s10676_s18 + $0x598] sm:$0xff] }
 0x139   : > { %10120 = vmatpush3.xpose.msk.msra.mxu1 %vm1259_vm0, %v321_v47  ;;  %10107 = vmatprep.subr.msk.mxu0 %vm1259_vm0, %v316_v54  ;;  %8283 = vst.msk [vmem:[%s11277_s21 + $0x178] sm:$0xff] %vm1259_vm0, %v9766_v59  ;;  %v2450_v60 = vpop.f32.mrf.mxu0  ;;  %v11842_v47 = vrot.slane %v574_v39, %v10704_v14  ;;  %v11978_v39 = vld [vmem:[%s10676_s18 + $0x5b8] sm:$0xff] }
 0x13a   : > { %10121 = vmatprep.subr.msk.mxu1 %vm1259_vm0, %v320_v56  ;;  %8278 = vst.msk [vmem:[%s11277_s21 + $0x150] sm:$0xff] %vm1259_vm0, %v2450_v60  ;;  %v2559_v61 = vpop.f32.mrf.mxu1  ;;  %10111 = vmatprep.mubr.msk.f32.mxu0 %vm1259_vm0, %v1147_v55  ;;  %v332_v55 = vld [vmem:[%s10676_s18 + $0x508] sm:$0xff]  ;;  %v1165_v9 = vmul.f32 %v11830_v42, %v11835_v43 }
 0x13b   : > { %8282 = vst.msk [vmem:[%s11277_s21 + $0x170] sm:$0xff] %vm1259_vm0, %v2559_v61  ;;  %10125 = vmatprep.mubr.msk.f32.mxu1 %vm1259_vm0, %v1151_v58  ;;  %v1167_v59 = vmul.f32 %v11842_v47, %v335_v52 }
 0x13c   : > { %10108 = vmatpush3.xpose.msk.msra.mxu0 %vm1259_vm0, %v316_v54 }
 0x13d   : > { %10122 = vmatpush3.xpose.msk.msra.mxu1 %vm1259_vm0, %v320_v56  ;;  %10109 = vmatprep.subr.msk.mxu0 %vm1259_vm0, %v315_v48  ;;  %v1163_v56 = vmul.f32 %v11830_v42, %v331_v49 }
 0x13e   : > { %10123 = vmatprep.subr.msk.mxu1 %vm1259_vm0, %v319_v51 }
 0x140   : > { %10110 = vmatpush3.xpose.msk.msra.mxu0 %vm1259_vm0, %v315_v48  ;;  %v337_v48 = vld [vmem:[%s10676_s18 + $0x530] sm:$0xff] }
 0x141   : > { %10124 = vmatpush3.xpose.msk.msra.mxu1 %vm1259_vm0, %v319_v51  ;;  %10131 = vmatprep.subr.msk.mxu0 %vm1259_vm0, %v11737_v2 }
 0x142   : > { %10145 = vmatprep.subr.msk.mxu1 %vm1259_vm0, %v11741_v5  ;;  %v10590_v1 = vpop.eup %10589 }
 0x143   : > { %v9777_v13 = vpop.f32.mrf.mxu0  ;;  %10112 = vmatmul.mubr.msk.f32.vlgmr.msra.gmra.mxu0 %vm1259_vm0, %v1148_v4  ;;  %v576_v4 = vmul.f32 0.6931472, %v10588_v63  ;;  %v10592_v32 = vpop.eup %10591 }
 0x144   : > { %8285 = vst.msk [vmem:[%s11277_s21 + $0x188] sm:$0xff] %vm1259_vm0, %v9777_v13  ;;  %v9791_v19 = vpop.f32.mrf.mxu1  ;;  %10126 = vmatmul.mubr.msk.f32.vlgmr.msra.gmra.mxu1 %vm1259_vm0, %v1152_v7  ;;  %10132 = vmatpush3.xpose.msk.msra.mxu0 %vm1259_vm0, %v11737_v2  ;;  %v472_v2 = vld [vmem:[%s10669_s15 + $0x2d] sm:$0x1]  ;;  %v578_v7 = vmul.f32 0.6931472, %v10590_v1  ;;  %v1169_v13 = vmul.f32 %v11842_v47, %v337_v48 }
 0x145   : > { %8289 = vst.msk [vmem:[%s11277_s21 + $0x1a8] sm:$0xff] %vm1259_vm0, %v9791_v19  ;;  %10146 = vmatpush3.xpose.msk.msra.mxu1 %vm1259_vm0, %v11741_v5  ;;  %v2658_v21 = vpop.f32.mrf.mxu0  ;;  %10133 = vmatprep.subr.msk.mxu0 %vm1259_vm0, %v11756_v10  ;;  %v1164_v5 = vmul.f32 %v11830_v42, %v332_v55  ;;  %10593 = vlog2.f32 %v472_v2  ;;  %v1170_v19 = vmul.f32 %v11842_v47, %v11820_v38  ;;  %v475_v1 = vld [vmem:[%s10669_s15 + $0x30] sm:$0x1] }
 0x146   : > { %8284 = vst.msk [vmem:[%s11277_s21 + $0x180] sm:$0xff] %vm1259_vm0, %v2658_v21  ;;  %v2767_v22 = vpop.f32.mrf.mxu1  ;;  %10147 = vmatprep.subr.msk.mxu1 %vm1259_vm0, %v329_v16  ;;  %10114 = vmatprep.mubr.msk.f32.mxu0 %vm1259_vm0, %v1149_v8  ;;  %v1168_v8 = vmul.f32 %v11842_v47, %v336_v57  ;;  %v343_v21 = vld [vmem:[%s10676_s18 + $0x560] sm:$0xff]  ;;  %10595 = vlog2.f32 %v473_v33 }
 0x147   : > { %8288 = vst.msk [vmem:[%s11277_s21 + $0x1a0] sm:$0xff] %vm1259_vm0, %v2767_v22  ;;  %10128 = vmatprep.mubr.msk.f32.mxu1 %vm1259_vm0, %v1153_v12  ;;  %v9780_v26 = vpop.f32.mrf.mxu0  ;;  %10115 = vmatmul.mubr.msk.f32.gmra.mxu0 %vm1259_vm0, %v1150_v11  ;;  %v11914_v11 = vld [vmem:[%s10676_s18 + $0x550] sm:$0xff]  ;;  %v1166_v12 = vmul.f32 %v11830_v42, %v11816_v35 }
 0x148   : > { %10134 = vmatpush3.xpose.msk.msra.mxu0 %vm1259_vm0, %v11756_v10  ;;  %8287 = vst.msk [vmem:[%s11277_s21 + $0x198] sm:$0xff] %vm1259_vm0, %v9780_v26  ;;  %v9794_v28 = vpop.f32.mrf.mxu1  ;;  %10129 = vmatmul.mubr.msk.f32.gmra.mxu1 %vm1259_vm0, %v1154_v18  ;;  %v11909_v10 = vrot.slane %v576_v4, %v10704_v14  ;;  %v339_v18 = vld [vmem:[%s10676_s18 + $0x540] sm:$0xff]  ;;  %v344_v26 = vld [vmem:[%s10676_s18 + $0x568] sm:$0xff]  ;;  %v12053_v4 = vld [vmem:[%s10676_s18 + $0x5d8] sm:$0xff] }
 0x149   : > { %10148 = vmatpush3.xpose.msk.msra.mxu1 %vm1259_vm0, %v329_v16  ;;  %10135 = vmatprep.subr.msk.mxu0 %vm1259_vm0, %v324_v23  ;;  %8291 = vst.msk [vmem:[%s11277_s21 + $0x1b8] sm:$0xff] %vm1259_vm0, %v9794_v28  ;;  %v2668_v29 = vpop.f32.mrf.mxu0  ;;  %v11921_v16 = vrot.slane %v578_v7, %v10704_v14  ;;  %v12057_v7 = vld [vmem:[%s10676_s18 + $0x5f8] sm:$0xff] }
 0x14a   : > { %10149 = vmatprep.subr.msk.mxu1 %vm1259_vm0, %v328_v25  ;;  %8286 = vst.msk [vmem:[%s11277_s21 + $0x190] sm:$0xff] %vm1259_vm0, %v2668_v29  ;;  %v2777_v30 = vpop.f32.mrf.mxu1  ;;  %10139 = vmatprep.mubr.msk.f32.mxu0 %vm1259_vm0, %v1155_v24  ;;  %v340_v24 = vld [vmem:[%s10676_s18 + $0x548] sm:$0xff]  ;;  %v1173_v42 = vmul.f32 %v11909_v10, %v11914_v11 }
 0x14b   : > { %8290 = vst.msk [vmem:[%s11277_s21 + $0x1b0] sm:$0xff] %vm1259_vm0, %v2777_v30  ;;  %10153 = vmatprep.mubr.msk.f32.mxu1 %vm1259_vm0, %v1159_v27  ;;  %v1175_v28 = vmul.f32 %v11921_v16, %v343_v21 }
 0x14c   : > { %10136 = vmatpush3.xpose.msk.msra.mxu0 %vm1259_vm0, %v324_v23 }
 0x14d   : > { %10150 = vmatpush3.xpose.msk.msra.mxu1 %vm1259_vm0, %v328_v25  ;;  %10137 = vmatprep.subr.msk.mxu0 %vm1259_vm0, %v323_v17  ;;  %v1171_v25 = vmul.f32 %v11909_v10, %v339_v18 }
 0x14e   : > { %10151 = vmatprep.subr.msk.mxu1 %vm1259_vm0, %v327_v20 }
 0x150   : > { %10138 = vmatpush3.xpose.msk.msra.mxu0 %vm1259_vm0, %v323_v17  ;;  %v345_v17 = vld [vmem:[%s10676_s18 + $0x570] sm:$0xff] }
 0x151   : > { %10152 = vmatpush3.xpose.msk.msra.mxu1 %vm1259_vm0, %v327_v20  ;;  %10159 = vmatprep.subr.msk.mxu0 %vm1259_vm0, %v11816_v35 }
 0x152   : > { %10173 = vmatprep.subr.msk.mxu1 %vm1259_vm0, %v11820_v38  ;;  %v10594_v34 = vpop.eup %10593 }
 0x153   : > { %v9805_v46 = vpop.f32.mrf.mxu0  ;;  %10140 = vmatmul.mubr.msk.f32.vlgmr.msra.gmra.mxu0 %vm1259_vm0, %v1156_v37  ;;  %v580_v37 = vmul.f32 0.6931472, %v10592_v32  ;;  %v10596_v0 = vpop.eup %10595 }
 0x154   : > { %8293 = vst.msk [vmem:[%s11277_s21 + $0x1c8] sm:$0xff] %vm1259_vm0, %v9805_v46  ;;  %v9819_v51 = vpop.f32.mrf.mxu1  ;;  %10154 = vmatmul.mubr.msk.f32.vlgmr.msra.gmra.mxu1 %vm1259_vm0, %v1160_v40  ;;  %10160 = vmatpush3.xpose.msk.msra.mxu0 %vm1259_vm0, %v11816_v35  ;;  %v474_v35 = vld [vmem:[%s10669_s15 + $0x2f] sm:$0x1]  ;;  %v582_v40 = vmul.f32 0.6931472, %v10594_v34  ;;  %v1177_v46 = vmul.f32 %v11921_v16, %v345_v17 }
 0x155   : > { %8297 = vst.msk [vmem:[%s11277_s21 + $0x1e8] sm:$0xff] %vm1259_vm0, %v9819_v51  ;;  %10174 = vmatpush3.xpose.msk.msra.mxu1 %vm1259_vm0, %v11820_v38  ;;  %v2876_v53 = vpop.f32.mrf.mxu0  ;;  %10161 = vmatprep.subr.msk.mxu0 %vm1259_vm0, %v11835_v43  ;;  %v1172_v38 = vmul.f32 %v11909_v10, %v340_v24  ;;  %10597 = vlog2.f32 %v474_v35  ;;  %v1178_v51 = vmul.f32 %v11921_v16, %v11899_v6  ;;  %v477_v34 = vld [vmem:[%s10669_s15 + $0x32] sm:$0x1] }
 0x156   : > { %8292 = vst.msk [vmem:[%s11277_s21 + $0x1c0] sm:$0xff] %vm1259_vm0, %v2876_v53  ;;  %v2985_v54 = vpop.f32.mrf.mxu1  ;;  %10175 = vmatprep.subr.msk.mxu1 %vm1259_vm0, %v337_v48  ;;  %10142 = vmatprep.mubr.msk.f32.mxu0 %vm1259_vm0, %v1157_v41  ;;  %v1176_v41 = vmul.f32 %v11921_v16, %v344_v26  ;;  %v351_v53 = vld [vmem:[%s10676_s18 + $0x5a0] sm:$0xff]  ;;  %10599 = vlog2.f32 %v475_v1 }
 0x157   : > { %8296 = vst.msk [vmem:[%s11277_s21 + $0x1e0] sm:$0xff] %vm1259_vm0, %v2985_v54  ;;  %10156 = vmatprep.mubr.msk.f32.mxu1 %vm1259_vm0, %v1161_v45  ;;  %v9808_v58 = vpop.f32.mrf.mxu0  ;;  %10143 = vmatmul.mubr.msk.f32.gmra.mxu0 %vm1259_vm0, %v1158_v44  ;;  %v11993_v44 = vld [vmem:[%s10676_s18 + $0x590] sm:$0xff]  ;;  %v1174_v45 = vmul.f32 %v11909_v10, %v11895_v3 }
 0x158   : > { %10162 = vmatpush3.xpose.msk.msra.mxu0 %vm1259_vm0, %v11835_v43  ;;  %8295 = vst.msk [vmem:[%s11277_s21 + $0x1d8] sm:$0xff] %vm1259_vm0, %v9808_v58  ;;  %v9822_v60 = vpop.f32.mrf.mxu1  ;;  %10157 = vmatmul.mubr.msk.f32.gmra.mxu1 %vm1259_vm0, %v1162_v50  ;;  %v11988_v43 = vrot.slane %v580_v37, %v10704_v14  ;;  %v347_v50 = vld [vmem:[%s10676_s18 + $0x580] sm:$0xff]  ;;  %v352_v58 = vld [vmem:[%s10676_s18 + $0x5a8] sm:$0xff]  ;;  %v12132_v37 = vld [vmem:[%s10676_s18 + $0x618] sm:$0xff] }
 0x159   : > { %10176 = vmatpush3.xpose.msk.msra.mxu1 %vm1259_vm0, %v337_v48  ;;  %10163 = vmatprep.subr.msk.mxu0 %vm1259_vm0, %v332_v55  ;;  %8299 = vst.msk [vmem:[%s11277_s21 + $0x1f8] sm:$0xff] %vm1259_vm0, %v9822_v60  ;;  %v2886_v61 = vpop.f32.mrf.mxu0  ;;  %v12000_v48 = vrot.slane %v582_v40, %v10704_v14  ;;  %v12136_v40 = vld [vmem:[%s10676_s18 + $0x638] sm:$0xff] }
 0x15a   : > { %10177 = vmatprep.subr.msk.mxu1 %vm1259_vm0, %v336_v57  ;;  %8294 = vst.msk [vmem:[%s11277_s21 + $0x1d0] sm:$0xff] %vm1259_vm0, %v2886_v61  ;;  %v2995_v62 = vpop.f32.mrf.mxu1  ;;  %10167 = vmatprep.mubr.msk.f32.mxu0 %vm1259_vm0, %v1163_v56  ;;  %v348_v56 = vld [vmem:[%s10676_s18 + $0x588] sm:$0xff]  ;;  %v1181_v10 = vmul.f32 %v11988_v43, %v11993_v44 }
 0x15b   : > { %8298 = vst.msk [vmem:[%s11277_s21 + $0x1f0] sm:$0xff] %vm1259_vm0, %v2995_v62  ;;  %10181 = vmatprep.mubr.msk.f32.mxu1 %vm1259_vm0, %v1167_v59  ;;  %v1183_v60 = vmul.f32 %v12000_v48, %v351_v53 }
 0x15c   : > { %10164 = vmatpush3.xpose.msk.msra.mxu0 %vm1259_vm0, %v332_v55 }
 0x15d   : > { %10178 = vmatpush3.xpose.msk.msra.mxu1 %vm1259_vm0, %v336_v57  ;;  %10165 = vmatprep.subr.msk.mxu0 %vm1259_vm0, %v331_v49  ;;  %v1179_v57 = vmul.f32 %v11988_v43, %v347_v50 }
 0x15e   : > { %10179 = vmatprep.subr.msk.mxu1 %vm1259_vm0, %v335_v52 }
 0x160   : > { %10166 = vmatpush3.xpose.msk.msra.mxu0 %vm1259_vm0, %v331_v49  ;;  %v353_v49 = vld [vmem:[%s10676_s18 + $0x5b0] sm:$0xff] }
 0x161   : > { %10180 = vmatpush3.xpose.msk.msra.mxu1 %vm1259_vm0, %v335_v52  ;;  %10187 = vmatprep.subr.msk.mxu0 %vm1259_vm0, %v11895_v3 }
 0x162   : > { %10201 = vmatprep.subr.msk.mxu1 %vm1259_vm0, %v11899_v6  ;;  %v10598_v2 = vpop.eup %10597 }
 0x163   : > { %v9833_v15 = vpop.f32.mrf.mxu0  ;;  %10168 = vmatmul.mubr.msk.f32.vlgmr.msra.gmra.mxu0 %vm1259_vm0, %v1164_v5  ;;  %v584_v5 = vmul.f32 0.6931472, %v10596_v0  ;;  %v10600_v33 = vpop.eup %10599 }
 0x164   : > { %8301 = vst.msk [vmem:[%s11277_s21 + $0x208] sm:$0xff] %vm1259_vm0, %v9833_v15  ;;  %v9847_v20 = vpop.f32.mrf.mxu1  ;;  %10182 = vmatmul.mubr.msk.f32.vlgmr.msra.gmra.mxu1 %vm1259_vm0, %v1168_v8  ;;  %10188 = vmatpush3.xpose.msk.msra.mxu0 %vm1259_vm0, %v11895_v3  ;;  %v476_v3 = vld [vmem:[%s10669_s15 + $0x31] sm:$0x1]  ;;  %v586_v8 = vmul.f32 0.6931472, %v10598_v2  ;;  %v1185_v15 = vmul.f32 %v12000_v48, %v353_v49 }
 0x165   : > { %8305 = vst.msk [vmem:[%s11277_s21 + $0x228] sm:$0xff] %vm1259_vm0, %v9847_v20  ;;  %10202 = vmatpush3.xpose.msk.msra.mxu1 %vm1259_vm0, %v11899_v6  ;;  %v3094_v22 = vpop.f32.mrf.mxu0  ;;  %10189 = vmatprep.subr.msk.mxu0 %vm1259_vm0, %v11914_v11  ;;  %v1180_v6 = vmul.f32 %v11988_v43, %v348_v56  ;;  %10601 = vlog2.f32 %v476_v3  ;;  %v1186_v20 = vmul.f32 %v12000_v48, %v11978_v39  ;;  %v479_v2 = vld [vmem:[%s10669_s15 + $0x34] sm:$0x1] }
 0x166   : > { %8300 = vst.msk [vmem:[%s11277_s21 + $0x200] sm:$0xff] %vm1259_vm0, %v3094_v22  ;;  %v3203_v23 = vpop.f32.mrf.mxu1  ;;  %10203 = vmatprep.subr.msk.mxu1 %vm1259_vm0, %v345_v17  ;;  %10170 = vmatprep.mubr.msk.f32.mxu0 %vm1259_vm0, %v1165_v9  ;;  %v1184_v9 = vmul.f32 %v12000_v48, %v352_v58  ;;  %v359_v22 = vld [vmem:[%s10676_s18 + $0x5e0] sm:$0xff]  ;;  %10603 = vlog2.f32 %v477_v34 }
 0x167   : > { %8304 = vst.msk [vmem:[%s11277_s21 + $0x220] sm:$0xff] %vm1259_vm0, %v3203_v23  ;;  %10184 = vmatprep.mubr.msk.f32.mxu1 %vm1259_vm0, %v1169_v13  ;;  %v9836_v27 = vpop.f32.mrf.mxu0  ;;  %10171 = vmatmul.mubr.msk.f32.gmra.mxu0 %vm1259_vm0, %v1166_v12  ;;  %v12072_v12 = vld [vmem:[%s10676_s18 + $0x5d0] sm:$0xff]  ;;  %v1182_v13 = vmul.f32 %v11988_v43, %v11974_v36 }
 0x168   : > { %10190 = vmatpush3.xpose.msk.msra.mxu0 %vm1259_vm0, %v11914_v11  ;;  %8303 = vst.msk [vmem:[%s11277_s21 + $0x218] sm:$0xff] %vm1259_vm0, %v9836_v27  ;;  %v9850_v29 = vpop.f32.mrf.mxu1  ;;  %10185 = vmatmul.mubr.msk.f32.gmra.mxu1 %vm1259_vm0, %v1170_v19  ;;  %v12067_v11 = vrot.slane %v584_v5, %v10704_v14  ;;  %v355_v19 = vld [vmem:[%s10676_s18 + $0x5c0] sm:$0xff]  ;;  %v360_v27 = vld [vmem:[%s10676_s18 + $0x5e8] sm:$0xff]  ;;  %v12211_v5 = vld [vmem:[%s10676_s18 + $0x658] sm:$0xff] }
 0x169   : > { %10204 = vmatpush3.xpose.msk.msra.mxu1 %vm1259_vm0, %v345_v17  ;;  %10191 = vmatprep.subr.msk.mxu0 %vm1259_vm0, %v340_v24  ;;  %8307 = vst.msk [vmem:[%s11277_s21 + $0x238] sm:$0xff] %vm1259_vm0, %v9850_v29  ;;  %v3104_v30 = vpop.f32.mrf.mxu0  ;;  %v12079_v17 = vrot.slane %v586_v8, %v10704_v14  ;;  %v12215_v8 = vld [vmem:[%s10676_s18 + $0x678] sm:$0xff] }
 0x16a   : > { %10205 = vmatprep.subr.msk.mxu1 %vm1259_vm0, %v344_v26  ;;  %8302 = vst.msk [vmem:[%s11277_s21 + $0x210] sm:$0xff] %vm1259_vm0, %v3104_v30  ;;  %v3213_v31 = vpop.f32.mrf.mxu1  ;;  %10195 = vmatprep.mubr.msk.f32.mxu0 %vm1259_vm0, %v1171_v25  ;;  %v356_v25 = vld [vmem:[%s10676_s18 + $0x5c8] sm:$0xff]  ;;  %v1189_v43 = vmul.f32 %v12067_v11, %v12072_v12 }
 0x16b   : > { %8306 = vst.msk [vmem:[%s11277_s21 + $0x230] sm:$0xff] %vm1259_vm0, %v3213_v31  ;;  %10209 = vmatprep.mubr.msk.f32.mxu1 %vm1259_vm0, %v1175_v28  ;;  %v1191_v29 = vmul.f32 %v12079_v17, %v359_v22 }
 0x16c   : > { %10192 = vmatpush3.xpose.msk.msra.mxu0 %vm1259_vm0, %v340_v24 }
 0x16d   : > { %10206 = vmatpush3.xpose.msk.msra.mxu1 %vm1259_vm0, %v344_v26  ;;  %10193 = vmatprep.subr.msk.mxu0 %vm1259_vm0, %v339_v18  ;;  %v1187_v26 = vmul.f32 %v12067_v11, %v355_v19 }
 0x16e   : > { %10207 = vmatprep.subr.msk.mxu1 %vm1259_vm0, %v343_v21 }
 0x170   : > { %10194 = vmatpush3.xpose.msk.msra.mxu0 %vm1259_vm0, %v339_v18  ;;  %v361_v18 = vld [vmem:[%s10676_s18 + $0x5f0] sm:$0xff] }
 0x171   : > { %10208 = vmatpush3.xpose.msk.msra.mxu1 %vm1259_vm0, %v343_v21  ;;  %10215 = vmatprep.subr.msk.mxu0 %vm1259_vm0, %v11974_v36 }
 0x172   : > { %10229 = vmatprep.subr.msk.mxu1 %vm1259_vm0, %v11978_v39  ;;  %v10602_v35 = vpop.eup %10601 }
 0x173   : > { %v9861_v47 = vpop.f32.mrf.mxu0  ;;  %10196 = vmatmul.mubr.msk.f32.vlgmr.msra.gmra.mxu0 %vm1259_vm0, %v1172_v38  ;;  %v588_v38 = vmul.f32 0.6931472, %v10600_v33  ;;  %v10604_v1 = vpop.eup %10603 }
 0x174   : > { %8309 = vst.msk [vmem:[%s11277_s21 + $0x248] sm:$0xff] %vm1259_vm0, %v9861_v47  ;;  %v9875_v52 = vpop.f32.mrf.mxu1  ;;  %10210 = vmatmul.mubr.msk.f32.vlgmr.msra.gmra.mxu1 %vm1259_vm0, %v1176_v41  ;;  %10216 = vmatpush3.xpose.msk.msra.mxu0 %vm1259_vm0, %v11974_v36  ;;  %v478_v36 = vld [vmem:[%s10669_s15 + $0x33] sm:$0x1]  ;;  %v590_v41 = vmul.f32 0.6931472, %v10602_v35  ;;  %v1193_v47 = vmul.f32 %v12079_v17, %v361_v18 }
 0x175   : > { %8313 = vst.msk [vmem:[%s11277_s21 + $0x268] sm:$0xff] %vm1259_vm0, %v9875_v52  ;;  %10230 = vmatpush3.xpose.msk.msra.mxu1 %vm1259_vm0, %v11978_v39  ;;  %v3312_v54 = vpop.f32.mrf.mxu0  ;;  %10217 = vmatprep.subr.msk.mxu0 %vm1259_vm0, %v11993_v44  ;;  %v1188_v39 = vmul.f32 %v12067_v11, %v356_v25  ;;  %10605 = vlog2.f32 %v478_v36  ;;  %v1194_v52 = vmul.f32 %v12079_v17, %v12057_v7  ;;  %v481_v35 = vld [vmem:[%s10669_s15 + $0x36] sm:$0x1] }
 0x176   : > { %8308 = vst.msk [vmem:[%s11277_s21 + $0x240] sm:$0xff] %vm1259_vm0, %v3312_v54  ;;  %v3421_v55 = vpop.f32.mrf.mxu1  ;;  %10231 = vmatprep.subr.msk.mxu1 %vm1259_vm0, %v353_v49  ;;  %10198 = vmatprep.mubr.msk.f32.mxu0 %vm1259_vm0, %v1173_v42  ;;  %v1192_v42 = vmul.f32 %v12079_v17, %v360_v27  ;;  %v367_v54 = vld [vmem:[%s10676_s18 + $0x620] sm:$0xff]  ;;  %10607 = vlog2.f32 %v479_v2 }
 0x177   : > { %8312 = vst.msk [vmem:[%s11277_s21 + $0x260] sm:$0xff] %vm1259_vm0, %v3421_v55  ;;  %10212 = vmatprep.mubr.msk.f32.mxu1 %vm1259_vm0, %v1177_v46  ;;  %v9864_v59 = vpop.f32.mrf.mxu0  ;;  %10199 = vmatmul.mubr.msk.f32.gmra.mxu0 %vm1259_vm0, %v1174_v45  ;;  %v12151_v45 = vld [vmem:[%s10676_s18 + $0x610] sm:$0xff]  ;;  %v1190_v46 = vmul.f32 %v12067_v11, %v12053_v4 }
 0x178   : > { %10218 = vmatpush3.xpose.msk.msra.mxu0 %vm1259_vm0, %v11993_v44  ;;  %8311 = vst.msk [vmem:[%s11277_s21 + $0x258] sm:$0xff] %vm1259_vm0, %v9864_v59  ;;  %v9878_v61 = vpop.f32.mrf.mxu1  ;;  %10213 = vmatmul.mubr.msk.f32.gmra.mxu1 %vm1259_vm0, %v1178_v51  ;;  %v12146_v44 = vrot.slane %v588_v38, %v10704_v14  ;;  %v363_v51 = vld [vmem:[%s10676_s18 + $0x600] sm:$0xff]  ;;  %v368_v59 = vld [vmem:[%s10676_s18 + $0x628] sm:$0xff]  ;;  %v12290_v38 = vld [vmem:[%s10676_s18 + $0x698] sm:$0xff] }
 0x179   : > { %10232 = vmatpush3.xpose.msk.msra.mxu1 %vm1259_vm0, %v353_v49  ;;  %10219 = vmatprep.subr.msk.mxu0 %vm1259_vm0, %v348_v56  ;;  %8315 = vst.msk [vmem:[%s11277_s21 + $0x278] sm:$0xff] %vm1259_vm0, %v9878_v61  ;;  %v3322_v62 = vpop.f32.mrf.mxu0  ;;  %v12158_v49 = vrot.slane %v590_v41, %v10704_v14  ;;  %v12294_v41 = vld [vmem:[%s10676_s18 + $0x6b8] sm:$0xff] }
 0x17a   : > { %10233 = vmatprep.subr.msk.mxu1 %vm1259_vm0, %v352_v58  ;;  %8310 = vst.msk [vmem:[%s11277_s21 + $0x250] sm:$0xff] %vm1259_vm0, %v3322_v62  ;;  %v3431_v63 = vpop.f32.mrf.mxu1  ;;  %10223 = vmatprep.mubr.msk.f32.mxu0 %vm1259_vm0, %v1179_v57  ;;  %v364_v57 = vld [vmem:[%s10676_s18 + $0x608] sm:$0xff]  ;;  %v1197_v11 = vmul.f32 %v12146_v44, %v12151_v45 }
 0x17b   : > { %8314 = vst.msk [vmem:[%s11277_s21 + $0x270] sm:$0xff] %vm1259_vm0, %v3431_v63  ;;  %10237 = vmatprep.mubr.msk.f32.mxu1 %vm1259_vm0, %v1183_v60  ;;  %v1199_v61 = vmul.f32 %v12158_v49, %v367_v54 }
 0x17c   : > { %10220 = vmatpush3.xpose.msk.msra.mxu0 %vm1259_vm0, %v348_v56 }
 0x17d   : > { %10234 = vmatpush3.xpose.msk.msra.mxu1 %vm1259_vm0, %v352_v58  ;;  %10221 = vmatprep.subr.msk.mxu0 %vm1259_vm0, %v347_v50  ;;  %v1195_v58 = vmul.f32 %v12146_v44, %v363_v51 }
 0x17e   : > { %10235 = vmatprep.subr.msk.mxu1 %vm1259_vm0, %v351_v53 }
 0x180   : > { %10222 = vmatpush3.xpose.msk.msra.mxu0 %vm1259_vm0, %v347_v50  ;;  %v369_v50 = vld [vmem:[%s10676_s18 + $0x630] sm:$0xff] }
 0x181   : > { %10236 = vmatpush3.xpose.msk.msra.mxu1 %vm1259_vm0, %v351_v53  ;;  %10243 = vmatprep.subr.msk.mxu0 %vm1259_vm0, %v12053_v4 }
 0x182   : > { %10257 = vmatprep.subr.msk.mxu1 %vm1259_vm0, %v12057_v7  ;;  %v10606_v3 = vpop.eup %10605 }
 0x183   : > { %v9889_v16 = vpop.f32.mrf.mxu0  ;;  %10224 = vmatmul.mubr.msk.f32.vlgmr.msra.gmra.mxu0 %vm1259_vm0, %v1180_v6  ;;  %v592_v6 = vmul.f32 0.6931472, %v10604_v1  ;;  %v10608_v34 = vpop.eup %10607 }
 0x184   : > { %8317 = vst.msk [vmem:[%s11277_s21 + $0x288] sm:$0xff] %vm1259_vm0, %v9889_v16  ;;  %v9903_v21 = vpop.f32.mrf.mxu1  ;;  %10238 = vmatmul.mubr.msk.f32.vlgmr.msra.gmra.mxu1 %vm1259_vm0, %v1184_v9  ;;  %10244 = vmatpush3.xpose.msk.msra.mxu0 %vm1259_vm0, %v12053_v4  ;;  %v480_v4 = vld [vmem:[%s10669_s15 + $0x35] sm:$0x1]  ;;  %v594_v9 = vmul.f32 0.6931472, %v10606_v3  ;;  %v1201_v16 = vmul.f32 %v12158_v49, %v369_v50 }
 0x185   : > { %8321 = vst.msk [vmem:[%s11277_s21 + $0x2a8] sm:$0xff] %vm1259_vm0, %v9903_v21  ;;  %10258 = vmatpush3.xpose.msk.msra.mxu1 %vm1259_vm0, %v12057_v7  ;;  %v3530_v23 = vpop.f32.mrf.mxu0  ;;  %10245 = vmatprep.subr.msk.mxu0 %vm1259_vm0, %v12072_v12  ;;  %v1196_v7 = vmul.f32 %v12146_v44, %v364_v57  ;;  %10609 = vlog2.f32 %v480_v4  ;;  %v1202_v21 = vmul.f32 %v12158_v49, %v12136_v40  ;;  %v483_v3 = vld [vmem:[%s10669_s15 + $0x38] sm:$0x1] }
 0x186   : > { %8316 = vst.msk [vmem:[%s11277_s21 + $0x280] sm:$0xff] %vm1259_vm0, %v3530_v23  ;;  %v3639_v24 = vpop.f32.mrf.mxu1  ;;  %10259 = vmatprep.subr.msk.mxu1 %vm1259_vm0, %v361_v18  ;;  %10226 = vmatprep.mubr.msk.f32.mxu0 %vm1259_vm0, %v1181_v10  ;;  %v1200_v10 = vmul.f32 %v12158_v49, %v368_v59  ;;  %v375_v23 = vld [vmem:[%s10676_s18 + $0x660] sm:$0xff]  ;;  %10611 = vlog2.f32 %v481_v35 }
 0x187   : > { %8320 = vst.msk [vmem:[%s11277_s21 + $0x2a0] sm:$0xff] %vm1259_vm0, %v3639_v24  ;;  %10240 = vmatprep.mubr.msk.f32.mxu1 %vm1259_vm0, %v1185_v15  ;;  %v9892_v28 = vpop.f32.mrf.mxu0  ;;  %10227 = vmatmul.mubr.msk.f32.gmra.mxu0 %vm1259_vm0, %v1182_v13  ;;  %v12230_v13 = vld [vmem:[%s10676_s18 + $0x650] sm:$0xff]  ;;  %v1198_v15 = vmul.f32 %v12146_v44, %v12132_v37 }
 0x188   : > { %10246 = vmatpush3.xpose.msk.msra.mxu0 %vm1259_vm0, %v12072_v12  ;;  %8319 = vst.msk [vmem:[%s11277_s21 + $0x298] sm:$0xff] %vm1259_vm0, %v9892_v28  ;;  %v9906_v30 = vpop.f32.mrf.mxu1  ;;  %10241 = vmatmul.mubr.msk.f32.gmra.mxu1 %vm1259_vm0, %v1186_v20  ;;  %v12225_v12 = vrot.slane %v592_v6, %v10704_v14  ;;  %v371_v20 = vld [vmem:[%s10676_s18 + $0x640] sm:$0xff]  ;;  %v376_v28 = vld [vmem:[%s10676_s18 + $0x668] sm:$0xff]  ;;  %v12369_v6 = vld [vmem:[%s10676_s18 + $0x6d8] sm:$0xff] }
 0x189   : > { %10260 = vmatpush3.xpose.msk.msra.mxu1 %vm1259_vm0, %v361_v18  ;;  %10247 = vmatprep.subr.msk.mxu0 %vm1259_vm0, %v356_v25  ;;  %8323 = vst.msk [vmem:[%s11277_s21 + $0x2b8] sm:$0xff] %vm1259_vm0, %v9906_v30  ;;  %v3540_v31 = vpop.f32.mrf.mxu0  ;;  %v12237_v18 = vrot.slane %v594_v9, %v10704_v14  ;;  %v12373_v9 = vld [vmem:[%s10676_s18 + $0x6f8] sm:$0xff] }
 0x18a   : > { %10261 = vmatprep.subr.msk.mxu1 %vm1259_vm0, %v360_v27  ;;  %8318 = vst.msk [vmem:[%s11277_s21 + $0x290] sm:$0xff] %vm1259_vm0, %v3540_v31  ;;  %v3649_v32 = vpop.f32.mrf.mxu1  ;;  %10251 = vmatprep.mubr.msk.f32.mxu0 %vm1259_vm0, %v1187_v26  ;;  %v372_v26 = vld [vmem:[%s10676_s18 + $0x648] sm:$0xff]  ;;  %v1205_v44 = vmul.f32 %v12225_v12, %v12230_v13 }
 0x18b   : > { %8322 = vst.msk [vmem:[%s11277_s21 + $0x2b0] sm:$0xff] %vm1259_vm0, %v3649_v32  ;;  %10265 = vmatprep.mubr.msk.f32.mxu1 %vm1259_vm0, %v1191_v29  ;;  %v1207_v30 = vmul.f32 %v12237_v18, %v375_v23 }
 0x18c   : > { %10248 = vmatpush3.xpose.msk.msra.mxu0 %vm1259_vm0, %v356_v25 }
 0x18d   : > { %10262 = vmatpush3.xpose.msk.msra.mxu1 %vm1259_vm0, %v360_v27  ;;  %10249 = vmatprep.subr.msk.mxu0 %vm1259_vm0, %v355_v19  ;;  %v1203_v27 = vmul.f32 %v12225_v12, %v371_v20 }
 0x18e   : > { %10263 = vmatprep.subr.msk.mxu1 %vm1259_vm0, %v359_v22 }
 0x190   : > { %10250 = vmatpush3.xpose.msk.msra.mxu0 %vm1259_vm0, %v355_v19  ;;  %v377_v19 = vld [vmem:[%s10676_s18 + $0x670] sm:$0xff] }
 0x191   : > { %10264 = vmatpush3.xpose.msk.msra.mxu1 %vm1259_vm0, %v359_v22  ;;  %10271 = vmatprep.subr.msk.mxu0 %vm1259_vm0, %v12132_v37 }
 0x192   : > { %10285 = vmatprep.subr.msk.mxu1 %vm1259_vm0, %v12136_v40  ;;  %v10610_v36 = vpop.eup %10609 }
 0x193   : > { %v9917_v48 = vpop.f32.mrf.mxu0  ;;  %10252 = vmatmul.mubr.msk.f32.vlgmr.msra.gmra.mxu0 %vm1259_vm0, %v1188_v39  ;;  %v596_v39 = vmul.f32 0.6931472, %v10608_v34  ;;  %v10612_v2 = vpop.eup %10611 }
 0x194   : > { %8325 = vst.msk [vmem:[%s11277_s21 + $0x2c8] sm:$0xff] %vm1259_vm0, %v9917_v48  ;;  %v9931_v53 = vpop.f32.mrf.mxu1  ;;  %10266 = vmatmul.mubr.msk.f32.vlgmr.msra.gmra.mxu1 %vm1259_vm0, %v1192_v42  ;;  %10272 = vmatpush3.xpose.msk.msra.mxu0 %vm1259_vm0, %v12132_v37  ;;  %v482_v37 = vld [vmem:[%s10669_s15 + $0x37] sm:$0x1]  ;;  %v598_v42 = vmul.f32 0.6931472, %v10610_v36  ;;  %v1209_v48 = vmul.f32 %v12237_v18, %v377_v19 }
 0x195   : > { %8329 = vst.msk [vmem:[%s11277_s21 + $0x2e8] sm:$0xff] %vm1259_vm0, %v9931_v53  ;;  %10286 = vmatpush3.xpose.msk.msra.mxu1 %vm1259_vm0, %v12136_v40  ;;  %v3748_v55 = vpop.f32.mrf.mxu0  ;;  %10273 = vmatprep.subr.msk.mxu0 %vm1259_vm0, %v12151_v45  ;;  %v1204_v40 = vmul.f32 %v12225_v12, %v372_v26  ;;  %10613 = vlog2.f32 %v482_v37  ;;  %v1210_v53 = vmul.f32 %v12237_v18, %v12215_v8  ;;  %v485_v36 = vld [vmem:[%s10669_s15 + $0x3a] sm:$0x1] }
 0x196   : > { %8324 = vst.msk [vmem:[%s11277_s21 + $0x2c0] sm:$0xff] %vm1259_vm0, %v3748_v55  ;;  %v3857_v56 = vpop.f32.mrf.mxu1  ;;  %10287 = vmatprep.subr.msk.mxu1 %vm1259_vm0, %v369_v50  ;;  %10254 = vmatprep.mubr.msk.f32.mxu0 %vm1259_vm0, %v1189_v43  ;;  %v1208_v43 = vmul.f32 %v12237_v18, %v376_v28  ;;  %v383_v55 = vld [vmem:[%s10676_s18 + $0x6a0] sm:$0xff]  ;;  %10615 = vlog2.f32 %v483_v3 }
 0x197   : > { %8328 = vst.msk [vmem:[%s11277_s21 + $0x2e0] sm:$0xff] %vm1259_vm0, %v3857_v56  ;;  %10268 = vmatprep.mubr.msk.f32.mxu1 %vm1259_vm0, %v1193_v47  ;;  %v9920_v60 = vpop.f32.mrf.mxu0  ;;  %10255 = vmatmul.mubr.msk.f32.gmra.mxu0 %vm1259_vm0, %v1190_v46  ;;  %v12309_v46 = vld [vmem:[%s10676_s18 + $0x690] sm:$0xff]  ;;  %v1206_v47 = vmul.f32 %v12225_v12, %v12211_v5 }
 0x198   : > { %10274 = vmatpush3.xpose.msk.msra.mxu0 %vm1259_vm0, %v12151_v45  ;;  %8327 = vst.msk [vmem:[%s11277_s21 + $0x2d8] sm:$0xff] %vm1259_vm0, %v9920_v60  ;;  %v9934_v62 = vpop.f32.mrf.mxu1  ;;  %10269 = vmatmul.mubr.msk.f32.gmra.mxu1 %vm1259_vm0, %v1194_v52  ;;  %v12304_v45 = vrot.slane %v596_v39, %v10704_v14  ;;  %v379_v52 = vld [vmem:[%s10676_s18 + $0x680] sm:$0xff]  ;;  %v384_v60 = vld [vmem:[%s10676_s18 + $0x6a8] sm:$0xff]  ;;  %v12448_v39 = vld [vmem:[%s10676_s18 + $0x718] sm:$0xff] }
 0x199   : > { %10288 = vmatpush3.xpose.msk.msra.mxu1 %vm1259_vm0, %v369_v50  ;;  %10275 = vmatprep.subr.msk.mxu0 %vm1259_vm0, %v364_v57  ;;  %8331 = vst.msk [vmem:[%s11277_s21 + $0x2f8] sm:$0xff] %vm1259_vm0, %v9934_v62  ;;  %v3758_v63 = vpop.f32.mrf.mxu0  ;;  %v12316_v50 = vrot.slane %v598_v42, %v10704_v14  ;;  %v12452_v42 = vld [vmem:[%s10676_s18 + $0x738] sm:$0xff] }
 0x19a   : > { %10289 = vmatprep.subr.msk.mxu1 %vm1259_vm0, %v368_v59  ;;  %8326 = vst.msk [vmem:[%s11277_s21 + $0x2d0] sm:$0xff] %vm1259_vm0, %v3758_v63  ;;  %v3867_v0 = vpop.f32.mrf.mxu1  ;;  %10279 = vmatprep.mubr.msk.f32.mxu0 %vm1259_vm0, %v1195_v58  ;;  %v380_v58 = vld [vmem:[%s10676_s18 + $0x688] sm:$0xff]  ;;  %v1213_v12 = vmul.f32 %v12304_v45, %v12309_v46 }
 0x19b   : > { %8330 = vst.msk [vmem:[%s11277_s21 + $0x2f0] sm:$0xff] %vm1259_vm0, %v3867_v0  ;;  %10293 = vmatprep.mubr.msk.f32.mxu1 %vm1259_vm0, %v1199_v61  ;;  %v1215_v62 = vmul.f32 %v12316_v50, %v383_v55 }
 0x19c   : > { %10276 = vmatpush3.xpose.msk.msra.mxu0 %vm1259_vm0, %v364_v57 }
 0x19d   : > { %10290 = vmatpush3.xpose.msk.msra.mxu1 %vm1259_vm0, %v368_v59  ;;  %10277 = vmatprep.subr.msk.mxu0 %vm1259_vm0, %v363_v51  ;;  %v1211_v59 = vmul.f32 %v12304_v45, %v379_v52 }
 0x19e   : > { %10291 = vmatprep.subr.msk.mxu1 %vm1259_vm0, %v367_v54 }
 0x1a0   : > { %10278 = vmatpush3.xpose.msk.msra.mxu0 %vm1259_vm0, %v363_v51  ;;  %v385_v51 = vld [vmem:[%s10676_s18 + $0x6b0] sm:$0xff] }
 0x1a1   : > { %10292 = vmatpush3.xpose.msk.msra.mxu1 %vm1259_vm0, %v367_v54  ;;  %10299 = vmatprep.subr.msk.mxu0 %vm1259_vm0, %v12211_v5 }
 0x1a2   : > { %10313 = vmatprep.subr.msk.mxu1 %vm1259_vm0, %v12215_v8  ;;  %v10614_v4 = vpop.eup %10613 }
 0x1a3   : > { %v9945_v17 = vpop.f32.mrf.mxu0  ;;  %10280 = vmatmul.mubr.msk.f32.vlgmr.msra.gmra.mxu0 %vm1259_vm0, %v1196_v7  ;;  %v600_v7 = vmul.f32 0.6931472, %v10612_v2  ;;  %v10616_v35 = vpop.eup %10615 }
 0x1a4   : > { %8333 = vst.msk [vmem:[%s11277_s21 + $0x308] sm:$0xff] %vm1259_vm0, %v9945_v17  ;;  %v9959_v22 = vpop.f32.mrf.mxu1  ;;  %10294 = vmatmul.mubr.msk.f32.vlgmr.msra.gmra.mxu1 %vm1259_vm0, %v1200_v10  ;;  %10300 = vmatpush3.xpose.msk.msra.mxu0 %vm1259_vm0, %v12211_v5  ;;  %v484_v5 = vld [vmem:[%s10669_s15 + $0x39] sm:$0x1]  ;;  %v602_v10 = vmul.f32 0.6931472, %v10614_v4  ;;  %v1217_v17 = vmul.f32 %v12316_v50, %v385_v51 }
 0x1a5   : > { %8337 = vst.msk [vmem:[%s11277_s21 + $0x328] sm:$0xff] %vm1259_vm0, %v9959_v22  ;;  %10314 = vmatpush3.xpose.msk.msra.mxu1 %vm1259_vm0, %v12215_v8  ;;  %v3966_v24 = vpop.f32.mrf.mxu0  ;;  %10301 = vmatprep.subr.msk.mxu0 %vm1259_vm0, %v12230_v13  ;;  %v1212_v8 = vmul.f32 %v12304_v45, %v380_v58  ;;  %10617 = vlog2.f32 %v484_v5  ;;  %v1218_v22 = vmul.f32 %v12316_v50, %v12294_v41  ;;  %v487_v4 = vld [vmem:[%s10669_s15 + $0x3c] sm:$0x1] }
 0x1a6   : > { %8332 = vst.msk [vmem:[%s11277_s21 + $0x300] sm:$0xff] %vm1259_vm0, %v3966_v24  ;;  %v4075_v25 = vpop.f32.mrf.mxu1  ;;  %10315 = vmatprep.subr.msk.mxu1 %vm1259_vm0, %v377_v19  ;;  %10282 = vmatprep.mubr.msk.f32.mxu0 %vm1259_vm0, %v1197_v11  ;;  %v1216_v11 = vmul.f32 %v12316_v50, %v384_v60  ;;  %v391_v24 = vld [vmem:[%s10676_s18 + $0x6e0] sm:$0xff]  ;;  %10619 = vlog2.f32 %v485_v36 }
 0x1a7   : > { %8336 = vst.msk [vmem:[%s11277_s21 + $0x320] sm:$0xff] %vm1259_vm0, %v4075_v25  ;;  %10296 = vmatprep.mubr.msk.f32.mxu1 %vm1259_vm0, %v1201_v16  ;;  %v9948_v29 = vpop.f32.mrf.mxu0  ;;  %10283 = vmatmul.mubr.msk.f32.gmra.mxu0 %vm1259_vm0, %v1198_v15  ;;  %v12388_v15 = vld [vmem:[%s10676_s18 + $0x6d0] sm:$0xff]  ;;  %v1214_v16 = vmul.f32 %v12304_v45, %v12290_v38 }
 0x1a8   : > { %10302 = vmatpush3.xpose.msk.msra.mxu0 %vm1259_vm0, %v12230_v13  ;;  %8335 = vst.msk [vmem:[%s11277_s21 + $0x318] sm:$0xff] %vm1259_vm0, %v9948_v29  ;;  %v9962_v31 = vpop.f32.mrf.mxu1  ;;  %10297 = vmatmul.mubr.msk.f32.gmra.mxu1 %vm1259_vm0, %v1202_v21  ;;  %v12383_v13 = vrot.slane %v600_v7, %v10704_v14  ;;  %v387_v21 = vld [vmem:[%s10676_s18 + $0x6c0] sm:$0xff]  ;;  %v392_v29 = vld [vmem:[%s10676_s18 + $0x6e8] sm:$0xff]  ;;  %v12527_v7 = vld [vmem:[%s10676_s18 + $0x758] sm:$0xff] }
 0x1a9   : > { %10316 = vmatpush3.xpose.msk.msra.mxu1 %vm1259_vm0, %v377_v19  ;;  %10303 = vmatprep.subr.msk.mxu0 %vm1259_vm0, %v372_v26  ;;  %8339 = vst.msk [vmem:[%s11277_s21 + $0x338] sm:$0xff] %vm1259_vm0, %v9962_v31  ;;  %v3976_v32 = vpop.f32.mrf.mxu0  ;;  %v12395_v19 = vrot.slane %v602_v10, %v10704_v14  ;;  %v12531_v10 = vld [vmem:[%s10676_s18 + $0x778] sm:$0xff] }
 0x1aa   : > { %10317 = vmatprep.subr.msk.mxu1 %vm1259_vm0, %v376_v28  ;;  %8334 = vst.msk [vmem:[%s11277_s21 + $0x310] sm:$0xff] %vm1259_vm0, %v3976_v32  ;;  %v4085_v33 = vpop.f32.mrf.mxu1  ;;  %10307 = vmatprep.mubr.msk.f32.mxu0 %vm1259_vm0, %v1203_v27  ;;  %v388_v27 = vld [vmem:[%s10676_s18 + $0x6c8] sm:$0xff]  ;;  %v1221_v45 = vmul.f32 %v12383_v13, %v12388_v15 }
 0x1ab   : > { %8338 = vst.msk [vmem:[%s11277_s21 + $0x330] sm:$0xff] %vm1259_vm0, %v4085_v33  ;;  %10321 = vmatprep.mubr.msk.f32.mxu1 %vm1259_vm0, %v1207_v30  ;;  %v1223_v31 = vmul.f32 %v12395_v19, %v391_v24 }
 0x1ac   : > { %10304 = vmatpush3.xpose.msk.msra.mxu0 %vm1259_vm0, %v372_v26 }
 0x1ad   : > { %10318 = vmatpush3.xpose.msk.msra.mxu1 %vm1259_vm0, %v376_v28  ;;  %10305 = vmatprep.subr.msk.mxu0 %vm1259_vm0, %v371_v20  ;;  %v1219_v28 = vmul.f32 %v12383_v13, %v387_v21 }
 0x1ae   : > { %10319 = vmatprep.subr.msk.mxu1 %vm1259_vm0, %v375_v23 }
 0x1b0   : > { %10306 = vmatpush3.xpose.msk.msra.mxu0 %vm1259_vm0, %v371_v20  ;;  %v393_v20 = vld [vmem:[%s10676_s18 + $0x6f0] sm:$0xff] }
 0x1b1   : > { %10320 = vmatpush3.xpose.msk.msra.mxu1 %vm1259_vm0, %v375_v23  ;;  %10327 = vmatprep.subr.msk.mxu0 %vm1259_vm0, %v12290_v38 }
 0x1b2   : > { %10341 = vmatprep.subr.msk.mxu1 %vm1259_vm0, %v12294_v41  ;;  %v10618_v37 = vpop.eup %10617 }
 0x1b3   : > { %v9973_v49 = vpop.f32.mrf.mxu0  ;;  %10308 = vmatmul.mubr.msk.f32.vlgmr.msra.gmra.mxu0 %vm1259_vm0, %v1204_v40  ;;  %v604_v40 = vmul.f32 0.6931472, %v10616_v35  ;;  %v10620_v3 = vpop.eup %10619 }
 0x1b4   : > { %8341 = vst.msk [vmem:[%s11277_s21 + $0x348] sm:$0xff] %vm1259_vm0, %v9973_v49  ;;  %v9987_v54 = vpop.f32.mrf.mxu1  ;;  %10322 = vmatmul.mubr.msk.f32.vlgmr.msra.gmra.mxu1 %vm1259_vm0, %v1208_v43  ;;  %10328 = vmatpush3.xpose.msk.msra.mxu0 %vm1259_vm0, %v12290_v38  ;;  %v486_v38 = vld [vmem:[%s10669_s15 + $0x3b] sm:$0x1]  ;;  %v606_v43 = vmul.f32 0.6931472, %v10618_v37  ;;  %v1225_v49 = vmul.f32 %v12395_v19, %v393_v20 }
 0x1b5   : > { %8345 = vst.msk [vmem:[%s11277_s21 + $0x368] sm:$0xff] %vm1259_vm0, %v9987_v54  ;;  %10342 = vmatpush3.xpose.msk.msra.mxu1 %vm1259_vm0, %v12294_v41  ;;  %v4184_v56 = vpop.f32.mrf.mxu0  ;;  %10329 = vmatprep.subr.msk.mxu0 %vm1259_vm0, %v12309_v46  ;;  %v1220_v41 = vmul.f32 %v12383_v13, %v388_v27  ;;  %10621 = vlog2.f32 %v486_v38  ;;  %v1226_v54 = vmul.f32 %v12395_v19, %v12373_v9  ;;  %v489_v37 = vld [vmem:[%s10669_s15 + $0x3e] sm:$0x1] }
 0x1b6   : > { %8340 = vst.msk [vmem:[%s11277_s21 + $0x340] sm:$0xff] %vm1259_vm0, %v4184_v56  ;;  %v4293_v57 = vpop.f32.mrf.mxu1  ;;  %10343 = vmatprep.subr.msk.mxu1 %vm1259_vm0, %v385_v51  ;;  %10310 = vmatprep.mubr.msk.f32.mxu0 %vm1259_vm0, %v1205_v44  ;;  %v1224_v44 = vmul.f32 %v12395_v19, %v392_v29  ;;  %v399_v56 = vld [vmem:[%s10676_s18 + $0x720] sm:$0xff]  ;;  %10623 = vlog2.f32 %v487_v4 }
 0x1b7   : > { %8344 = vst.msk [vmem:[%s11277_s21 + $0x360] sm:$0xff] %vm1259_vm0, %v4293_v57  ;;  %10324 = vmatprep.mubr.msk.f32.mxu1 %vm1259_vm0, %v1209_v48  ;;  %v9976_v61 = vpop.f32.mrf.mxu0  ;;  %10311 = vmatmul.mubr.msk.f32.gmra.mxu0 %vm1259_vm0, %v1206_v47  ;;  %v12467_v47 = vld [vmem:[%s10676_s18 + $0x710] sm:$0xff]  ;;  %v1222_v48 = vmul.f32 %v12383_v13, %v12369_v6 }
 0x1b8   : > { %10330 = vmatpush3.xpose.msk.msra.mxu0 %vm1259_vm0, %v12309_v46  ;;  %8343 = vst.msk [vmem:[%s11277_s21 + $0x358] sm:$0xff] %vm1259_vm0, %v9976_v61  ;;  %v9990_v63 = vpop.f32.mrf.mxu1  ;;  %10325 = vmatmul.mubr.msk.f32.gmra.mxu1 %vm1259_vm0, %v1210_v53  ;;  %v12462_v46 = vrot.slane %v604_v40, %v10704_v14  ;;  %v395_v53 = vld [vmem:[%s10676_s18 + $0x700] sm:$0xff]  ;;  %v400_v61 = vld [vmem:[%s10676_s18 + $0x728] sm:$0xff]  ;;  %v12606_v40 = vld [vmem:[%s10676_s18 + $0x798] sm:$0xff] }
 0x1b9   : > { %10344 = vmatpush3.xpose.msk.msra.mxu1 %vm1259_vm0, %v385_v51  ;;  %10331 = vmatprep.subr.msk.mxu0 %vm1259_vm0, %v380_v58  ;;  %8347 = vst.msk [vmem:[%s11277_s21 + $0x378] sm:$0xff] %vm1259_vm0, %v9990_v63  ;;  %v4194_v0 = vpop.f32.mrf.mxu0  ;;  %v12474_v51 = vrot.slane %v606_v43, %v10704_v14  ;;  %v12610_v43 = vld [vmem:[%s10676_s18 + $0x7b8] sm:$0xff] }
 0x1ba   : > { %10345 = vmatprep.subr.msk.mxu1 %vm1259_vm0, %v384_v60  ;;  %8342 = vst.msk [vmem:[%s11277_s21 + $0x350] sm:$0xff] %vm1259_vm0, %v4194_v0  ;;  %v4303_v1 = vpop.f32.mrf.mxu1  ;;  %10335 = vmatprep.mubr.msk.f32.mxu0 %vm1259_vm0, %v1211_v59  ;;  %v396_v59 = vld [vmem:[%s10676_s18 + $0x708] sm:$0xff]  ;;  %v1229_v13 = vmul.f32 %v12462_v46, %v12467_v47 }
 0x1bb   : > { %8346 = vst.msk [vmem:[%s11277_s21 + $0x370] sm:$0xff] %vm1259_vm0, %v4303_v1  ;;  %10349 = vmatprep.mubr.msk.f32.mxu1 %vm1259_vm0, %v1215_v62  ;;  %v1231_v63 = vmul.f32 %v12474_v51, %v399_v56 }
 0x1bc   : > { %10332 = vmatpush3.xpose.msk.msra.mxu0 %vm1259_vm0, %v380_v58 }
 0x1bd   : > { %10346 = vmatpush3.xpose.msk.msra.mxu1 %vm1259_vm0, %v384_v60  ;;  %10333 = vmatprep.subr.msk.mxu0 %vm1259_vm0, %v379_v52  ;;  %v1227_v60 = vmul.f32 %v12462_v46, %v395_v53 }
 0x1be   : > { %10347 = vmatprep.subr.msk.mxu1 %vm1259_vm0, %v383_v55 }
 0x1c0   : > { %10334 = vmatpush3.xpose.msk.msra.mxu0 %vm1259_vm0, %v379_v52  ;;  %v401_v52 = vld [vmem:[%s10676_s18 + $0x730] sm:$0xff] }
 0x1c1   : > { %10348 = vmatpush3.xpose.msk.msra.mxu1 %vm1259_vm0, %v383_v55  ;;  %10355 = vmatprep.subr.msk.mxu0 %vm1259_vm0, %v12369_v6 }
 0x1c2   : > { %10369 = vmatprep.subr.msk.mxu1 %vm1259_vm0, %v12373_v9  ;;  %v10622_v5 = vpop.eup %10621 }
 0x1c3   : > { %v10001_v18 = vpop.f32.mrf.mxu0  ;;  %10336 = vmatmul.mubr.msk.f32.vlgmr.msra.gmra.mxu0 %vm1259_vm0, %v1212_v8  ;;  %v608_v8 = vmul.f32 0.6931472, %v10620_v3  ;;  %v10624_v36 = vpop.eup %10623 }
 0x1c4   : > { %8349 = vst.msk [vmem:[%s11277_s21 + $0x388] sm:$0xff] %vm1259_vm0, %v10001_v18  ;;  %v10015_v23 = vpop.f32.mrf.mxu1  ;;  %10350 = vmatmul.mubr.msk.f32.vlgmr.msra.gmra.mxu1 %vm1259_vm0, %v1216_v11  ;;  %10356 = vmatpush3.xpose.msk.msra.mxu0 %vm1259_vm0, %v12369_v6  ;;  %v488_v6 = vld [vmem:[%s10669_s15 + $0x3d] sm:$0x1]  ;;  %v610_v11 = vmul.f32 0.6931472, %v10622_v5  ;;  %v1233_v18 = vmul.f32 %v12474_v51, %v401_v52 }
 0x1c5   : > { %8353 = vst.msk [vmem:[%s11277_s21 + $0x3a8] sm:$0xff] %vm1259_vm0, %v10015_v23  ;;  %10370 = vmatpush3.xpose.msk.msra.mxu1 %vm1259_vm0, %v12373_v9  ;;  %v4402_v25 = vpop.f32.mrf.mxu0  ;;  %10357 = vmatprep.subr.msk.mxu0 %vm1259_vm0, %v12388_v15  ;;  %v1228_v9 = vmul.f32 %v12462_v46, %v396_v59  ;;  %10625 = vlog2.f32 %v488_v6  ;;  %v1234_v23 = vmul.f32 %v12474_v51, %v12452_v42  ;;  %v12679_v6 = vld [vmem:[%s10676_s18 + $0x7d8] sm:$0xff] }
 0x1c6   : > { %8348 = vst.msk [vmem:[%s11277_s21 + $0x380] sm:$0xff] %vm1259_vm0, %v4402_v25  ;;  %v4511_v26 = vpop.f32.mrf.mxu1  ;;  %10371 = vmatprep.subr.msk.mxu1 %vm1259_vm0, %v393_v20  ;;  %10338 = vmatprep.mubr.msk.f32.mxu0 %vm1259_vm0, %v1213_v12  ;;  %v1232_v12 = vmul.f32 %v12474_v51, %v400_v61  ;;  %v407_v25 = vld [vmem:[%s10676_s18 + $0x760] sm:$0xff]  ;;  %10627 = vlog2.f32 %v489_v37 }
 0x1c7   : > { %8352 = vst.msk [vmem:[%s11277_s21 + $0x3a0] sm:$0xff] %vm1259_vm0, %v4511_v26  ;;  %10352 = vmatprep.mubr.msk.f32.mxu1 %vm1259_vm0, %v1217_v17  ;;  %v10004_v30 = vpop.f32.mrf.mxu0  ;;  %10339 = vmatmul.mubr.msk.f32.gmra.mxu0 %vm1259_vm0, %v1214_v16  ;;  %v12546_v16 = vld [vmem:[%s10676_s18 + $0x750] sm:$0xff]  ;;  %v1230_v17 = vmul.f32 %v12462_v46, %v12448_v39 }
 0x1c8   : > { %10358 = vmatpush3.xpose.msk.msra.mxu0 %vm1259_vm0, %v12388_v15  ;;  %8351 = vst.msk [vmem:[%s11277_s21 + $0x398] sm:$0xff] %vm1259_vm0, %v10004_v30  ;;  %v10018_v32 = vpop.f32.mrf.mxu1  ;;  %10353 = vmatmul.mubr.msk.f32.gmra.mxu1 %vm1259_vm0, %v1218_v22  ;;  %v12541_v15 = vrot.slane %v608_v8, %v10704_v14  ;;  %v403_v22 = vld [vmem:[%s10676_s18 + $0x740] sm:$0xff]  ;;  %v408_v30 = vld [vmem:[%s10676_s18 + $0x768] sm:$0xff] }
 0x1c9   : > { %10372 = vmatpush3.xpose.msk.msra.mxu1 %vm1259_vm0, %v393_v20  ;;  %10359 = vmatprep.subr.msk.mxu0 %vm1259_vm0, %v388_v27  ;;  %8355 = vst.msk [vmem:[%s11277_s21 + $0x3b8] sm:$0xff] %vm1259_vm0, %v10018_v32  ;;  %v4412_v33 = vpop.f32.mrf.mxu0  ;;  %v12553_v20 = vrot.slane %v610_v11, %v10704_v14 }
 0x1ca   : > { %10373 = vmatprep.subr.msk.mxu1 %vm1259_vm0, %v392_v29  ;;  %8350 = vst.msk [vmem:[%s11277_s21 + $0x390] sm:$0xff] %vm1259_vm0, %v4412_v33  ;;  %v4521_v34 = vpop.f32.mrf.mxu1  ;;  %10363 = vmatprep.mubr.msk.f32.mxu0 %vm1259_vm0, %v1219_v28  ;;  %v404_v28 = vld [vmem:[%s10676_s18 + $0x748] sm:$0xff]  ;;  %v1237_v46 = vmul.f32 %v12541_v15, %v12546_v16 }
 0x1cb   : > { %8354 = vst.msk [vmem:[%s11277_s21 + $0x3b0] sm:$0xff] %vm1259_vm0, %v4521_v34  ;;  %10377 = vmatprep.mubr.msk.f32.mxu1 %vm1259_vm0, %v1223_v31  ;;  %v1239_v32 = vmul.f32 %v12553_v20, %v407_v25 }
 0x1cc   : > { %10360 = vmatpush3.xpose.msk.msra.mxu0 %vm1259_vm0, %v388_v27 }
 0x1cd   : > { %10374 = vmatpush3.xpose.msk.msra.mxu1 %vm1259_vm0, %v392_v29  ;;  %10361 = vmatprep.subr.msk.mxu0 %vm1259_vm0, %v387_v21  ;;  %v1235_v29 = vmul.f32 %v12541_v15, %v403_v22 }
 0x1ce   : > { %10375 = vmatprep.subr.msk.mxu1 %vm1259_vm0, %v391_v24 }
 0x1d0   : > { %10362 = vmatpush3.xpose.msk.msra.mxu0 %vm1259_vm0, %v387_v21  ;;  %v409_v21 = vld [vmem:[%s10676_s18 + $0x770] sm:$0xff] }
 0x1d1   : > { %10376 = vmatpush3.xpose.msk.msra.mxu1 %vm1259_vm0, %v391_v24  ;;  %10383 = vmatprep.subr.msk.mxu0 %vm1259_vm0, %v12448_v39 }
 0x1d2   : > { %10397 = vmatprep.subr.msk.mxu1 %vm1259_vm0, %v12452_v42  ;;  %v10626_v38 = vpop.eup %10625 }
 0x1d3   : > { %v10029_v50 = vpop.f32.mrf.mxu0  ;;  %10364 = vmatmul.mubr.msk.f32.vlgmr.msra.gmra.mxu0 %vm1259_vm0, %v1220_v41  ;;  %v612_v41 = vmul.f32 0.6931472, %v10624_v36  ;;  %v10628_v4 = vpop.eup %10627 }
 0x1d4   : > { %8357 = vst.msk [vmem:[%s11277_s21 + $0x3c8] sm:$0xff] %vm1259_vm0, %v10029_v50  ;;  %v10043_v55 = vpop.f32.mrf.mxu1  ;;  %10378 = vmatmul.mubr.msk.f32.vlgmr.msra.gmra.mxu1 %vm1259_vm0, %v1224_v44  ;;  %10384 = vmatpush3.xpose.msk.msra.mxu0 %vm1259_vm0, %v12448_v39  ;;  %v490_v39 = vld [vmem:[%s10669_s15 + $0x3f] sm:$0x1]  ;;  %v614_v44 = vmul.f32 0.6931472, %v10626_v38  ;;  %v1241_v50 = vmul.f32 %v12553_v20, %v409_v21 }
 0x1d5   : > { %8361 = vst.msk [vmem:[%s11277_s21 + $0x3e8] sm:$0xff] %vm1259_vm0, %v10043_v55  ;;  %10398 = vmatpush3.xpose.msk.msra.mxu1 %vm1259_vm0, %v12452_v42  ;;  %v4620_v57 = vpop.f32.mrf.mxu0  ;;  %10385 = vmatprep.subr.msk.mxu0 %vm1259_vm0, %v12467_v47  ;;  %v1236_v42 = vmul.f32 %v12541_v15, %v404_v28  ;;  %10629 = vlog2.f32 %v490_v39  ;;  %v1242_v55 = vmul.f32 %v12553_v20, %v12531_v10 }
 0x1d6   : > { %8356 = vst.msk [vmem:[%s11277_s21 + $0x3c0] sm:$0xff] %vm1259_vm0, %v4620_v57  ;;  %v4729_v58 = vpop.f32.mrf.mxu1  ;;  %10399 = vmatprep.subr.msk.mxu1 %vm1259_vm0, %v401_v52  ;;  %10366 = vmatprep.mubr.msk.f32.mxu0 %vm1259_vm0, %v1221_v45  ;;  %v1240_v45 = vmul.f32 %v12553_v20, %v408_v30  ;;  %v415_v57 = vld [vmem:[%s10676_s18 + $0x7a0] sm:$0xff]  ;;  %v425_v20 = vld [vmem:[%s10676_s18 + $0x7f0] sm:$0xff] }
 0x1d7   : > { %8360 = vst.msk [vmem:[%s11277_s21 + $0x3e0] sm:$0xff] %vm1259_vm0, %v4729_v58  ;;  %10380 = vmatprep.mubr.msk.f32.mxu1 %vm1259_vm0, %v1225_v49  ;;  %v10032_v62 = vpop.f32.mrf.mxu0  ;;  %10367 = vmatmul.mubr.msk.f32.gmra.mxu0 %vm1259_vm0, %v1222_v48  ;;  %v413_v48 = vld [vmem:[%s10676_s18 + $0x790] sm:$0xff]  ;;  %v1238_v49 = vmul.f32 %v12541_v15, %v12527_v7 }
 0x1d8   : > { %10386 = vmatpush3.xpose.msk.msra.mxu0 %vm1259_vm0, %v12467_v47  ;;  %8359 = vst.msk [vmem:[%s11277_s21 + $0x3d8] sm:$0xff] %vm1259_vm0, %v10032_v62  ;;  %v10046_v0 = vpop.f32.mrf.mxu1  ;;  %10381 = vmatmul.mubr.msk.f32.gmra.mxu1 %vm1259_vm0, %v1226_v54  ;;  %v12620_v47 = vrot.slane %v612_v41, %v10704_v14  ;;  %v411_v54 = vld [vmem:[%s10676_s18 + $0x780] sm:$0xff]  ;;  %v416_v62 = vld [vmem:[%s10676_s18 + $0x7a8] sm:$0xff]  ;;  %v421_v15 = vld [vmem:[%s10676_s18 + $0x7d0] sm:$0xff] }
 0x1d9   : > { %10400 = vmatpush3.xpose.msk.msra.mxu1 %vm1259_vm0, %v401_v52  ;;  %10387 = vmatprep.subr.msk.mxu0 %vm1259_vm0, %v396_v59  ;;  %8363 = vst.msk [vmem:[%s11277_s21 + $0x3f8] sm:$0xff] %vm1259_vm0, %v10046_v0  ;;  %v4630_v1 = vpop.f32.mrf.mxu0  ;;  %v12630_v52 = vrot.slane %v614_v44, %v10704_v14 }
 0x1da   : > { %10401 = vmatprep.subr.msk.mxu1 %vm1259_vm0, %v400_v61  ;;  %8358 = vst.msk [vmem:[%s11277_s21 + $0x3d0] sm:$0xff] %vm1259_vm0, %v4630_v1  ;;  %v4739_v2 = vpop.f32.mrf.mxu1  ;;  %10391 = vmatprep.mubr.msk.f32.mxu0 %vm1259_vm0, %v1227_v60  ;;  %v412_v60 = vld [vmem:[%s10676_s18 + $0x788] sm:$0xff] }
 0x1db   : > { %8362 = vst.msk [vmem:[%s11277_s21 + $0x3f0] sm:$0xff] %vm1259_vm0, %v4739_v2  ;;  %10405 = vmatprep.mubr.msk.f32.mxu1 %vm1259_vm0, %v1231_v63  ;;  %v1247_v0 = vmul.f32 %v12630_v52, %v415_v57  ;;  %v1244_v8 = vmul.f32 %v12620_v47, %v412_v60  ;;  %v1248_v11 = vmul.f32 %v12630_v52, %v416_v62 }
 0x1dc   : > { %10388 = vmatpush3.xpose.msk.msra.mxu0 %vm1259_vm0, %v396_v59 }
 0x1dd   : > { %10402 = vmatpush3.xpose.msk.msra.mxu1 %vm1259_vm0, %v400_v61  ;;  %10389 = vmatprep.subr.msk.mxu0 %vm1259_vm0, %v395_v53  ;;  %v1243_v61 = vmul.f32 %v12620_v47, %v411_v54 }
 0x1de   : > { %10403 = vmatprep.subr.msk.mxu1 %vm1259_vm0, %v399_v56 }
 0x1e0   : > { %10390 = vmatpush3.xpose.msk.msra.mxu0 %vm1259_vm0, %v395_v53  ;;  %v417_v53 = vld [vmem:[%s10676_s18 + $0x7b0] sm:$0xff] }
 0x1e1   : > { %10404 = vmatpush3.xpose.msk.msra.mxu1 %vm1259_vm0, %v399_v56  ;;  %10411 = vmatprep.subr.msk.mxu0 %vm1259_vm0, %v12527_v7 }
 0x1e2   : > { %10425 = vmatprep.subr.msk.mxu1 %vm1259_vm0, %v12531_v10  ;;  %v10630_v5 = vpop.eup %10629 }
 0x1e3   : > { %v10057_v19 = vpop.f32.mrf.mxu0  ;;  %10392 = vmatmul.mubr.msk.f32.vlgmr.msra.gmra.mxu0 %vm1259_vm0, %v1228_v9  ;;  %v12683_v9 = vld [vmem:[%s10676_s18 + $0x7f8] sm:$0xff] }
 0x1e4   : > { %8365 = vst.msk [vmem:[%s11277_s21 + $0x408] sm:$0xff] %vm1259_vm0, %v10057_v19  ;;  %v10071_v24 = vpop.f32.mrf.mxu1  ;;  %10406 = vmatmul.mubr.msk.f32.vlgmr.msra.gmra.mxu1 %vm1259_vm0, %v1232_v12  ;;  %10412 = vmatpush3.xpose.msk.msra.mxu0 %vm1259_vm0, %v12527_v7  ;;  %v616_v7 = vmul.f32 0.6931472, %v10628_v4  ;;  %v1245_v12 = vmul.f32 %v12620_v47, %v413_v48 }
 0x1e5   : > { %8369 = vst.msk [vmem:[%s11277_s21 + $0x428] sm:$0xff] %vm1259_vm0, %v10071_v24  ;;  %10426 = vmatpush3.xpose.msk.msra.mxu1 %vm1259_vm0, %v12531_v10  ;;  %v4838_v26 = vpop.f32.mrf.mxu0  ;;  %10413 = vmatprep.subr.msk.mxu0 %vm1259_vm0, %v12546_v16  ;;  %v618_v10 = vmul.f32 0.6931472, %v10630_v5  ;;  %v423_v24 = vld [vmem:[%s10676_s18 + $0x7e0] sm:$0xff] }
 0x1e6   : > { %8364 = vst.msk [vmem:[%s11277_s21 + $0x400] sm:$0xff] %vm1259_vm0, %v4838_v26  ;;  %v4947_v27 = vpop.f32.mrf.mxu1  ;;  %10427 = vmatprep.subr.msk.mxu1 %vm1259_vm0, %v409_v21  ;;  %10394 = vmatprep.mubr.msk.f32.mxu0 %vm1259_vm0, %v1229_v13  ;;  %v934_v13 = vrot.slane %v616_v7, %v10704_v14  ;;  %v420_v26 = vld [vmem:[%s10676_s18 + $0x7c8] sm:$0xff] }
 0x1e7   : > { %8368 = vst.msk [vmem:[%s11277_s21 + $0x420] sm:$0xff] %vm1259_vm0, %v4947_v27  ;;  %10408 = vmatprep.mubr.msk.f32.mxu1 %vm1259_vm0, %v1233_v18  ;;  %v10060_v31 = vpop.f32.mrf.mxu0  ;;  %10395 = vmatmul.mubr.msk.f32.gmra.mxu0 %vm1259_vm0, %v1230_v17  ;;  %v1249_v17 = vmul.f32 %v12630_v52, %v417_v53  ;;  %v938_v19 = vrot.slane %v618_v10, %v10704_v14 }
 0x1e8   : > { %10414 = vmatpush3.xpose.msk.msra.mxu0 %vm1259_vm0, %v12546_v16  ;;  %8367 = vst.msk [vmem:[%s11277_s21 + $0x418] sm:$0xff] %vm1259_vm0, %v10060_v31  ;;  %v10074_v33 = vpop.f32.mrf.mxu1  ;;  %10409 = vmatmul.mubr.msk.f32.gmra.mxu1 %vm1259_vm0, %v1234_v23  ;;  %v1246_v16 = vmul.f32 %v12620_v47, %v12606_v40  ;;  %v1254_v38 = vmul.f32 %v934_v13, %v12679_v6 }
 0x1e9   : > { %10428 = vmatpush3.xpose.msk.msra.mxu1 %vm1259_vm0, %v409_v21  ;;  %10415 = vmatprep.subr.msk.mxu0 %vm1259_vm0, %v404_v28  ;;  %8371 = vst.msk [vmem:[%s11277_s21 + $0x438] sm:$0xff] %vm1259_vm0, %v10074_v33  ;;  %v4848_v34 = vpop.f32.mrf.mxu0  ;;  %v419_v21 = vld [vmem:[%s10676_s18 + $0x7c0] sm:$0xff]  ;;  %v1257_v37 = vmul.f32 %v938_v19, %v425_v20 }
 0x1ea   : > { %10429 = vmatprep.subr.msk.mxu1 %vm1259_vm0, %v408_v30  ;;  %8366 = vst.msk [vmem:[%s11277_s21 + $0x410] sm:$0xff] %vm1259_vm0, %v4848_v34  ;;  %v4957_v35 = vpop.f32.mrf.mxu1  ;;  %10419 = vmatprep.mubr.msk.f32.mxu0 %vm1259_vm0, %v1235_v29  ;;  %v1251_v27 = vmul.f32 %v934_v13, %v419_v21  ;;  %v1252_v34 = vmul.f32 %v934_v13, %v420_v26 }
 0x1eb   : > { %8370 = vst.msk [vmem:[%s11277_s21 + $0x430] sm:$0xff] %vm1259_vm0, %v4957_v35  ;;  %10433 = vmatprep.mubr.msk.f32.mxu1 %vm1259_vm0, %v1239_v32  ;;  %v1253_v35 = vmul.f32 %v934_v13, %v421_v15 }
 0x1ec   : > { %10416 = vmatpush3.xpose.msk.msra.mxu0 %vm1259_vm0, %v404_v28  ;;  %v424_v28 = vld [vmem:[%s10676_s18 + $0x7e8] sm:$0xff] }
 0x1ed   : > { %10430 = vmatpush3.xpose.msk.msra.mxu1 %vm1259_vm0, %v408_v30  ;;  %10417 = vmatprep.subr.msk.mxu0 %vm1259_vm0, %v403_v22  ;;  %v1255_v30 = vmul.f32 %v938_v19, %v423_v24  ;;  %v1256_v36 = vmul.f32 %v938_v19, %v424_v28 }
 0x1ee   : > { %10431 = vmatprep.subr.msk.mxu1 %vm1259_vm0, %v407_v25 }
 0x1f0   : > { %10418 = vmatpush3.xpose.msk.msra.mxu0 %vm1259_vm0, %v403_v22  ;;  %v1250_v22 = vmul.f32 %v12630_v52, %v12610_v43 }
 0x1f1   : > { %10432 = vmatpush3.xpose.msk.msra.mxu1 %vm1259_vm0, %v407_v25  ;;  %10439 = vmatprep.subr.msk.mxu0 %vm1259_vm0, %v12606_v40 }
 0x1f2   : > { %10453 = vmatprep.subr.msk.mxu1 %vm1259_vm0, %v12610_v43 }
 0x1f3   : > { %v10085_v51 = vpop.f32.mrf.mxu0  ;;  %10420 = vmatmul.mubr.msk.f32.vlgmr.msra.gmra.mxu0 %vm1259_vm0, %v1236_v42 }
 0x1f4   : > { %8373 = vst.msk [vmem:[%s11277_s21 + $0x448] sm:$0xff] %vm1259_vm0, %v10085_v51  ;;  %v10099_v56 = vpop.f32.mrf.mxu1  ;;  %10434 = vmatmul.mubr.msk.f32.vlgmr.msra.gmra.mxu1 %vm1259_vm0, %v1240_v45  ;;  %10440 = vmatpush3.xpose.msk.msra.mxu0 %vm1259_vm0, %v12606_v40  ;;  %v1258_v40 = vmul.f32 %v938_v19, %v12683_v9 }
 0x1f5   : > { %8377 = vst.msk [vmem:[%s11277_s21 + $0x468] sm:$0xff] %vm1259_vm0, %v10099_v56  ;;  %10454 = vmatpush3.xpose.msk.msra.mxu1 %vm1259_vm0, %v12610_v43  ;;  %v5056_v58 = vpop.f32.mrf.mxu0  ;;  %10441 = vmatprep.subr.msk.mxu0 %vm1259_vm0, %v413_v48 }
 0x1f6   : > { %8372 = vst.msk [vmem:[%s11277_s21 + $0x440] sm:$0xff] %vm1259_vm0, %v5056_v58  ;;  %v5165_v59 = vpop.f32.mrf.mxu1  ;;  %10455 = vmatprep.subr.msk.mxu1 %vm1259_vm0, %v417_v53  ;;  %10422 = vmatprep.mubr.msk.f32.mxu0 %vm1259_vm0, %v1237_v46 }
 0x1f7   : > { %8376 = vst.msk [vmem:[%s11277_s21 + $0x460] sm:$0xff] %vm1259_vm0, %v5165_v59  ;;  %10436 = vmatprep.mubr.msk.f32.mxu1 %vm1259_vm0, %v1241_v50  ;;  %v10088_v63 = vpop.f32.mrf.mxu0  ;;  %10423 = vmatmul.mubr.msk.f32.gmra.mxu0 %vm1259_vm0, %v1238_v49 }
 0x1f8   : > { %10442 = vmatpush3.xpose.msk.msra.mxu0 %vm1259_vm0, %v413_v48  ;;  %8375 = vst.msk [vmem:[%s11277_s21 + $0x458] sm:$0xff] %vm1259_vm0, %v10088_v63  ;;  %v10102_v1 = vpop.f32.mrf.mxu1  ;;  %10437 = vmatmul.mubr.msk.f32.gmra.mxu1 %vm1259_vm0, %v1242_v55 }
 0x1f9   : > { %10456 = vmatpush3.xpose.msk.msra.mxu1 %vm1259_vm0, %v417_v53  ;;  %10443 = vmatprep.subr.msk.mxu0 %vm1259_vm0, %v412_v60  ;;  %8379 = vst.msk [vmem:[%s11277_s21 + $0x478] sm:$0xff] %vm1259_vm0, %v10102_v1  ;;  %v5066_v2 = vpop.f32.mrf.mxu0 }
 0x1fa   : > { %10457 = vmatprep.subr.msk.mxu1 %vm1259_vm0, %v416_v62  ;;  %8374 = vst.msk [vmem:[%s11277_s21 + $0x450] sm:$0xff] %vm1259_vm0, %v5066_v2  ;;  %v5175_v3 = vpop.f32.mrf.mxu1  ;;  %10447 = vmatprep.mubr.msk.f32.mxu0 %vm1259_vm0, %v1243_v61 }
 0x1fb   : > { %8378 = vst.msk [vmem:[%s11277_s21 + $0x470] sm:$0xff] %vm1259_vm0, %v5175_v3  ;;  %10461 = vmatprep.mubr.msk.f32.mxu1 %vm1259_vm0, %v1247_v0 }
 0x1fc   : > { %10444 = vmatpush3.xpose.msk.msra.mxu0 %vm1259_vm0, %v412_v60 }
 0x1fd   : > { %10458 = vmatpush3.xpose.msk.msra.mxu1 %vm1259_vm0, %v416_v62  ;;  %10445 = vmatprep.subr.msk.mxu0 %vm1259_vm0, %v411_v54 }
 0x1fe   : > { %10459 = vmatprep.subr.msk.mxu1 %vm1259_vm0, %v415_v57 }
 0x200   : > { %10446 = vmatpush3.xpose.msk.msra.mxu0 %vm1259_vm0, %v411_v54 }
 0x201   : > { %10460 = vmatpush3.xpose.msk.msra.mxu1 %vm1259_vm0, %v415_v57  ;;  %10467 = vmatprep.subr.msk.mxu0 %vm1259_vm0, %v12679_v6 }
 0x202   : > { %10481 = vmatprep.subr.msk.mxu1 %vm1259_vm0, %v12683_v9 }
 0x203   : > { %v10113_v18 = vpop.f32.mrf.mxu0  ;;  %10448 = vmatmul.mubr.msk.f32.vlgmr.msra.gmra.mxu0 %vm1259_vm0, %v1244_v8 }
 0x204   : > { %8381 = vst.msk [vmem:[%s11277_s21 + $0x488] sm:$0xff] %vm1259_vm0, %v10113_v18  ;;  %v10127_v23 = vpop.f32.mrf.mxu1  ;;  %10462 = vmatmul.mubr.msk.f32.vlgmr.msra.gmra.mxu1 %vm1259_vm0, %v1248_v11  ;;  %10468 = vmatpush3.xpose.msk.msra.mxu0 %vm1259_vm0, %v12679_v6 }
 0x205   : > { %8385 = vst.msk [vmem:[%s11277_s21 + $0x4a8] sm:$0xff] %vm1259_vm0, %v10127_v23  ;;  %10482 = vmatpush3.xpose.msk.msra.mxu1 %vm1259_vm0, %v12683_v9  ;;  %v5274_v14 = vpop.f32.mrf.mxu0  ;;  %10469 = vmatprep.subr.msk.mxu0 %vm1259_vm0, %v421_v15 }
 0x206   : > { %8380 = vst.msk [vmem:[%s11277_s21 + $0x480] sm:$0xff] %vm1259_vm0, %v5274_v14  ;;  %v5383_v25 = vpop.f32.mrf.mxu1  ;;  %10483 = vmatprep.subr.msk.mxu1 %vm1259_vm0, %v425_v20  ;;  %10450 = vmatprep.mubr.msk.f32.mxu0 %vm1259_vm0, %v1245_v12 }
 0x207   : > { %8384 = vst.msk [vmem:[%s11277_s21 + $0x4a0] sm:$0xff] %vm1259_vm0, %v5383_v25  ;;  %10464 = vmatprep.mubr.msk.f32.mxu1 %vm1259_vm0, %v1249_v17  ;;  %10451 = vmatmul.mubr.msk.f32.gmra.mxu0 %vm1259_vm0, %v1246_v16  ;;  %v10116_v29 = vpop.f32.mrf.mxu0 }
 0x208   : > { %10470 = vmatpush3.xpose.msk.msra.mxu0 %vm1259_vm0, %v421_v15  ;;  %10465 = vmatmul.mubr.msk.f32.gmra.mxu1 %vm1259_vm0, %v1250_v22  ;;  %8383 = vst.msk [vmem:[%s11277_s21 + $0x498] sm:$0xff] %vm1259_vm0, %v10116_v29  ;;  %v10130_v31 = vpop.f32.mrf.mxu1 }
 0x209   : > { %10484 = vmatpush3.xpose.msk.msra.mxu1 %vm1259_vm0, %v425_v20  ;;  %10471 = vmatprep.subr.msk.mxu0 %vm1259_vm0, %v420_v26  ;;  %8387 = vst.msk [vmem:[%s11277_s21 + $0x4b8] sm:$0xff] %vm1259_vm0, %v10130_v31  ;;  %v5284_v32 = vpop.f32.mrf.mxu0 }
 0x20a   : > { %10485 = vmatprep.subr.msk.mxu1 %vm1259_vm0, %v424_v28  ;;  %8382 = vst.msk [vmem:[%s11277_s21 + $0x490] sm:$0xff] %vm1259_vm0, %v5284_v32  ;;  %v5393_v33 = vpop.f32.mrf.mxu1  ;;  %10475 = vmatprep.mubr.msk.f32.mxu0 %vm1259_vm0, %v1251_v27 }
 0x20b   : > { %8386 = vst.msk [vmem:[%s11277_s21 + $0x4b0] sm:$0xff] %vm1259_vm0, %v5393_v33  ;;  %10489 = vmatprep.mubr.msk.f32.mxu1 %vm1259_vm0, %v1255_v30 }
 0x20c   : > { %10472 = vmatpush3.xpose.msk.msra.mxu0 %vm1259_vm0, %v420_v26 }
 0x20d   : > { %10486 = vmatpush3.xpose.msk.msra.mxu1 %vm1259_vm0, %v424_v28  ;;  %10473 = vmatprep.subr.msk.mxu0 %vm1259_vm0, %v419_v21 }
 0x20e   : > { %10487 = vmatprep.subr.msk.mxu1 %vm1259_vm0, %v423_v24 }
 0x210   : > { %10474 = vmatpush3.xpose.msk.msra.mxu0 %vm1259_vm0, %v419_v21 }
 0x211   : > { %10488 = vmatpush3.xpose.msk.msra.mxu1 %vm1259_vm0, %v423_v24 }
 0x213   : > { %v10141_v39 = vpop.f32.mrf.mxu0  ;;  %10476 = vmatmul.mubr.msk.f32.vlgmr.msra.gmra.mxu0 %vm1259_vm0, %v1252_v34 }
 0x214   : > { %8389 = vst.msk [vmem:[%s11277_s21 + $0x4c8] sm:$0xff] %vm1259_vm0, %v10141_v39  ;;  %v10155_v41 = vpop.f32.mrf.mxu1  ;;  %10490 = vmatmul.mubr.msk.f32.vlgmr.msra.gmra.mxu1 %vm1259_vm0, %v1256_v36  ;;  %10478 = vmatprep.mubr.msk.f32.mxu0 %vm1259_vm0, %v1253_v35 }
 0x215   : > { %8393 = vst.msk [vmem:[%s11277_s21 + $0x4e8] sm:$0xff] %vm1259_vm0, %v10155_v41  ;;  %v5492_v42 = vpop.f32.mrf.mxu0  ;;  %10492 = vmatprep.mubr.msk.f32.mxu1 %vm1259_vm0, %v1257_v37 }
 0x216   : > { %8388 = vst.msk [vmem:[%s11277_s21 + $0x4c0] sm:$0xff] %vm1259_vm0, %v5492_v42  ;;  %v5601_v43 = vpop.f32.mrf.mxu1 }
 0x217   : > { %8392 = vst.msk [vmem:[%s11277_s21 + $0x4e0] sm:$0xff] %vm1259_vm0, %v5601_v43  ;;  %10479 = vmatmul.mubr.msk.f32.gmra.mxu0 %vm1259_vm0, %v1254_v38  ;;  %v10144_v44 = vpop.f32.mrf.mxu0 }
 0x218   : > { %10493 = vmatmul.mubr.msk.f32.gmra.mxu1 %vm1259_vm0, %v1258_v40  ;;  %8391 = vst.msk [vmem:[%s11277_s21 + $0x4d8] sm:$0xff] %vm1259_vm0, %v10144_v44  ;;  %v10158_v45 = vpop.f32.mrf.mxu1 }
 0x219   : > { %8395 = vst.msk [vmem:[%s11277_s21 + $0x4f8] sm:$0xff] %vm1259_vm0, %v10158_v45  ;;  %v5502_v46 = vpop.f32.mrf.mxu0 }
 0x21a   : > { %8390 = vst.msk [vmem:[%s11277_s21 + $0x4d0] sm:$0xff] %vm1259_vm0, %v5502_v46  ;;  %v5611_v47 = vpop.f32.mrf.mxu1 }
 0x21b   : > { %8394 = vst.msk [vmem:[%s11277_s21 + $0x4f0] sm:$0xff] %vm1259_vm0, %v5611_v47 }
 0x223   : > { %v10169_v48 = vpop.f32.mrf.mxu0 }
 0x224   : > { %8397 = vst.msk [vmem:[%s11277_s21 + $0x508] sm:$0xff] %vm1259_vm0, %v10169_v48  ;;  %v10183_v49 = vpop.f32.mrf.mxu1 }
 0x225   : > { %8401 = vst.msk [vmem:[%s11277_s21 + $0x528] sm:$0xff] %vm1259_vm0, %v10183_v49  ;;  %v5710_v50 = vpop.f32.mrf.mxu0 }
 0x226   : > { %8396 = vst.msk [vmem:[%s11277_s21 + $0x500] sm:$0xff] %vm1259_vm0, %v5710_v50  ;;  %v5819_v51 = vpop.f32.mrf.mxu1 }
 0x227   : > { %8400 = vst.msk [vmem:[%s11277_s21 + $0x520] sm:$0xff] %vm1259_vm0, %v5819_v51  ;;  %v10172_v52 = vpop.f32.mrf.mxu0 }
 0x228   : > { %8399 = vst.msk [vmem:[%s11277_s21 + $0x518] sm:$0xff] %vm1259_vm0, %v10172_v52  ;;  %v10186_v53 = vpop.f32.mrf.mxu1 }
 0x229   : > { %8403 = vst.msk [vmem:[%s11277_s21 + $0x538] sm:$0xff] %vm1259_vm0, %v10186_v53  ;;  %v5720_v54 = vpop.f32.mrf.mxu0 }
 0x22a   : > { %8398 = vst.msk [vmem:[%s11277_s21 + $0x510] sm:$0xff] %vm1259_vm0, %v5720_v54  ;;  %v5829_v55 = vpop.f32.mrf.mxu1 }
 0x22b   : > { %8402 = vst.msk [vmem:[%s11277_s21 + $0x530] sm:$0xff] %vm1259_vm0, %v5829_v55 }
 0x233   : > { %v10197_v56 = vpop.f32.mrf.mxu0 }
 0x234   : > { %8405 = vst.msk [vmem:[%s11277_s21 + $0x548] sm:$0xff] %vm1259_vm0, %v10197_v56  ;;  %v10211_v57 = vpop.f32.mrf.mxu1 }
 0x235   : > { %8409 = vst.msk [vmem:[%s11277_s21 + $0x568] sm:$0xff] %vm1259_vm0, %v10211_v57  ;;  %v5928_v58 = vpop.f32.mrf.mxu0 }
 0x236   : > { %8404 = vst.msk [vmem:[%s11277_s21 + $0x540] sm:$0xff] %vm1259_vm0, %v5928_v58  ;;  %v6037_v59 = vpop.f32.mrf.mxu1 }
 0x237   : > { %8408 = vst.msk [vmem:[%s11277_s21 + $0x560] sm:$0xff] %vm1259_vm0, %v6037_v59  ;;  %v10200_v60 = vpop.f32.mrf.mxu0 }
 0x238   : > { %8407 = vst.msk [vmem:[%s11277_s21 + $0x558] sm:$0xff] %vm1259_vm0, %v10200_v60  ;;  %v10214_v61 = vpop.f32.mrf.mxu1 }
 0x239   : > { %8411 = vst.msk [vmem:[%s11277_s21 + $0x578] sm:$0xff] %vm1259_vm0, %v10214_v61  ;;  %v5938_v62 = vpop.f32.mrf.mxu0 }
 0x23a   : > { %8406 = vst.msk [vmem:[%s11277_s21 + $0x550] sm:$0xff] %vm1259_vm0, %v5938_v62  ;;  %v6047_v63 = vpop.f32.mrf.mxu1 }
 0x23b   : > { %8410 = vst.msk [vmem:[%s11277_s21 + $0x570] sm:$0xff] %vm1259_vm0, %v6047_v63 }
 0x243   : > { %v10225_v0 = vpop.f32.mrf.mxu0 }
 0x244   : > { %8413 = vst.msk [vmem:[%s11277_s21 + $0x588] sm:$0xff] %vm1259_vm0, %v10225_v0  ;;  %v10239_v1 = vpop.f32.mrf.mxu1 }
 0x245   : > { %8417 = vst.msk [vmem:[%s11277_s21 + $0x5a8] sm:$0xff] %vm1259_vm0, %v10239_v1  ;;  %v6146_v2 = vpop.f32.mrf.mxu0 }
 0x246   : > { %8412 = vst.msk [vmem:[%s11277_s21 + $0x580] sm:$0xff] %vm1259_vm0, %v6146_v2  ;;  %v6255_v3 = vpop.f32.mrf.mxu1 }
 0x247   : > { %8416 = vst.msk [vmem:[%s11277_s21 + $0x5a0] sm:$0xff] %vm1259_vm0, %v6255_v3  ;;  %v10228_v4 = vpop.f32.mrf.mxu0 }
 0x248   : > { %8415 = vst.msk [vmem:[%s11277_s21 + $0x598] sm:$0xff] %vm1259_vm0, %v10228_v4  ;;  %v10242_v5 = vpop.f32.mrf.mxu1 }
 0x249   : > { %8419 = vst.msk [vmem:[%s11277_s21 + $0x5b8] sm:$0xff] %vm1259_vm0, %v10242_v5  ;;  %v6156_v6 = vpop.f32.mrf.mxu0 }
 0x24a   : > { %8414 = vst.msk [vmem:[%s11277_s21 + $0x590] sm:$0xff] %vm1259_vm0, %v6156_v6  ;;  %v6265_v7 = vpop.f32.mrf.mxu1 }
 0x24b   : > { %8418 = vst.msk [vmem:[%s11277_s21 + $0x5b0] sm:$0xff] %vm1259_vm0, %v6265_v7 }
 0x253   : > { %v10253_v8 = vpop.f32.mrf.mxu0 }
 0x254   : > { %8421 = vst.msk [vmem:[%s11277_s21 + $0x5c8] sm:$0xff] %vm1259_vm0, %v10253_v8  ;;  %v10267_v9 = vpop.f32.mrf.mxu1 }
 0x255   : > { %8425 = vst.msk [vmem:[%s11277_s21 + $0x5e8] sm:$0xff] %vm1259_vm0, %v10267_v9  ;;  %v6364_v10 = vpop.f32.mrf.mxu0 }
 0x256   : > { %8420 = vst.msk [vmem:[%s11277_s21 + $0x5c0] sm:$0xff] %vm1259_vm0, %v6364_v10  ;;  %v6473_v11 = vpop.f32.mrf.mxu1 }
 0x257   : > { %8424 = vst.msk [vmem:[%s11277_s21 + $0x5e0] sm:$0xff] %vm1259_vm0, %v6473_v11  ;;  %v10256_v12 = vpop.f32.mrf.mxu0 }
 0x258   : > { %8423 = vst.msk [vmem:[%s11277_s21 + $0x5d8] sm:$0xff] %vm1259_vm0, %v10256_v12  ;;  %v10270_v13 = vpop.f32.mrf.mxu1 }
 0x259   : > { %8427 = vst.msk [vmem:[%s11277_s21 + $0x5f8] sm:$0xff] %vm1259_vm0, %v10270_v13  ;;  %v6374_v15 = vpop.f32.mrf.mxu0 }
 0x25a   : > { %8422 = vst.msk [vmem:[%s11277_s21 + $0x5d0] sm:$0xff] %vm1259_vm0, %v6374_v15  ;;  %v6483_v16 = vpop.f32.mrf.mxu1 }
 0x25b   : > { %8426 = vst.msk [vmem:[%s11277_s21 + $0x5f0] sm:$0xff] %vm1259_vm0, %v6483_v16 }
 0x263   : > { %v10281_v17 = vpop.f32.mrf.mxu0 }
 0x264   : > { %8429 = vst.msk [vmem:[%s11277_s21 + $0x608] sm:$0xff] %vm1259_vm0, %v10281_v17  ;;  %v10295_v18 = vpop.f32.mrf.mxu1 }
 0x265   : > { %8433 = vst.msk [vmem:[%s11277_s21 + $0x628] sm:$0xff] %vm1259_vm0, %v10295_v18  ;;  %v6582_v19 = vpop.f32.mrf.mxu0 }
 0x266   : > { %8428 = vst.msk [vmem:[%s11277_s21 + $0x600] sm:$0xff] %vm1259_vm0, %v6582_v19  ;;  %v6691_v20 = vpop.f32.mrf.mxu1 }
 0x267   : > { %8432 = vst.msk [vmem:[%s11277_s21 + $0x620] sm:$0xff] %vm1259_vm0, %v6691_v20  ;;  %v10284_v21 = vpop.f32.mrf.mxu0 }
 0x268   : > { %8431 = vst.msk [vmem:[%s11277_s21 + $0x618] sm:$0xff] %vm1259_vm0, %v10284_v21  ;;  %v10298_v22 = vpop.f32.mrf.mxu1 }
 0x269   : > { %8435 = vst.msk [vmem:[%s11277_s21 + $0x638] sm:$0xff] %vm1259_vm0, %v10298_v22  ;;  %v6592_v23 = vpop.f32.mrf.mxu0 }
 0x26a   : > { %8430 = vst.msk [vmem:[%s11277_s21 + $0x610] sm:$0xff] %vm1259_vm0, %v6592_v23  ;;  %v6701_v24 = vpop.f32.mrf.mxu1 }
 0x26b   : > { %8434 = vst.msk [vmem:[%s11277_s21 + $0x630] sm:$0xff] %vm1259_vm0, %v6701_v24 }
 0x273   : > { %v10309_v14 = vpop.f32.mrf.mxu0 }
 0x274   : > { %8437 = vst.msk [vmem:[%s11277_s21 + $0x648] sm:$0xff] %vm1259_vm0, %v10309_v14  ;;  %v10323_v25 = vpop.f32.mrf.mxu1 }
 0x275   : > { %8441 = vst.msk [vmem:[%s11277_s21 + $0x668] sm:$0xff] %vm1259_vm0, %v10323_v25  ;;  %v6800_v26 = vpop.f32.mrf.mxu0 }
 0x276   : > { %8436 = vst.msk [vmem:[%s11277_s21 + $0x640] sm:$0xff] %vm1259_vm0, %v6800_v26  ;;  %v6909_v27 = vpop.f32.mrf.mxu1 }
 0x277   : > { %8440 = vst.msk [vmem:[%s11277_s21 + $0x660] sm:$0xff] %vm1259_vm0, %v6909_v27  ;;  %v10312_v28 = vpop.f32.mrf.mxu0 }
 0x278   : > { %8439 = vst.msk [vmem:[%s11277_s21 + $0x658] sm:$0xff] %vm1259_vm0, %v10312_v28  ;;  %v10326_v29 = vpop.f32.mrf.mxu1 }
 0x279   : > { %8443 = vst.msk [vmem:[%s11277_s21 + $0x678] sm:$0xff] %vm1259_vm0, %v10326_v29  ;;  %v6810_v30 = vpop.f32.mrf.mxu0 }
 0x27a   : > { %8438 = vst.msk [vmem:[%s11277_s21 + $0x650] sm:$0xff] %vm1259_vm0, %v6810_v30  ;;  %v6919_v31 = vpop.f32.mrf.mxu1 }
 0x27b   : > { %8442 = vst.msk [vmem:[%s11277_s21 + $0x670] sm:$0xff] %vm1259_vm0, %v6919_v31 }
 0x283   : > { %v10337_v32 = vpop.f32.mrf.mxu0 }
 0x284   : > { %8445 = vst.msk [vmem:[%s11277_s21 + $0x688] sm:$0xff] %vm1259_vm0, %v10337_v32  ;;  %v10351_v33 = vpop.f32.mrf.mxu1 }
 0x285   : > { %8449 = vst.msk [vmem:[%s11277_s21 + $0x6a8] sm:$0xff] %vm1259_vm0, %v10351_v33  ;;  %v7018_v34 = vpop.f32.mrf.mxu0 }
 0x286   : > { %8444 = vst.msk [vmem:[%s11277_s21 + $0x680] sm:$0xff] %vm1259_vm0, %v7018_v34  ;;  %v7127_v35 = vpop.f32.mrf.mxu1 }
 0x287   : > { %8448 = vst.msk [vmem:[%s11277_s21 + $0x6a0] sm:$0xff] %vm1259_vm0, %v7127_v35  ;;  %v10340_v36 = vpop.f32.mrf.mxu0 }
 0x288   : > { %8447 = vst.msk [vmem:[%s11277_s21 + $0x698] sm:$0xff] %vm1259_vm0, %v10340_v36  ;;  %v10354_v37 = vpop.f32.mrf.mxu1 }
 0x289   : > { %8451 = vst.msk [vmem:[%s11277_s21 + $0x6b8] sm:$0xff] %vm1259_vm0, %v10354_v37  ;;  %v7028_v38 = vpop.f32.mrf.mxu0 }
 0x28a   : > { %8446 = vst.msk [vmem:[%s11277_s21 + $0x690] sm:$0xff] %vm1259_vm0, %v7028_v38  ;;  %v7137_v39 = vpop.f32.mrf.mxu1 }
 0x28b   : > { %8450 = vst.msk [vmem:[%s11277_s21 + $0x6b0] sm:$0xff] %vm1259_vm0, %v7137_v39 }
 0x293   : > { %v10365_v40 = vpop.f32.mrf.mxu0 }
 0x294   : > { %8453 = vst.msk [vmem:[%s11277_s21 + $0x6c8] sm:$0xff] %vm1259_vm0, %v10365_v40  ;;  %v10379_v41 = vpop.f32.mrf.mxu1 }
 0x295   : > { %8457 = vst.msk [vmem:[%s11277_s21 + $0x6e8] sm:$0xff] %vm1259_vm0, %v10379_v41  ;;  %v7236_v42 = vpop.f32.mrf.mxu0 }
 0x296   : > { %8452 = vst.msk [vmem:[%s11277_s21 + $0x6c0] sm:$0xff] %vm1259_vm0, %v7236_v42  ;;  %v7345_v43 = vpop.f32.mrf.mxu1 }
 0x297   : > { %8456 = vst.msk [vmem:[%s11277_s21 + $0x6e0] sm:$0xff] %vm1259_vm0, %v7345_v43  ;;  %v10368_v44 = vpop.f32.mrf.mxu0 }
 0x298   : > { %8455 = vst.msk [vmem:[%s11277_s21 + $0x6d8] sm:$0xff] %vm1259_vm0, %v10368_v44  ;;  %v10382_v45 = vpop.f32.mrf.mxu1 }
 0x299   : > { %8459 = vst.msk [vmem:[%s11277_s21 + $0x6f8] sm:$0xff] %vm1259_vm0, %v10382_v45  ;;  %v7246_v46 = vpop.f32.mrf.mxu0 }
 0x29a   : > { %8454 = vst.msk [vmem:[%s11277_s21 + $0x6d0] sm:$0xff] %vm1259_vm0, %v7246_v46  ;;  %v7355_v47 = vpop.f32.mrf.mxu1 }
 0x29b   : > { %8458 = vst.msk [vmem:[%s11277_s21 + $0x6f0] sm:$0xff] %vm1259_vm0, %v7355_v47 }
 0x2a3   : > { %v10393_v48 = vpop.f32.mrf.mxu0 }
 0x2a4   : > { %8461 = vst.msk [vmem:[%s11277_s21 + $0x708] sm:$0xff] %vm1259_vm0, %v10393_v48  ;;  %v10407_v49 = vpop.f32.mrf.mxu1 }
 0x2a5   : > { %8465 = vst.msk [vmem:[%s11277_s21 + $0x728] sm:$0xff] %vm1259_vm0, %v10407_v49  ;;  %v7454_v50 = vpop.f32.mrf.mxu0 }
 0x2a6   : > { %8460 = vst.msk [vmem:[%s11277_s21 + $0x700] sm:$0xff] %vm1259_vm0, %v7454_v50  ;;  %v7563_v51 = vpop.f32.mrf.mxu1 }
 0x2a7   : > { %8464 = vst.msk [vmem:[%s11277_s21 + $0x720] sm:$0xff] %vm1259_vm0, %v7563_v51  ;;  %v10396_v52 = vpop.f32.mrf.mxu0 }
 0x2a8   : > { %8463 = vst.msk [vmem:[%s11277_s21 + $0x718] sm:$0xff] %vm1259_vm0, %v10396_v52  ;;  %v10410_v53 = vpop.f32.mrf.mxu1 }
 0x2a9   : > { %8467 = vst.msk [vmem:[%s11277_s21 + $0x738] sm:$0xff] %vm1259_vm0, %v10410_v53  ;;  %v7464_v54 = vpop.f32.mrf.mxu0 }
 0x2aa   : > { %8462 = vst.msk [vmem:[%s11277_s21 + $0x710] sm:$0xff] %vm1259_vm0, %v7464_v54  ;;  %v7573_v55 = vpop.f32.mrf.mxu1 }
 0x2ab   : > { %8466 = vst.msk [vmem:[%s11277_s21 + $0x730] sm:$0xff] %vm1259_vm0, %v7573_v55 }
 0x2b3   : > { %v10421_v56 = vpop.f32.mrf.mxu0 }
 0x2b4   : > { %8469 = vst.msk [vmem:[%s11277_s21 + $0x748] sm:$0xff] %vm1259_vm0, %v10421_v56  ;;  %v10435_v57 = vpop.f32.mrf.mxu1 }
 0x2b5   : > { %8473 = vst.msk [vmem:[%s11277_s21 + $0x768] sm:$0xff] %vm1259_vm0, %v10435_v57  ;;  %v7672_v58 = vpop.f32.mrf.mxu0 }
 0x2b6   : > { %8468 = vst.msk [vmem:[%s11277_s21 + $0x740] sm:$0xff] %vm1259_vm0, %v7672_v58  ;;  %v7781_v59 = vpop.f32.mrf.mxu1 }
 0x2b7   : > { %8472 = vst.msk [vmem:[%s11277_s21 + $0x760] sm:$0xff] %vm1259_vm0, %v7781_v59  ;;  %v10424_v60 = vpop.f32.mrf.mxu0 }
 0x2b8   : > { %8471 = vst.msk [vmem:[%s11277_s21 + $0x758] sm:$0xff] %vm1259_vm0, %v10424_v60  ;;  %v10438_v61 = vpop.f32.mrf.mxu1 }
 0x2b9   : > { %8475 = vst.msk [vmem:[%s11277_s21 + $0x778] sm:$0xff] %vm1259_vm0, %v10438_v61  ;;  %v7682_v62 = vpop.f32.mrf.mxu0 }
 0x2ba   : > { %8470 = vst.msk [vmem:[%s11277_s21 + $0x750] sm:$0xff] %vm1259_vm0, %v7682_v62  ;;  %v7791_v63 = vpop.f32.mrf.mxu1 }
 0x2bb   : > { %8474 = vst.msk [vmem:[%s11277_s21 + $0x770] sm:$0xff] %vm1259_vm0, %v7791_v63 }
 0x2c3   : > { %v10449_v0 = vpop.f32.mrf.mxu0 }
 0x2c4   : > { %8477 = vst.msk [vmem:[%s11277_s21 + $0x788] sm:$0xff] %vm1259_vm0, %v10449_v0  ;;  %v10463_v1 = vpop.f32.mrf.mxu1 }
 0x2c5   : > { %8481 = vst.msk [vmem:[%s11277_s21 + $0x7a8] sm:$0xff] %vm1259_vm0, %v10463_v1  ;;  %v7890_v2 = vpop.f32.mrf.mxu0 }
 0x2c6   : > { %8476 = vst.msk [vmem:[%s11277_s21 + $0x780] sm:$0xff] %vm1259_vm0, %v7890_v2  ;;  %v7999_v3 = vpop.f32.mrf.mxu1 }
 0x2c7   : > { %8480 = vst.msk [vmem:[%s11277_s21 + $0x7a0] sm:$0xff] %vm1259_vm0, %v7999_v3  ;;  %v10452_v4 = vpop.f32.mrf.mxu0 }
 0x2c8   : > { %8479 = vst.msk [vmem:[%s11277_s21 + $0x798] sm:$0xff] %vm1259_vm0, %v10452_v4  ;;  %v10466_v5 = vpop.f32.mrf.mxu1 }
 0x2c9   : > { %8483 = vst.msk [vmem:[%s11277_s21 + $0x7b8] sm:$0xff] %vm1259_vm0, %v10466_v5  ;;  %v7900_v6 = vpop.f32.mrf.mxu0 }
 0x2ca   : > { %8478 = vst.msk [vmem:[%s11277_s21 + $0x790] sm:$0xff] %vm1259_vm0, %v7900_v6  ;;  %v8009_v7 = vpop.f32.mrf.mxu1 }
 0x2cb   : > { %8482 = vst.msk [vmem:[%s11277_s21 + $0x7b0] sm:$0xff] %vm1259_vm0, %v8009_v7 }
 0x2d3   : > { %v10477_v8 = vpop.f32.mrf.mxu0 }
 0x2d4   : > { %8485 = vst.msk [vmem:[%s11277_s21 + $0x7c8] sm:$0xff] %vm1259_vm0, %v10477_v8  ;;  %v10491_v9 = vpop.f32.mrf.mxu1 }
 0x2d5   : > { %8489 = vst.msk [vmem:[%s11277_s21 + $0x7e8] sm:$0xff] %vm1259_vm0, %v10491_v9  ;;  %v8108_v10 = vpop.f32.mrf.mxu0 }
 0x2d6   : > { %8484 = vst.msk [vmem:[%s11277_s21 + $0x7c0] sm:$0xff] %vm1259_vm0, %v8108_v10  ;;  %v8217_v11 = vpop.f32.mrf.mxu1 }
 0x2d7   : > { %8488 = vst.msk [vmem:[%s11277_s21 + $0x7e0] sm:$0xff] %vm1259_vm0, %v8217_v11  ;;  %v10480_v12 = vpop.f32.mrf.mxu0 }
 0x2d8   : > { %8487 = vst.msk [vmem:[%s11277_s21 + $0x7d8] sm:$0xff] %vm1259_vm0, %v10480_v12  ;;  %v10494_v13 = vpop.f32.mrf.mxu1 }
 0x2d9   : > { %8491 = vst.msk [vmem:[%s11277_s21 + $0x7f8] sm:$0xff] %vm1259_vm0, %v10494_v13  ;;  %v8118_v15 = vpop.f32.mrf.mxu0 }
 0x2da   : > { %8486 = vst.msk [vmem:[%s11277_s21 + $0x7d0] sm:$0xff] %vm1259_vm0, %v8118_v15  ;;  %v8227_v16 = vpop.f32.mrf.mxu1 }
 0x2db   : > { %8490 = vst.msk [vmem:[%s11277_s21 + $0x7f0] sm:$0xff] %vm1259_vm0, %v8227_v16 }
 0x2dc PF: > { %s12_s9 = sadd.s32 1, %s10637_s9  }
 0x2dd   : > { %p9_p4 = scmp.ge.s32.totalorder %s12_s9, 4  }
 0x2df   :  { %11 = sbr.rel (!%p9_p4) target bundleno = 1 (0x1), region = 61 }

</bundles_post_ra>
